<compile_context>
chip_gen: v7x
topology: tpu7x:2x2x1
jax: 0.10.0
libtpu: 0.0.40
codegen_flags: <defaults>
</compile_context>

<pallas_src>
import jax
import jax.numpy as jnp
from jax.experimental import pallas as pl
from jax.experimental.pallas import tpu as pltpu

jax.config.update("jax_default_matmul_precision", "highest")  # keep f32 parity with the ref

# ---- shapes (small, consistent with the module) -----------------------------
B, C_IN, H, W = 2, 4, 16, 16
C_FEAT = 64                  # "in_features" of the classifier / g_layer
NUM_CLASSES = 10
G_HIDDEN = 512               # default g_layer hidden width from GNet.from_model
BN_EPS = 1e-5
OUT_W = 128                  # lane-dense output slab: [ y (10) | g (1) | zero-pad ]
KTAPS = 9 * C_IN             # im2col contraction dim (36)
KPAD = 64                    # contraction dim zero-padded for alignment
HEADS_W = OUT_W + G_HIDDEN   # fused head width: 128 + 512 = 640
BHW = B * H * W              # 512

# misc slab row layout
ROW_BCONV = B                # conv bias, cols [:C_FEAT]
ROW_BHEADS = B + 1           # fused head bias, cols [:HEADS_W]
ROW_W2 = B + 2               # BN-folded g2 weight row [:G_HIDDEN], scalar bias at col G_HIDDEN
ROW_GMASK = B + 3            # one-hot mask at column NUM_CLASSES, cols [:OUT_W]
MISC_ROWS = 8

_VMEM = pl.BlockSpec(memory_space=pltpu.MemorySpace.VMEM)
_HIGH = jax.lax.Precision.HIGHEST


# ---- fused kernel: conv backbone + pooling + both heads ----------------------
def gnet_kernel(patches_ref, wconv_ref, wheads_ref, misc_ref, out_ref):
    # patches_ref: (B*H*W, KPAD)    wconv_ref: (KPAD, C_FEAT)
    # wheads_ref : (C_FEAT, HEADS_W) = [ classifier (padded to 128) | g1 (512) ]
    # misc_ref   : (8, HEADS_W) slab, see ROW_* layout above
    # out_ref    : (B, OUT_W) slab; cols [0:NUM_CLASSES] = y, col NUM_CLASSES = g
    misc = misc_ref[...]
    pool = misc[:B, :BHW]                                       # (B, B*H*W), block-diag * 1/(H*W)
    bconv = misc[ROW_BCONV:ROW_BCONV + 1, :C_FEAT]              # (1, C_FEAT)
    bheads = misc[ROW_BHEADS:ROW_BHEADS + 1, :]                 # (1, HEADS_W)
    w2 = misc[ROW_W2:ROW_W2 + 1, :G_HIDDEN]                     # (1, G_HIDDEN)  BN-folded
    b2 = misc[ROW_W2:ROW_W2 + 1, G_HIDDEN:G_HIDDEN + 1]         # (1, 1)         BN-folded
    gmask = misc[ROW_GMASK:ROW_GMASK + 1, :OUT_W]               # (1, OUT_W) one-hot @ NUM_CLASSES

    # "features": 3x3 conv as one im2col matmul -> bias -> ReLU
    acc = jnp.dot(patches_ref[...], wconv_ref[...],
                  preferred_element_type=jnp.float32, precision=_HIGH)      # (B*H*W, C_FEAT)
    acc = jnp.maximum(acc + bconv, 0.0)

    # global average pool as an MXU matmul (folds the 1/(H*W) scale)
    z = jnp.dot(pool, acc, preferred_element_type=jnp.float32, precision=_HIGH)  # (B, C_FEAT)

    # fused heads: one matmul produces [ classifier slab | g1 pre-activation ]
    heads = jnp.dot(z, wheads_ref[...],
                    preferred_element_type=jnp.float32, precision=_HIGH) + bheads  # (B, HEADS_W)
    y_slab = heads[:, :OUT_W]                                   # (B, OUT_W)
    h = jnp.maximum(heads[:, OUT_W:], 0.0)                      # (B, G_HIDDEN)

    # g2 projection: VPU multiply + cross-lane sum (no N=1 MXU matmul), then sigmoid
    logit = jnp.sum(h * w2, axis=-1, keepdims=True) + b2        # (B, 1)
    g = jax.nn.sigmoid(logit)

    # Single lane-dense store. Invariant (held by construction in pack_params): column
    # NUM_CLASSES of the classifier block of wheads/bheads is exactly zero, so adding
    # g * one_hot(NUM_CLASSES) is exact.
    out_ref[...] = y_slab + g * gmask


# ---- parameters ---------------------------------------------------------------
def init_params(key):
    """PyTorch-layout parameters (as the nn.Module would hold them)."""
    ks = jax.random.split(key, 8)
    return {
        "conv_w": jax.random.normal(ks[0], (C_FEAT, C_IN, 3, 3), jnp.float32) * 0.05,  # OIHW
        "conv_b": jax.random.normal(ks[1], (C_FEAT,), jnp.float32) * 0.05,
        "cls_w": jax.random.normal(ks[2], (NUM_CLASSES, C_FEAT), jnp.float32) * 0.05,  # (out,in)
        "cls_b": jax.random.normal(ks[3], (NUM_CLASSES,), jnp.float32) * 0.05,
        "g1_w": jax.random.normal(ks[4], (G_HIDDEN, C_FEAT), jnp.float32) * 0.05,
        "g1_b": jax.random.normal(ks[5], (G_HIDDEN,), jnp.float32) * 0.05,
        "bn_gamma": jnp.ones((G_HIDDEN,), jnp.float32),
        "bn_beta": jnp.zeros((G_HIDDEN,), jnp.float32),
        "bn_mean": jnp.zeros((G_HIDDEN,), jnp.float32),
        "bn_var": jnp.ones((G_HIDDEN,), jnp.float32),
        "g2_w": jax.random.normal(ks[6], (1, G_HIDDEN), jnp.float32) * 0.05,
        "g2_b": jax.random.normal(ks[7], (1,), jnp.float32) * 0.05,
    }


def pack_params(p):
    """One-time conversion to kernel layout: transposes, padding, BN folding, input packing."""
    assert BHW <= HEADS_W and B + 4 <= MISC_ROWS and NUM_CLASSES + 1 <= OUT_W

    # conv OIHW -> (C_IN, kh, kw, C_FEAT) -> (9*C_IN, C_FEAT); channel-major tap order
    # matches lax.conv_general_dilated_patches. Zero-pad K 36 -> 64.
    wconv = jnp.transpose(p["conv_w"], (1, 2, 3, 0)).reshape(KTAPS, C_FEAT)
    wconv_pad = jnp.zeros((KPAD, C_FEAT), jnp.float32).at[:KTAPS].set(wconv)

    # fused head weight/bias: [ classifier (zero-padded to 128 lanes) | g1 (512 lanes) ].
    # Columns NUM_CLASSES..OUT_W-1 stay exactly zero -> the g epilogue add is exact.
    w_heads = jnp.zeros((C_FEAT, HEADS_W), jnp.float32)
    w_heads = w_heads.at[:, :NUM_CLASSES].set(p["cls_w"].T)
    w_heads = w_heads.at[:, OUT_W:].set(p["g1_w"].T)
    b_heads = jnp.zeros((HEADS_W,), jnp.float32)
    b_heads = b_heads.at[:NUM_CLASSES].set(p["cls_b"])
    b_heads = b_heads.at[OUT_W:].set(p["g1_b"])

    # Fold BatchNorm1d (eval) into the g2 linear:  BN(h) = (h - mean)*s + beta,
    #   s = gamma * rsqrt(var + eps)
    #   logit = BN(h) @ w2.T + b2 = h @ (s*w2).T + (beta - mean*s) @ w2.T + b2
    s = p["bn_gamma"] * jax.lax.rsqrt(p["bn_var"] + BN_EPS)
    w2_row = p["g2_w"][0] * s
    b2 = p["g2_b"][0] + jnp.dot(p["bn_beta"] - p["bn_mean"] * s, p["g2_w"][0])

    # block-diagonal average-pool matrix: row b has 1/(H*W) over columns [b*H*W, (b+1)*H*W)
    pool = jnp.repeat(jnp.eye(B, dtype=jnp.float32), H * W, axis=1) / float(H * W)

    # pack all small tensors into one (8, HEADS_W) misc slab (single DMA)
    misc = jnp.zeros((MISC_ROWS, HEADS_W), jnp.float32)
    misc = misc.at[:B, :BHW].set(pool)
    misc = misc.at[ROW_BCONV, :C_FEAT].set(p["conv_b"])
    misc = misc.at[ROW_BHEADS, :].set(b_heads)
    misc = misc.at[ROW_W2, :G_HIDDEN].set(w2_row)
    misc = misc.at[ROW_W2, G_HIDDEN].set(b2)
    misc = misc.at[ROW_GMASK, NUM_CLASSES].set(1.0)   # one-hot g mask
    return {"wconv": wconv_pad, "w_heads": w_heads, "misc": misc}


# ---- forward ------------------------------------------------------------------
@jax.jit
def gnet_forward(x_nchw, kp):
    # single fused patch-extraction op (channel-major tap order, NHWC out), then one
    # reshape + one alignment pad -> (B*H*W, KPAD)
    patches = jax.lax.conv_general_dilated_patches(
        x_nchw, filter_shape=(3, 3), window_strides=(1, 1), padding="SAME",
        dimension_numbers=("NCHW", "OIHW", "NHWC"))              # (B, H, W, 9*C_IN)
    patches = patches.reshape(BHW, KTAPS)
    patches = jnp.pad(patches, ((0, 0), (0, KPAD - KTAPS)))

    out_slab = pl.pallas_call(
        gnet_kernel,
        out_shape=jax.ShapeDtypeStruct((B, OUT_W), jnp.float32),
        in_specs=[_VMEM, _VMEM, _VMEM, _VMEM],
        out_specs=_VMEM,
    )(patches, kp["wconv"], kp["w_heads"], kp["misc"])

    y = out_slab[:, :NUM_CLASSES]
    g = out_slab[:, NUM_CLASSES:NUM_CLASSES + 1]
    return y, g


# ---- reference in plain JAX (sanity check, PyTorch-layout params) --------------
def gnet_ref(x_nchw, p):
    x = jnp.transpose(x_nchw, (0, 2, 3, 1))
    conv_w = jnp.transpose(p["conv_w"], (2, 3, 1, 0))
    feat = jax.lax.conv_general_dilated(
        x, conv_w, (1, 1), "SAME", dimension_numbers=("NHWC", "HWIO", "NHWC"),
        precision=_HIGH)
    feat = jnp.maximum(feat + p["conv_b"], 0.0)
    z = feat.mean(axis=(1, 2))
    y = z @ p["cls_w"].T + p["cls_b"]
    h = jnp.maximum(z @ p["g1_w"].T + p["g1_b"], 0.0)
    h = (h - p["bn_mean"]) * jax.lax.rsqrt(p["bn_var"] + BN_EPS) * p["bn_gamma"] + p["bn_beta"]
    g = jax.nn.sigmoid(h @ p["g2_w"].T + p["g2_b"])
    return y, g


if __name__ == "__main__":
    key = jax.random.PRNGKey(0)
    kx, kparam = jax.random.split(key)
    x = jax.random.normal(kx, (B, C_IN, H, W), jnp.float32)   # PyTorch NCHW input
    params = init_params(kparam)
    kernel_params = pack_params(params)                       # one-time, outside the jit

    y, g = gnet_forward(x, kernel_params)
    jax.block_until_ready((y, g))

    y_ref, g_ref = gnet_ref(x, params)
    assert y.shape == (B, NUM_CLASSES) and g.shape == (B, 1)
    assert jnp.allclose(y, y_ref, atol=1e-4, rtol=1e-4)
    assert jnp.allclose(g, g_ref, atol=1e-4, rtol=1e-4)
    print("KERNEL_OK")
</pallas_src>

<mosaic_0001>
module attributes {stable_mosaic.version = 11 : i64} {
  func.func @gnet_kernel(%arg0: memref<512x64xf32, #tpu.memory_space<vmem>>, %arg1: memref<64x64xf32, #tpu.memory_space<vmem>>, %arg2: memref<64x640xf32, #tpu.memory_space<vmem>>, %arg3: memref<8x640xf32, #tpu.memory_space<vmem>>, %arg4: memref<2x128xf32, #tpu.memory_space<vmem>>) attributes {dimension_semantics = [], scalar_prefetch = 0 : i64, scratch_operands = 0 : i64, tpu.core_type = #tpu.core_type<tc>} {
    %c0 = arith.constant 0 : index
    %c0_0 = arith.constant 0 : index
    %0 = vector.load %arg3[%c0, %c0_0] : memref<8x640xf32, #tpu.memory_space<vmem>>, vector<8x640xf32>
    %1 = vector.extract_strided_slice %0 {offsets = [0, 0], sizes = [2, 512], strides = [1, 1]} : vector<8x640xf32> to vector<2x512xf32>
    %2 = vector.extract_strided_slice %0 {offsets = [2, 0], sizes = [1, 64], strides = [1, 1]} : vector<8x640xf32> to vector<1x64xf32>
    %3 = vector.extract_strided_slice %0 {offsets = [3, 0], sizes = [1, 640], strides = [1, 1]} : vector<8x640xf32> to vector<1x640xf32>
    %4 = vector.extract_strided_slice %0 {offsets = [4, 0], sizes = [1, 512], strides = [1, 1]} : vector<8x640xf32> to vector<1x512xf32>
    %5 = vector.extract_strided_slice %0 {offsets = [4, 512], sizes = [1, 1], strides = [1, 1]} : vector<8x640xf32> to vector<1x1xf32>
    %6 = vector.extract_strided_slice %0 {offsets = [5, 0], sizes = [1, 128], strides = [1, 1]} : vector<8x640xf32> to vector<1x128xf32>
    %c0_1 = arith.constant 0 : index
    %c0_2 = arith.constant 0 : index
    %7 = vector.load %arg0[%c0_1, %c0_2] : memref<512x64xf32, #tpu.memory_space<vmem>>, vector<512x64xf32>
    %c0_3 = arith.constant 0 : index
    %c0_4 = arith.constant 0 : index
    %8 = vector.load %arg1[%c0_3, %c0_4] : memref<64x64xf32, #tpu.memory_space<vmem>>, vector<64x64xf32>
    %cst = arith.constant dense<0.000000e+00> : vector<512x64xf32>
    %9 = tpu.matmul %7, %8, %cst {dimension_numbers = #tpu.dot_dimension_numbers<[1], [0], [0], [1], [0, 0, 1, 1], [], []>, precision = #tpu.contract_precision<fp32>} : vector<512x64xf32>, vector<64x64xf32>, vector<512x64xf32> -> vector<512x64xf32>
    %10 = vector.broadcast %2 : vector<1x64xf32> to vector<512x64xf32>
    %11 = arith.addf %9, %10 : vector<512x64xf32>
    %cst_5 = arith.constant 0.000000e+00 : f32
    %12 = vector.broadcast %cst_5 : f32 to vector<512x64xf32>
    %13 = arith.maximumf %11, %12 : vector<512x64xf32>
    %cst_6 = arith.constant dense<0.000000e+00> : vector<2x64xf32>
    %14 = tpu.matmul %1, %13, %cst_6 {dimension_numbers = #tpu.dot_dimension_numbers<[1], [0], [0], [1], [0, 0, 1, 1], [], []>, precision = #tpu.contract_precision<fp32>} : vector<2x512xf32>, vector<512x64xf32>, vector<2x64xf32> -> vector<2x64xf32>
    %c0_7 = arith.constant 0 : index
    %c0_8 = arith.constant 0 : index
    %15 = vector.load %arg2[%c0_7, %c0_8] : memref<64x640xf32, #tpu.memory_space<vmem>>, vector<64x640xf32>
    %cst_9 = arith.constant dense<0.000000e+00> : vector<2x640xf32>
    %16 = tpu.matmul %14, %15, %cst_9 {dimension_numbers = #tpu.dot_dimension_numbers<[1], [0], [0], [1], [0, 0, 1, 1], [], []>, precision = #tpu.contract_precision<fp32>} : vector<2x64xf32>, vector<64x640xf32>, vector<2x640xf32> -> vector<2x640xf32>
    %17 = vector.broadcast %3 : vector<1x640xf32> to vector<2x640xf32>
    %18 = arith.addf %16, %17 : vector<2x640xf32>
    %19 = vector.extract_strided_slice %18 {offsets = [0, 0], sizes = [2, 128], strides = [1, 1]} : vector<2x640xf32> to vector<2x128xf32>
    %20 = vector.extract_strided_slice %18 {offsets = [0, 128], sizes = [2, 512], strides = [1, 1]} : vector<2x640xf32> to vector<2x512xf32>
    %cst_10 = arith.constant 0.000000e+00 : f32
    %21 = vector.broadcast %cst_10 : f32 to vector<2x512xf32>
    %22 = arith.maximumf %20, %21 : vector<2x512xf32>
    %23 = vector.broadcast %4 : vector<1x512xf32> to vector<2x512xf32>
    %24 = arith.mulf %22, %23 : vector<2x512xf32>
    %cst_11 = arith.constant dense<0.000000e+00> : vector<2xf32>
    %25 = vector.multi_reduction <add>, %24, %cst_11 [1] : vector<2x512xf32> to vector<2xf32>
    %26 = vector.shape_cast %25 : vector<2xf32> to vector<2x1xf32>
    %27 = vector.broadcast %5 : vector<1x1xf32> to vector<2x1xf32>
    %28 = arith.addf %26, %27 : vector<2x1xf32>
    %29 = arith.negf %28 : vector<2x1xf32>
    %30 = math.exp %29 : vector<2x1xf32>
    %cst_12 = arith.constant 1.000000e+00 : f32
    %31 = vector.broadcast %cst_12 : f32 to vector<2x1xf32>
    %32 = arith.addf %31, %30 : vector<2x1xf32>
    %33 = arith.divf %31, %32 : vector<2x1xf32>
    %34 = vector.broadcast %33 : vector<2x1xf32> to vector<2x128xf32>
    %35 = vector.broadcast %6 : vector<1x128xf32> to vector<2x128xf32>
    %36 = arith.mulf %34, %35 : vector<2x128xf32>
    %37 = arith.addf %19, %36 : vector<2x128xf32>
    %c0_13 = arith.constant 0 : index
    %c0_14 = arith.constant 0 : index
    %38 = vector.load %arg4[%c0_13, %c0_14] : memref<2x128xf32, #tpu.memory_space<vmem>>, vector<2x128xf32>
    tpu.vector_store %arg4[%c0_13, %c0_14], %37 {strides = array<i32>} : memref<2x128xf32, #tpu.memory_space<vmem>>, vector<2x128xf32>,
    return
  }
}

</mosaic_0001>

<bundles_post_ra>
// kernel: gnet_forward.1
= control target key start
LH: loop header
LB: loop body
LE: loop exit
PB: predicated region body
PF: predicated region fallthrough
CT: control target
= control target key end

     0   :  { %vm98_vm0 = vcmask 523264   ;;  %vm10159_vm1 = vmmov 0   ;;  %vm7243_vm2 = vcmask 1041408   ;;  %s13720_s1 = inlined_call_operand.vmem [shape: f32[64,64], index: 1, kind: input, shape index: {}]   ;;  %s13721_s0 = inlined_call_operand.vmem [shape: f32[512,64], index: 0, kind: input, shape index: {}]   ;;  %s13722_s3 = inlined_call_operand.vmem [shape: f32[8,640], index: 3, kind: input, shape index: {}]   ;;  %s13723_s2 = inlined_call_operand.vmem [shape: f32[64,640], index: 2, kind: input, shape index: {}]   ;;  %s13724_s4 = inlined_call_operand.vmem [shape: f32[2,128], index: 4, kind: output, shape index: {}]  }
   0x1   :  { %v10189_v0 = vld [vmem:[%s13720_s1] sm:$0xff]  ;;  %v10194_v1 = vld [vmem:[%s13720_s1 + $0x8] sm:$0xff]  ;;  %v10199_v2 = vld [vmem:[%s13720_s1 + $0x10] sm:$0xff] }
   0x2   :  { %v292_v3 = vand.u32 4294901760, %v10189_v0  ;;  %v295_v4 = vand.u32 4294901760, %v10194_v1  ;;  %v10206_v5 = vld [vmem:[%s13720_s1 + $0x18] sm:$0xff]  ;;  %v13741_v6 = vand.u32 4294901760, %v10199_v2  ;;  %v10212_v7 = vld [vmem:[%s13720_s1 + $0x20] sm:$0xff]  ;;  %v10217_v8 = vld [vmem:[%s13720_s1 + $0x28] sm:$0xff] }
   0x3   :  { %v13740_v9 = vand.u32 4294901760, %v10206_v5  ;;  %v13739_v10 = vand.u32 4294901760, %v10212_v7  ;;  %v13737_v11 = vand.u32 4294901760, %v10217_v8  ;;  %v10225_v12 = vld [vmem:[%s13720_s1 + $0x30] sm:$0xff]  ;;  %v10230_v13 = vld [vmem:[%s13720_s1 + $0x38] sm:$0xff]  ;;  %v22_v14 = vld [vmem:[%s13721_s0] sm:$0xff] }
   0x4   :  { %v10239_v15 = vpack.c.bf16 %v295_v4, %v292_v3  ;;  %v13735_v16 = vand.u32 4294901760, %v10225_v12  ;;  %v100_v17 = vsel %vm98_vm0, %v22_v14, 0  ;;  %v23_v18 = vld [vmem:[%s13721_s0 + $0x8] sm:$0xff]  ;;  %v24_v19 = vld [vmem:[%s13721_s0 + $0x10] sm:$0xff]  ;;  %v25_v20 = vld [vmem:[%s13721_s0 + $0x18] sm:$0xff]  ;;  %v13734_v22 = vand.u32 4294901760, %v10230_v13 }
   0x5   :  { %v10256_v21 = vpack.c.bf16 %v13740_v9, %v13741_v6  ;;  %v10259_v23 = vand.u32 4294901760, %v100_v17  ;;  %v103_v24 = vsel %vm98_vm0, %v23_v18, 0  ;;  %v26_v25 = vld [vmem:[%s13721_s0 + $0x20] sm:$0xff]  ;;  %v27_v26 = vld [vmem:[%s13721_s0 + $0x28] sm:$0xff]  ;;  %v28_v27 = vld [vmem:[%s13721_s0 + $0x30] sm:$0xff]  ;;  %v10276_v28 = vpack.c.bf16 %v13737_v11, %v13739_v10 }
   0x6   :  { %14195 = vst [vmem:[#allocation2_spill] sm:$0xff] %v10239_v15  ;;  %8974 = vmatprep.subr.bf16.mxu0 %v10239_v15  ;;  %v10278_v29 = vand.u32 4294901760, %v103_v24  ;;  %v106_v30 = vsel %vm98_vm0, %v24_v19, 0  ;;  %v109_v31 = vsel %vm98_vm0, %v25_v20, 0  ;;  %9717 = vmatprep.subr.bf16.mxu1 %v10239_v15  ;;  %v112_v35 = vsel %vm98_vm0, %v26_v25, 0  ;;  %v29_v36 = vld [vmem:[%s13721_s0 + $0x38] sm:$0xff] }
   0x7   :  { %14196 = vst [vmem:[#allocation3_spill] sm:$0xff] %v10256_v21  ;;  %14197 = vst [vmem:[#allocation4_spill] sm:$0xff] %v10259_v23  ;;  %8976 = vmatpush3.bf16.msra.mxu0 %v10239_v15  ;;  %v10285_v32 = vsub.f32 %v100_v17, %v10259_v23  ;;  %v10287_v33 = vand.u32 4294901760, %v106_v30  ;;  %v10289_v34 = vand.u32 4294901760, %v109_v31  ;;  %9721 = vmatpush3.bf16.msra.mxu1 %v10239_v15  ;;  %v10300_v38 = vand.u32 4294901760, %v112_v35  ;;  %v30_v55 = vld [vmem:[%s13721_s0 + $0x40] sm:$0xff] }
   0x8   :  { %14198 = vst [vmem:[#allocation5_spill] sm:$0xff] %v10276_v28  ;;  %14199 = vst [vmem:[#allocation6_spill] sm:$0xff] %v10278_v29  ;;  %8978 = vmatprep.subr.bf16.mxu0 %v10256_v21  ;;  %v10298_v37 = vsub.f32 %v103_v24, %v10278_v29  ;;  %v115_v39 = vsel %vm98_vm0, %v27_v26, 0  ;;  %v118_v40 = vsel %vm98_vm0, %v28_v27, 0  ;;  %9718 = vmatprep.subr.bf16.mxu1 %v10256_v21  ;;  %v121_v48 = vsel %vm98_vm0, %v29_v36, 0  ;;  %v31_v60 = vld [vmem:[%s13721_s0 + $0x48] sm:$0xff] }
   0x9   :  { %14200 = vst [vmem:[#allocation7_spill] sm:$0xff] %v10285_v32  ;;  %14201 = vst [vmem:[#allocation8_spill] sm:$0xff] %v10287_v33  ;;  %v13733_v41 = vand.u32 4294901760, %v10285_v32  ;;  %v10307_v42 = vsub.f32 %v106_v30, %v10287_v33  ;;  %v10310_v43 = vsub.f32 %v109_v31, %v10289_v34  ;;  %v10312_v44 = vand.u32 4294901760, %v115_v39  ;;  %v32_v61 = vld [vmem:[%s13721_s0 + $0x50] sm:$0xff]  ;;  %v33_v62 = vld [vmem:[%s13721_s0 + $0x58] sm:$0xff] }
   0xa   :  { %14202 = vst [vmem:[#allocation9_spill] sm:$0xff] %v10289_v34  ;;  %14203 = vst [vmem:[#allocation10_spill] sm:$0xff] %v10298_v37  ;;  %v13728_v45 = vand.u32 4294901760, %v10298_v37  ;;  %v10316_v46 = vsub.f32 %v112_v35, %v10300_v38  ;;  %v10318_v47 = vand.u32 4294901760, %v118_v40  ;;  %v10332_v51 = vpack.c.bf16 %v13734_v22, %v13735_v16  ;;  %v34_v24 = vld [vmem:[%s13721_s0 + $0x60] sm:$0xff]  ;;  %v35_v31 = vld [vmem:[%s13721_s0 + $0x68] sm:$0xff] }
   0xb   :  { %14204 = vst [vmem:[#allocation11_spill] sm:$0xff] %v10300_v38  ;;  %14205 = vst [vmem:[#allocation12_spill] sm:$0xff] %v10307_v42  ;;  %8980 = vmatpush3.bf16.msra.mxu0 %v10256_v21  ;;  %v367_v49 = vsub.f32 %v10285_v32, %v13733_v41  ;;  %v13727_v50 = vand.u32 4294901760, %v10307_v42  ;;  %9722 = vmatpush3.bf16.msra.mxu1 %v10256_v21  ;;  %v13726_v52 = vand.u32 4294901760, %v10310_v43  ;;  %v10338_v54 = vand.u32 4294901760, %v121_v48 }
   0xc   :  { %14206 = vst [vmem:[#allocation13_spill] sm:$0xff] %v10310_v43  ;;  %14207 = vst [vmem:[#allocation14_spill] sm:$0xff] %v10312_v44  ;;  %8982 = vmatprep.subr.bf16.mxu0 %v10276_v28  ;;  %v10336_v53 = vsub.f32 %v115_v39, %v10312_v44  ;;  %9719 = vmatprep.subr.bf16.mxu1 %v10276_v28  ;;  %v377_v57 = vsub.f32 %v10298_v37, %v13728_v45  ;;  %v13725_v58 = vand.u32 4294901760, %v10316_v46 }
   0xd   :  { %14208 = vst [vmem:[#allocation15_spill] sm:$0xff] %v10316_v46  ;;  %14209 = vst [vmem:[#allocation16_spill] sm:$0xff] %v10318_v47  ;;  %v368_v56 = vand.u32 4294901760, %v367_v49  ;;  %v10349_v59 = vsub.f32 %v118_v40, %v10318_v47  ;;  %v387_v63 = vsub.f32 %v10307_v42, %v13727_v50  ;;  %v124_v14 = vsel %vm98_vm0, %v30_v55, 0 }
   0xe   :  { %14210 = vst [vmem:[#allocation17_spill] sm:$0xff] %v10332_v51  ;;  %14211 = vst [vmem:[#allocation18_spill] sm:$0xff] %v10336_v53  ;;  %v397_v17 = vsub.f32 %v10310_v43, %v13726_v52  ;;  %v13730_v18 = vand.u32 4294901760, %v10336_v53  ;;  %v10371_v19 = vsub.f32 %v121_v48, %v10338_v54  ;;  %v10373_v20 = vand.u32 4294901760, %v124_v14  ;;  %v36_v48 = vld [vmem:[%s13721_s0 + $0x70] sm:$0xff] }
   0xf   :  { %14212 = vst [vmem:[#allocation19_spill] sm:$0xff] %v10338_v54  ;;  %14213 = vst [vmem:[#allocation20_spill] sm:$0xff] %v10349_v59  ;;  %8984 = vmatpush3.bf16.msra.mxu0 %v10276_v28  ;;  %8203 = vmatprep.mubr.f32.mxu0 %v368_v56  ;;  %v378_v25 = vand.u32 4294901760, %v377_v57  ;;  %v127_v26 = vsel %vm98_vm0, %v31_v60, 0  ;;  %v130_v27 = vsel %vm98_vm0, %v32_v61, 0  ;;  %v133_v30 = vsel %vm98_vm0, %v33_v62, 0 }
  0x10   :  { %8986 = vmatprep.subr.bf16.mxu0 %v10332_v51  ;;  %14214 = vst [vmem:[#allocation21_spill] sm:$0xff] %v10371_v19  ;;  %14215 = vst [vmem:[#allocation22_spill] sm:$0xff] %v10373_v20  ;;  %9723 = vmatpush3.bf16.msra.mxu1 %v10276_v28  ;;  %v407_v35 = vsub.f32 %v10316_v46, %v13725_v58  ;;  %v13729_v36 = vand.u32 4294901760, %v10349_v59  ;;  %v10391_v39 = vsub.f32 %v124_v14, %v10373_v20 }
  0x11   :  { %9720 = vmatprep.subr.bf16.mxu1 %v10332_v51  ;;  %v10393_v40 = vand.u32 4294901760, %v127_v26  ;;  %v388_v49 = vand.u32 4294901760, %v387_v63  ;;  %v10399_v55 = vand.u32 4294901760, %v130_v27  ;;  %v136_v56 = vsel %vm98_vm0, %v34_v24, 0 }
  0x12   :  { %14216 = vst [vmem:[#allocation23_spill] sm:$0xff] %v10391_v39  ;;  %v13731_v57 = vand.u32 4294901760, %v10371_v19  ;;  %v10403_v60 = vand.u32 4294901760, %v133_v30  ;;  %v139_v61 = vsel %vm98_vm0, %v35_v31, 0  ;;  %v398_v62 = vand.u32 4294901760, %v397_v17 }
  0x13   :  { %14217 = vst [vmem:[#allocation24_spill] sm:$0xff] %v10393_v40  ;;  %8988 = vmatpush3.bf16.msra.mxu0 %v10332_v51  ;;  %14218 = vst [vmem:[#allocation25_spill] sm:$0xff] %v10399_v55  ;;  %v13732_v14 = vand.u32 4294901760, %v10391_v39  ;;  %v10409_v58 = vsub.f32 %v127_v26, %v10393_v40  ;;  %v142_v63 = vsel %vm98_vm0, %v36_v48, 0  ;;  %v408_v52 = vand.u32 4294901760, %v407_v35 }
  0x14   :  { %14219 = vst [vmem:[#allocation26_spill] sm:$0xff] %v10403_v60  ;;  %9724 = vmatpush3.bf16.msra.mxu1 %v10332_v51  ;;  %v417_v24 = vsub.f32 %v10336_v53, %v13730_v18  ;;  %v427_v31 = vsub.f32 %v10349_v59, %v13729_v36  ;;  %v10418_v50 = vand.u32 4294901760, %v136_v56  ;;  %v10421_v17 = vsub.f32 %v130_v27, %v10399_v55 }
  0x15   :  { %14220 = vst [vmem:[#allocation27_spill] sm:$0xff] %v10409_v58  ;;  %v10423_v26 = vand.u32 4294901760, %v139_v61  ;;  %v10425_v45 = vand.u32 4294901760, %v142_v63  ;;  %v437_v35 = vsub.f32 %v10371_v19, %v13731_v57  ;;  %v10436_v48 = vsub.f32 %v133_v30, %v10403_v60 }
  0x16   :  { %8204 = vmatmul.mubr.f32.vlgmr.msra.gmra.mrb[0].mxu0 %v378_v25  ;;  %14221 = vst [vmem:[#allocation28_spill] sm:$0xff] %v10418_v50  ;;  %14222 = vst [vmem:[#allocation29_spill] sm:$0xff] %v10421_v17  ;;  %v10430_v25 = vsub.f32 %v10189_v0, %v292_v3  ;;  %v447_v27 = vsub.f32 %v10391_v39, %v13732_v14  ;;  %v37_v0 = vld [vmem:[%s13721_s0 + $0x78] sm:$0xff]  ;;  %v418_v3 = vand.u32 4294901760, %v417_v24  ;;  %v428_v18 = vand.u32 4294901760, %v427_v31  ;;  %v38_v14 = vld [vmem:[%s13721_s0 + $0x80] sm:$0xff] }
  0x17   :  { %8206 = vmatprep.mubr.f32.mxu0 %v388_v49  ;;  %14223 = vst [vmem:[#allocation30_spill] sm:$0xff] %v10423_v26  ;;  %14224 = vst [vmem:[#allocation31_spill] sm:$0xff] %v10425_v45  ;;  %v13738_v49 = vand.u32 4294901760, %v10409_v58  ;;  %v10447_v57 = vsub.f32 %v136_v56, %v10418_v50  ;;  %v10452_v30 = vsub.f32 %v10194_v1, %v295_v4  ;;  %v13745_v41 = vand.u32 4294901760, %v10421_v17 }
  0x18   :  { %14225 = vst [vmem:[#allocation32_spill] sm:$0xff] %v10436_v48  ;;  %v13736_v36 = vand.u32 4294901760, %v10430_v25  ;;  %v10459_v22 = vsub.f32 %v139_v61, %v10423_v26  ;;  %v438_v24 = vand.u32 4294901760, %v437_v35  ;;  %v145_v31 = vsel %vm98_vm0, %v37_v0, 0  ;;  %v40_v35 = vld [vmem:[%s13721_s0 + $0x90] sm:$0xff]  ;;  %v41_v0 = vld [vmem:[%s13721_s0 + $0x98] sm:$0xff] }
  0x19   :  { %14226 = vst [vmem:[#allocation33_spill] sm:$0xff] %v10447_v57  ;;  %v13742_v4 = vand.u32 4294901760, %v10452_v30  ;;  %v448_v61 = vand.u32 4294901760, %v447_v27  ;;  %v10476_v16 = vand.u32 4294901760, %v145_v31  ;;  %v154_v11 = vsel %vm98_vm0, %v40_v35, 0 }
  0x1a   :  { %8207 = vmatmul.mubr.f32.gmra.mrb[2].mxu0 %v398_v62  ;;  %14227 = vst [vmem:[#allocation34_spill] sm:$0xff] %v10459_v22  ;;  %v10462_v62 = vsub.f32 %v142_v63, %v10425_v45  ;;  %v1008_v56 = vsub.f32 %v10430_v25, %v13736_v36  ;;  %v457_v63 = vsub.f32 %v10409_v58, %v13738_v49  ;;  %v148_v36 = vsel %vm98_vm0, %v38_v14, 0 }
  0x1b   :  { %8209 = vmatprep.mubr.f32.mxu0 %v408_v52  ;;  %v39_v52 = vld [vmem:[%s13721_s0 + $0x88] sm:$0xff]  ;;  %14229 = vst [vmem:[#allocation36_spill] sm:$0xff] %v10476_v16  ;;  %v1015_v49 = vsub.f32 %v10452_v30, %v13742_v4  ;;  %v10489_v10 = vand.u32 4294901760, %v148_v36  ;;  %v467_v14 = vsub.f32 %v10421_v17, %v13745_v41  ;;  %v157_v4 = vsel %vm98_vm0, %v41_v0, 0 }
  0x1c   :  { %14228 = vst [vmem:[#allocation35_spill] sm:$0xff] %v10462_v62  ;;  %v1009_v27 = vand.u32 4294901760, %v1008_v56  ;;  %v10498_v56 = vsub.f32 %v145_v31, %v10476_v16  ;;  %v458_v58 = vand.u32 4294901760, %v457_v63  ;;  %v14232_v41 = vand.u32 4294901760, %v10436_v48  ;;  %v43_v0 = vld [vmem:[%s13721_s0 + $0xa8] sm:$0xff] }
  0x1d   :  { %14230 = vst [vmem:[#allocation37_spill] sm:$0xff] %v10489_v10  ;;  %v1016_v1 = vand.u32 4294901760, %v1015_v49  ;;  %v10512_v6 = vsub.f32 %v148_v36, %v10489_v10  ;;  %v468_v63 = vand.u32 4294901760, %v467_v14  ;;  %v10519_v17 = vand.u32 4294901760, %v154_v11  ;;  %v45_v14 = vld [vmem:[%s13721_s0 + $0xb8] sm:$0xff] }
  0x1e   :  { %8210 = vmatmul.mubr.f32.gmra.mrb[4].mxu0 %v418_v3  ;;  %v151_v3 = vsel %vm98_vm0, %v39_v52, 0  ;;  %14231 = vst [vmem:[#allocation38_spill] sm:$0xff] %v10498_v56  ;;  %v477_v9 = vsub.f32 %v10436_v48, %v14232_v41  ;;  %v14233_v52 = vand.u32 4294901760, %v10447_v57  ;;  %v10521_v41 = vand.u32 4294901760, %v157_v4 }
  0x1f   :  { %8212 = vmatprep.mubr.f32.mxu0 %v428_v18  ;;  %v42_v18 = vld [vmem:[%s13721_s0 + $0xa0] sm:$0xff]  ;;  %v8989_v31 = vpack.c.bf16 %v1016_v1, %v1009_v27  ;;  %14234 = vst [vmem:[#allocation39_spill] sm:$0xff] %v10512_v6  ;;  %v10514_v35 = vand.u32 4294901760, %v151_v3  ;;  %14236 = vst [vmem:[#allocation41_spill] sm:$0xff] %v10519_v17  ;;  %v44_v1 = vld [vmem:[%s13721_s0 + $0xb0] sm:$0xff]  ;;  %v14238_v36 = vand.u32 4294901760, %v10459_v22 }
  0x20   :  { %v487_v49 = vsub.f32 %v10447_v57, %v14233_v52  ;;  %14237 = vst [vmem:[#allocation42_spill] sm:$0xff] %v10521_v41  ;;  %v14239_v52 = vand.u32 4294901760, %v10462_v62  ;;  %v163_v48 = vsel %vm98_vm0, %v43_v0, 0  ;;  %v14244_v39 = vand.u32 4294901760, %v10498_v56 }
  0x21   :  { %14235 = vst [vmem:[#allocation40_spill] sm:$0xff] %v10514_v35  ;;  %v497_v27 = vsub.f32 %v10459_v22, %v14238_v36  ;;  %8990 = vmatprep.subr.bf16.mxu0 %v8989_v31  ;;  %v10540_v36 = vsub.f32 %v151_v3, %v10514_v35  ;;  %v14250_v19 = vand.u32 4294901760, %v10206_v5 }
  0x22   :  { %8213 = vmatmul.mubr.f32.gmra.mrb[6].mxu0 %v438_v24  ;;  %v160_v24 = vsel %vm98_vm0, %v42_v18, 0  ;;  %v507_v57 = vsub.f32 %v10462_v62, %v14239_v52  ;;  %v478_v18 = vand.u32 4294901760, %v477_v9  ;;  %v166_v52 = vsel %vm98_vm0, %v44_v1, 0 }
  0x23   :  { %8215 = vmatprep.mubr.f32.mxu0 %v448_v61  ;;  %8992 = vmatpush3.bf16.msra.mxu0 %v8989_v31  ;;  %14240 = vst [vmem:[#allocation43_spill] sm:$0xff] %v10540_v36  ;;  %v10542_v22 = vand.u32 4294901760, %v160_v24  ;;  %v488_v61 = vand.u32 4294901760, %v487_v49  ;;  %v10546_v62 = vsub.f32 %v154_v11, %v10519_v17  ;;  %v10549_v9 = vsub.f32 %v157_v4, %v10521_v41 }
  0x24   :  { %v169_v31 = vsel %vm98_vm0, %v45_v14, 0  ;;  %v498_v3 = vand.u32 4294901760, %v497_v27  ;;  %v508_v0 = vand.u32 4294901760, %v507_v57  ;;  %v517_v1 = vsub.f32 %v10498_v56, %v14244_v39  ;;  %v47_v39 = vld [vmem:[%s13721_s0 + $0xc8] sm:$0xff] }
  0x25   :  { %14241 = vst [vmem:[#allocation44_spill] sm:$0xff] %v10542_v22  ;;  %14242 = vst [vmem:[#allocation45_spill] sm:$0xff] %v10546_v62  ;;  %v10560_v49 = vand.u32 4294901760, %v166_v52  ;;  %v10562_v11 = vand.u32 4294901760, %v169_v31  ;;  %v14248_v4 = vand.u32 4294901760, %v10199_v2  ;;  %v10572_v27 = vsub.f32 %v10206_v5, %v14250_v19 }
  0x26   :  { %8216 = vmatmul.mubr.f32.gmra.mrb[8].mxu0 %v458_v58  ;;  %14243 = vst [vmem:[#allocation46_spill] sm:$0xff] %v10549_v9  ;;  %v46_v58 = vld [vmem:[%s13721_s0 + $0xc0] sm:$0xff]  ;;  %v14252_v57 = vand.u32 4294901760, %v10512_v6  ;;  %v10582_v59 = vsub.f32 %v160_v24, %v10542_v22 }
  0x27   :  { %8218 = vmatprep.mubr.f32.mxu0 %v468_v63  ;;  %v10558_v63 = vand.u32 4294901760, %v163_v48  ;;  %14246 = vst [vmem:[#allocation48_spill] sm:$0xff] %v10560_v49  ;;  %14247 = vst [vmem:[#allocation49_spill] sm:$0xff] %v10562_v11  ;;  %v10567_v14 = vsub.f32 %v10199_v2, %v14248_v4  ;;  %v172_v2 = vsel %vm98_vm0, %v46_v58, 0  ;;  %v10599_v58 = vsub.f32 %v166_v52, %v10560_v49 }
  0x28   :  { %14251 = vst [vmem:[#allocation51_spill] sm:$0xff] %v10572_v27  ;;  %v527_v56 = vsub.f32 %v10512_v6, %v14252_v57  ;;  %14253 = vst [vmem:[#allocation52_spill] sm:$0xff] %v10582_v59  ;;  %v48_v57 = vld [vmem:[%s13721_s0 + $0xd0] sm:$0xff]  ;;  %v518_v6 = vand.u32 4294901760, %v517_v1  ;;  %v10595_v24 = vand.u32 4294901760, %v172_v2  ;;  %v10602_v19 = vsub.f32 %v169_v31, %v10562_v11 }
  0x29   :  { %14245 = vst [vmem:[#allocation47_spill] sm:$0xff] %v10558_v63  ;;  %14249 = vst [vmem:[#allocation50_spill] sm:$0xff] %v10567_v14  ;;  %v13772_v4 = vand.u32 4294901760, %v10567_v14  ;;  %v10593_v51 = vsub.f32 %v163_v48, %v10558_v63  ;;  %v49_v48 = vld [vmem:[%s13721_s0 + $0xd8] sm:$0xff]  ;;  %v14258_v52 = vand.u32 4294901760, %v10540_v36  ;;  %v178_v28 = vsel %vm98_vm0, %v48_v57, 0 }
  0x2a   :  { %8219 = vmatmul.mubr.f32.gmra.mrb[10].mxu0 %v478_v18  ;;  %v13775_v18 = vand.u32 4294901760, %v10572_v27  ;;  %14255 = vst [vmem:[#allocation54_spill] sm:$0xff] %v10595_v24  ;;  %14256 = vst [vmem:[#allocation55_spill] sm:$0xff] %v10599_v58  ;;  %v181_v57 = vsel %vm98_vm0, %v49_v48, 0 }
  0x2b   :  { %8221 = vmatprep.mubr.f32.mxu0 %v488_v61  ;;  %14254 = vst [vmem:[#allocation53_spill] sm:$0xff] %v10593_v51  ;;  %v175_v61 = vsel %vm98_vm0, %v47_v39, 0  ;;  %14257 = vst [vmem:[#allocation56_spill] sm:$0xff] %v10602_v19  ;;  %v1022_v5 = vsub.f32 %v10567_v14, %v13772_v4  ;;  %v528_v39 = vand.u32 4294901760, %v527_v56  ;;  %v537_v53 = vsub.f32 %v10540_v36, %v14258_v52  ;;  %v50_v56 = vld [vmem:[%s13721_s0 + $0xe0] sm:$0xff] }
  0x2c   :  { %v1029_v1 = vsub.f32 %v10572_v27, %v13775_v18  ;;  %v14259_v4 = vand.u32 4294901760, %v10546_v62  ;;  %v10621_v21 = vand.u32 4294901760, %v175_v61  ;;  %v10628_v52 = vsub.f32 %v172_v2, %v10595_v24 }
  0x2d   :  { %v1023_v18 = vand.u32 4294901760, %v1022_v5  ;;  %v10633_v5 = vand.u32 4294901760, %v178_v28  ;;  %v184_v42 = vsel %vm98_vm0, %v50_v56, 0 }
  0x2e   :  { %8222 = vmatmul.mubr.f32.gmra.mrb[12].mxu0 %v498_v3  ;;  %v547_v46 = vsub.f32 %v10546_v62, %v14259_v4  ;;  %v1030_v43 = vand.u32 4294901760, %v1029_v1  ;;  %14260 = vst [vmem:[#allocation57_spill] sm:$0xff] %v10621_v21  ;;  %14261 = vst [vmem:[#allocation58_spill] sm:$0xff] %v10628_v52  ;;  %v538_v1 = vand.u32 4294901760, %v537_v53  ;;  %v14263_v62 = vand.u32 4294901760, %v10549_v9 }
  0x2f   :  { %8224 = vmatprep.mubr.f32.mxu0 %v508_v0  ;;  %v13792_v0 = vand.u32 4294901760, %v10599_v58  ;;  %14262 = vst [vmem:[#allocation59_spill] sm:$0xff] %v10633_v5  ;;  %v14264_v3 = vand.u32 4294901760, %v10582_v59  ;;  %v10643_v31 = vsub.f32 %v175_v61, %v10621_v21 }
  0x30   :  { %v8993_v4 = vpack.c.bf16 %v1030_v43, %v1023_v18  ;;  %v557_v36 = vsub.f32 %v10549_v9, %v14263_v62  ;;  %v548_v48 = vand.u32 4294901760, %v547_v46  ;;  %v10645_v43 = vand.u32 4294901760, %v181_v57  ;;  %v51_v18 = vld [vmem:[%s13721_s0 + $0xe8] sm:$0xff]  ;;  %v52_v46 = vld [vmem:[%s13721_s0 + $0xf0] sm:$0xff] }
  0x31   :  { %v567_v2 = vsub.f32 %v10582_v59, %v14264_v3  ;;  %v587_v61 = vsub.f32 %v10599_v58, %v13792_v0  ;;  %v10664_v3 = vsub.f32 %v178_v28, %v10633_v5  ;;  %v14272_v9 = vand.u32 4294901760, %v10217_v8 }
  0x32   :  { %8225 = vmatmul.mubr.f32.gmra.mrb[14].mxu0 %v518_v6  ;;  %8994 = vmatprep.subr.bf16.mxu0 %v8993_v4  ;;  %14265 = vst [vmem:[#allocation60_spill] sm:$0xff] %v10645_v43  ;;  %v14266_v6 = vand.u32 4294901760, %v10593_v51  ;;  %v10680_v28 = vsub.f32 %v181_v57, %v10645_v43  ;;  %v14280_v58 = vand.u32 4294901760, %v10225_v12 }
  0x33   :  { %8227 = vmatprep.mubr.f32.mxu0 %v528_v39  ;;  %8996 = vmatpush3.bf16.msra.mxu0 %v8993_v4  ;;  %v14267_v39 = vand.u32 4294901760, %v10602_v19  ;;  %14268 = vst [vmem:[#allocation61_spill] sm:$0xff] %v10664_v3  ;;  %v10666_v4 = vand.u32 4294901760, %v184_v42  ;;  %v568_v62 = vand.u32 4294901760, %v567_v2  ;;  %v10676_v0 = vsub.f32 %v10217_v8, %v14272_v9  ;;  %v53_v8 = vld [vmem:[%s13721_s0 + $0xf8] sm:$0xff] }
  0x34   :  { %v577_v53 = vsub.f32 %v10593_v51, %v14266_v6  ;;  %v558_v6 = vand.u32 4294901760, %v557_v36  ;;  %v14270_v51 = vand.u32 4294901760, %v10212_v7  ;;  %14274 = vst [vmem:[#allocation65_spill] sm:$0xff] %v10680_v28  ;;  %v190_v36 = vsel %vm98_vm0, %v52_v46, 0 }
  0x35   :  { %v597_v56 = vsub.f32 %v10602_v19, %v14267_v39  ;;  %14269 = vst [vmem:[#allocation62_spill] sm:$0xff] %v10666_v4  ;;  %14273 = vst [vmem:[#allocation64_spill] sm:$0xff] %v10676_v0  ;;  %v14275_v19 = vand.u32 4294901760, %v10628_v52  ;;  %v10701_v46 = vand.u32 4294901760, %v190_v36  ;;  %v10717_v37 = vsub.f32 %v10225_v12, %v14280_v58 }
  0x36   :  { %8228 = vmatmul.mubr.f32.gmra.mrb[16].mxu0 %v538_v1  ;;  %v10671_v59 = vsub.f32 %v10212_v7, %v14270_v51  ;;  %v187_v1 = vsel %vm98_vm0, %v51_v18, 0  ;;  %v578_v2 = vand.u32 4294901760, %v577_v53  ;;  %v10694_v18 = vsub.f32 %v184_v42, %v10666_v4  ;;  %v54_v53 = vld [vmem:[%s13721_s0 + $0x100] sm:$0xff] }
  0x37   :  { %8230 = vmatprep.mubr.f32.mxu0 %v548_v48  ;;  %v607_v7 = vsub.f32 %v10628_v52, %v14275_v19  ;;  %v588_v48 = vand.u32 4294901760, %v587_v61  ;;  %v598_v57 = vand.u32 4294901760, %v597_v56  ;;  %v10699_v19 = vand.u32 4294901760, %v187_v1  ;;  %14277 = vst [vmem:[#allocation67_spill] sm:$0xff] %v10701_v46  ;;  %14281 = vst [vmem:[#allocation68_spill] sm:$0xff] %v10717_v37 }
  0x38   :  { %14271 = vst [vmem:[#allocation63_spill] sm:$0xff] %v10671_v59  ;;  %v13803_v51 = vand.u32 4294901760, %v10671_v59  ;;  %v14278_v61 = vand.u32 4294901760, %v10676_v0  ;;  %v14279_v42 = vand.u32 4294901760, %v10643_v31  ;;  %v196_v43 = vsel %vm98_vm0, %v54_v53, 0 }
  0x39   :  { %14276 = vst [vmem:[#allocation66_spill] sm:$0xff] %v10699_v19  ;;  %v608_v32 = vand.u32 4294901760, %v607_v7  ;;  %v13810_v52 = vand.u32 4294901760, %v10717_v37  ;;  %v14283_v12 = vand.u32 4294901760, %v10230_v13  ;;  %v10734_v7 = vsub.f32 %v187_v1, %v10699_v19 }
  0x3a   :  { %8231 = vmatmul.mubr.f32.gmra.mrb[18].mxu0 %v558_v6  ;;  %v1036_v9 = vsub.f32 %v10671_v59, %v13803_v51  ;;  %v1043_v56 = vsub.f32 %v10676_v0, %v14278_v61  ;;  %v617_v39 = vsub.f32 %v10643_v31, %v14279_v42  ;;  %v193_v6 = vsel %vm98_vm0, %v53_v8, 0 }
  0x3b   :  { %8233 = vmatprep.mubr.f32.mxu0 %v568_v62  ;;  %v55_v62 = vld [vmem:[%s13721_s0 + $0x108] sm:$0xff]  ;;  %v14282_v61 = vand.u32 4294901760, %v10664_v3  ;;  %v10731_v58 = vsub.f32 %v10230_v13, %v14283_v12  ;;  %14285 = vst [vmem:[#allocation70_spill] sm:$0xff] %v10734_v7  ;;  %v10739_v53 = vand.u32 4294901760, %v193_v6  ;;  %v1050_v13 = vsub.f32 %v10717_v37, %v13810_v52 }
  0x3c   :  { %v1037_v51 = vand.u32 4294901760, %v1036_v9  ;;  %v1044_v4 = vand.u32 4294901760, %v1043_v56  ;;  %v10737_v9 = vsub.f32 %v190_v36, %v10701_v46  ;;  %v199_v8 = vsel %vm98_vm0, %v55_v62, 0 }
  0x3d   :  { %v627_v42 = vsub.f32 %v10664_v3, %v14282_v61  ;;  %14284 = vst [vmem:[#allocation69_spill] sm:$0xff] %v10731_v58  ;;  %14286 = vst [vmem:[#allocation71_spill] sm:$0xff] %v10739_v53  ;;  %v10741_v61 = vand.u32 4294901760, %v196_v43  ;;  %v618_v1 = vand.u32 4294901760, %v617_v39  ;;  %v14288_v12 = vand.u32 4294901760, %v10680_v28 }
  0x3e   :  { %8234 = vmatmul.mubr.f32.gmra.mrb[20].mxu0 %v578_v2  ;;  %v8997_v56 = vpack.c.bf16 %v1044_v4, %v1037_v51  ;;  %v13811_v2 = vand.u32 4294901760, %v10731_v58  ;;  %v1051_v3 = vand.u32 4294901760, %v1050_v13  ;;  %v10756_v62 = vsub.f32 %v193_v6, %v10739_v53 }
  0x3f   :  { %8236 = vmatprep.mubr.f32.mxu0 %v588_v48  ;;  %14287 = vst [vmem:[#allocation72_spill] sm:$0xff] %v10741_v61  ;;  %v637_v36 = vsub.f32 %v10680_v28, %v14288_v12  ;;  %v628_v51 = vand.u32 4294901760, %v627_v42  ;;  %v13817_v48 = vand.u32 4294901760, %v10734_v7  ;;  %v10758_v52 = vand.u32 4294901760, %v199_v8 }
  0x40   :  { %8998 = vmatprep.subr.bf16.mxu0 %v8997_v56  ;;  %v1057_v4 = vsub.f32 %v10731_v58, %v13811_v2  ;;  %v14290_v39 = vand.u32 4294901760, %v10694_v18  ;;  %v10765_v13 = vsub.f32 %v196_v43, %v10741_v61  ;;  %v9005_v42 = vpack.c.bf16 %v10452_v30, %v10430_v25 }
  0x41   :  { %9000 = vmatpush3.bf16.msra.mxu0 %v8997_v56  ;;  %14289 = vst [vmem:[#allocation73_spill] sm:$0xff] %v10758_v52  ;;  %v638_v6 = vand.u32 4294901760, %v637_v36  ;;  %v13816_v28 = vand.u32 4294901760, %v10756_v62  ;;  %v14292_v43 = vand.u32 4294901760, %v10737_v9 }
  0x42   :  { %8237 = vmatmul.mubr.f32.gmra.mrb[22].mxu0 %v598_v57  ;;  %v647_v12 = vsub.f32 %v10694_v18, %v14290_v39  ;;  %14291 = vst [vmem:[#allocation74_spill] sm:$0xff] %v10765_v13  ;;  %v1058_v2 = vand.u32 4294901760, %v1057_v4  ;;  %v10774_v39 = vsub.f32 %v199_v8, %v10758_v52 }
  0x43   :  { %8239 = vmatprep.mubr.f32.mxu0 %v608_v32  ;;  %v657_v32 = vsub.f32 %v10734_v7, %v13817_v48  ;;  %v677_v36 = vsub.f32 %v10756_v62, %v13816_v28 }
  0x44   :  { %v9001_v57 = vpack.c.bf16 %v1058_v2, %v1051_v3  ;;  %v648_v56 = vand.u32 4294901760, %v647_v12  ;;  %v667_v3 = vsub.f32 %v10737_v9, %v14292_v43  ;;  %v13815_v2 = vand.u32 4294901760, %v10765_v13 }
  0x45   :  { %v13814_v8 = vand.u32 4294901760, %v10774_v39  ;;  %v678_v12 = vand.u32 4294901760, %v677_v36  ;;  %v9013_v43 = vpack.c.bf16 %v10676_v0, %v10671_v59  ;;  %v56_v36 = vld [vmem:[%s13721_s0 + $0x110] sm:$0xff]  ;;  %v81_v0 = vld [vmem:[%s13721_s0 + $0x1d8] sm:$0xff]  ;;  %v82_v59 = vld [vmem:[%s13721_s0 + $0x1e0] sm:$0xff] }
  0x46   :  { %8240 = vmatmul.mubr.f32.gmra.mrb[24].mxu0 %v618_v1  ;;  %9002 = vmatprep.subr.bf16.mxu0 %v9001_v57  ;;  %v658_v1 = vand.u32 4294901760, %v657_v32  ;;  %v668_v4 = vand.u32 4294901760, %v667_v3  ;;  %v9017_v3 = vpack.c.bf16 %v10731_v58, %v10717_v37 }
  0x47   :  { %8242 = vmatprep.mubr.f32.mxu0 %v628_v51  ;;  %9004 = vmatpush3.bf16.msra.mxu0 %v9001_v57  ;;  %v687_v51 = vsub.f32 %v10765_v13, %v13815_v2  ;;  %v697_v57 = vsub.f32 %v10774_v39, %v13814_v8  ;;  %v61_v8 = vld [vmem:[%s13721_s0 + $0x138] sm:$0xff]  ;;  %v62_v2 = vld [vmem:[%s13721_s0 + $0x140] sm:$0xff] }
  0x48   :  { %9006 = vmatprep.subr.bf16.mxu0 %v9005_v42  ;;  %v10889_v48 = vsel %vm98_vm0, %v62_v2, 0 }
  0x49   :  { %v698_v32 = vand.u32 4294901760, %v697_v57 }
  0x4a   :  { %8243 = vmatmul.mubr.f32.gmra.mrb[26].mxu0 %v638_v6  ;;  %v688_v6 = vand.u32 4294901760, %v687_v51  ;;  %v57_v51 = vld [vmem:[%s13721_s0 + $0x118] sm:$0xff] }
  0x4b   :  { %8245 = vmatprep.mubr.f32.mxu0 %v648_v56  ;;  %v9009_v56 = vpack.c.bf16 %v10572_v27, %v10567_v14  ;;  %v11089_v14 = vsel %vm98_vm0, %v82_v59, 0 }
  0x4c   :  { %14324 = vst [vmem:[#allocation104_spill] sm:$0xff] %v11089_v14 }
  0x4e   :  { %8246 = vmatmul.mubr.f32.gmra.mrb[28].mxu0 %v658_v1  ;;  %v14294_v1 = vld [vmem:[#allocation62_spill] sm:$0xff] }
  0x4f   :  { %8248 = vmatprep.mubr.f32.mxu0 %v668_v4  ;;  %v10832_v4 = vsel %vm98_vm0, %v56_v36, 0 }
  0x50   :  { %v10843_v57 = vand.u32 4294901760, %v10832_v4 }
  0x52   :  { %8249 = vmatmul.mubr.f32.gmra.mrb[30].mxu0 %v678_v12  ;;  %v58_v12 = vld [vmem:[%s13721_s0 + $0x120] sm:$0xff] }
  0x53   :  { %8251 = vmatprep.mubr.f32.mxu0 %v688_v6  ;;  %v10846_v6 = vsel %vm98_vm0, %v57_v51, 0 }
  0x56   :  { %8252 = vmatmul.mubr.f32.gmra.mrb[32].mxu0 %v698_v32  ;;  %v10849_v32 = vsel %vm98_vm0, %v58_v12, 0 }
  0x57   :  { %8315 = vmatprep.mubr.f32.mxu0 %v10259_v23  ;;  %v10863_v36 = vand.u32 4294901760, %v10849_v32  ;;  %v80_v23 = vld [vmem:[%s13721_s0 + $0x1d0] sm:$0xff] }
  0x58   :  { %v11069_v37 = vsel %vm98_vm0, %v80_v23, 0  ;;  %v11086_v23 = vsel %vm98_vm0, %v81_v0, 0  ;;  %v11103_v0 = vand.u32 4294901760, %v11089_v14 }
  0x59   :  { %14296 = vst [vmem:[#allocation76_spill] sm:$0xff] %v10863_v36  ;;  %14320 = vst [vmem:[#allocation100_spill] sm:$0xff] %v11069_v37 }
  0x5a   :  { %8316 = vmatmul.mubr.f32.vlgmr.msra.gmra.mrb[0].mxu0 %v10278_v29  ;;  %v79_v29 = vld [vmem:[%s13721_s0 + $0x1c8] sm:$0xff]  ;;  %14323 = vst [vmem:[#allocation103_spill] sm:$0xff] %v11086_v23  ;;  %14326 = vst [vmem:[#allocation106_spill] sm:$0xff] %v11103_v0 }
  0x5b   :  { %8318 = vmatprep.mubr.f32.mxu0 %v10287_v33  ;;  %9008 = vmatpush3.bf16.msra.mxu0 %v9005_v42  ;;  %v14293_v42 = vld [vmem:[#allocation60_spill] sm:$0xff] }
  0x5c   :  { %9010 = vmatprep.subr.bf16.mxu0 %v9009_v56 }
  0x5e   :  { %8319 = vmatmul.mubr.f32.gmra.mrb[2].mxu0 %v10289_v34 }
  0x5f   :  { %8321 = vmatprep.mubr.f32.mxu0 %v10300_v38  ;;  %9012 = vmatpush3.bf16.msra.mxu0 %v9009_v56  ;;  %v59_v56 = vld [vmem:[%s13721_s0 + $0x128] sm:$0xff]  ;;  %v78_v38 = vld [vmem:[%s13721_s0 + $0x1c0] sm:$0xff] }
  0x60   :  { %9014 = vmatprep.subr.bf16.mxu0 %v9013_v43  ;;  %v10866_v51 = vsel %vm98_vm0, %v59_v56, 0  ;;  %v11049_v33 = vsel %vm98_vm0, %v78_v38, 0  ;;  %v11066_v38 = vsel %vm98_vm0, %v79_v29, 0  ;;  %v11083_v29 = vand.u32 4294901760, %v11069_v37 }
  0x61   :  { %v10879_v28 = vand.u32 4294901760, %v10866_v51  ;;  %14316 = vst [vmem:[#allocation96_spill] sm:$0xff] %v11049_v33  ;;  %14319 = vst [vmem:[#allocation99_spill] sm:$0xff] %v11066_v38  ;;  %v11079_v27 = vand.u32 4294901760, %v11066_v38  ;;  %v84_v38 = vld [vmem:[%s13721_s0 + $0x1f0] sm:$0xff] }
  0x62   :  { %8322 = vmatmul.mubr.f32.gmra.mrb[4].mxu0 %v10312_v44  ;;  %v77_v44 = vld [vmem:[%s13721_s0 + $0x1b8] sm:$0xff]  ;;  %14322 = vst [vmem:[#allocation102_spill] sm:$0xff] %v11083_v29  ;;  %v11109_v37 = vsel %vm98_vm0, %v84_v38, 0 }
  0x63   :  { %8324 = vmatprep.mubr.f32.mxu0 %v10318_v47  ;;  %9016 = vmatpush3.bf16.msra.mxu0 %v9013_v43  ;;  %v60_v43 = vld [vmem:[%s13721_s0 + $0x130] sm:$0xff]  ;;  %14297 = vst [vmem:[#allocation77_spill] sm:$0xff] %v10879_v28  ;;  %14321 = vst [vmem:[#allocation101_spill] sm:$0xff] %v11079_v27  ;;  %v11120_v14 = vand.u32 4294901760, %v11109_v37 }
  0x64   :  { %9018 = vmatprep.subr.bf16.mxu0 %v9017_v3  ;;  %v10869_v12 = vsel %vm98_vm0, %v60_v43, 0  ;;  %v10886_v43 = vsel %vm98_vm0, %v61_v8, 0  ;;  %v10903_v8 = vand.u32 4294901760, %v10889_v48  ;;  %14328 = vst [vmem:[#allocation108_spill] sm:$0xff] %v11109_v37  ;;  %v14336_v37 = vld [vmem:[#allocation3_spill] sm:$0xff] }
  0x65   :  { %v10883_v56 = vand.u32 4294901760, %v10869_v12  ;;  %14330 = vst [vmem:[#allocation110_spill] sm:$0xff] %v11120_v14 }
  0x66   :  { %8325 = vmatmul.mubr.f32.gmra.mrb[6].mxu0 %v10338_v54  ;;  %14300 = vst [vmem:[#allocation80_spill] sm:$0xff] %v10903_v8 }
  0x67   :  { %8327 = vmatprep.mubr.f32.mxu0 %v10373_v20  ;;  %9020 = vmatpush3.bf16.msra.mxu0 %v9017_v3  ;;  %v10859_v3 = vand.u32 4294901760, %v10846_v6  ;;  %14298 = vst [vmem:[#allocation78_spill] sm:$0xff] %v10883_v56  ;;  %v76_v20 = vld [vmem:[%s13721_s0 + $0x1b0] sm:$0xff] }
  0x68   :  { %9022 = vmatprep.subr.bf16.mxu0 %v10239_v15  ;;  %v11029_v47 = vsel %vm98_vm0, %v76_v20, 0  ;;  %v11046_v20 = vsel %vm98_vm0, %v77_v44, 0  ;;  %v11063_v44 = vand.u32 4294901760, %v11049_v33  ;;  %v83_v33 = vld [vmem:[%s13721_s0 + $0x1e8] sm:$0xff] }
  0x69   :  { %14295 = vst [vmem:[#allocation75_spill] sm:$0xff] %v10859_v3  ;;  %14315 = vst [vmem:[#allocation95_spill] sm:$0xff] %v11046_v20  ;;  %v11059_v58 = vand.u32 4294901760, %v11046_v20  ;;  %v11106_v59 = vsel %vm98_vm0, %v83_v33, 0  ;;  %v85_v20 = vld [vmem:[%s13721_s0 + $0x1f8] sm:$0xff] }
  0x6a   :  { %8328 = vmatmul.mubr.f32.gmra.mrb[8].mxu0 %v10393_v40  ;;  %v75_v40 = vld [vmem:[%s13721_s0 + $0x1a8] sm:$0xff]  ;;  %14318 = vst [vmem:[#allocation98_spill] sm:$0xff] %v11063_v44  ;;  %14327 = vst [vmem:[#allocation107_spill] sm:$0xff] %v11106_v59  ;;  %v11123_v33 = vsel %vm98_vm0, %v85_v20, 0  ;;  %v14337_v20 = vld [vmem:[#allocation13_spill] sm:$0xff] }
  0x6b   :  { %8330 = vmatprep.mubr.f32.mxu0 %v10399_v55  ;;  %14317 = vst [vmem:[#allocation97_spill] sm:$0xff] %v11059_v58  ;;  %14331 = vst [vmem:[#allocation111_spill] sm:$0xff] %v11123_v33  ;;  %v11127_v38 = vand.u32 4294901760, %v11123_v33  ;;  %v14339_v33 = vld [vmem:[#allocation5_spill] sm:$0xff] }
  0x6d   :  { %14332 = vst [vmem:[#allocation112_spill] sm:$0xff] %v11127_v38 }
  0x6e   :  { %8331 = vmatmul.mubr.f32.gmra.mrb[10].mxu0 %v10403_v60 }
  0x6f   :  { %8333 = vmatprep.mubr.f32.mxu0 %v10418_v50  ;;  %v74_v50 = vld [vmem:[%s13721_s0 + $0x1a0] sm:$0xff] }
  0x70   :  { %v11009_v55 = vsel %vm98_vm0, %v74_v50, 0  ;;  %v11026_v50 = vsel %vm98_vm0, %v75_v40, 0  ;;  %v11043_v40 = vand.u32 4294901760, %v11029_v47 }
  0x71   :  { %v11039_v34 = vand.u32 4294901760, %v11026_v50 }
  0x72   :  { %8334 = vmatmul.mubr.f32.gmra.mrb[12].mxu0 %v10423_v26  ;;  %v73_v26 = vld [vmem:[%s13721_s0 + $0x198] sm:$0xff]  ;;  %14314 = vst [vmem:[#allocation94_spill] sm:$0xff] %v11043_v40 }
  0x73   :  { %8336 = vmatprep.mubr.f32.mxu0 %v10425_v45  ;;  %14313 = vst [vmem:[#allocation93_spill] sm:$0xff] %v11039_v34 }
  0x76   :  { %8337 = vmatmul.mubr.f32.gmra.mrb[14].mxu0 %v10476_v16 }
  0x77   :  { %8339 = vmatprep.mubr.f32.mxu0 %v10489_v10  ;;  %v72_v10 = vld [vmem:[%s13721_s0 + $0x190] sm:$0xff] }
  0x78   :  { %v10989_v45 = vsel %vm98_vm0, %v72_v10, 0  ;;  %v11006_v10 = vsel %vm98_vm0, %v73_v26, 0  ;;  %v11023_v26 = vand.u32 4294901760, %v11009_v55 }
  0x79   :  { %v11019_v54 = vand.u32 4294901760, %v11006_v10 }
  0x7a   :  { %8340 = vmatmul.mubr.f32.gmra.mrb[16].mxu0 %v10514_v35  ;;  %v71_v35 = vld [vmem:[%s13721_s0 + $0x188] sm:$0xff]  ;;  %14312 = vst [vmem:[#allocation92_spill] sm:$0xff] %v11023_v26 }
  0x7b   :  { %8342 = vmatprep.mubr.f32.mxu0 %v10519_v17  ;;  %14311 = vst [vmem:[#allocation91_spill] sm:$0xff] %v11019_v54 }
  0x7e   :  { %8343 = vmatmul.mubr.f32.gmra.mrb[18].mxu0 %v10521_v41 }
  0x7f   :  { %8345 = vmatprep.mubr.f32.mxu0 %v10542_v22  ;;  %v70_v22 = vld [vmem:[%s13721_s0 + $0x180] sm:$0xff] }
  0x80   :  { %v10969_v17 = vsel %vm98_vm0, %v70_v22, 0  ;;  %v10986_v22 = vsel %vm98_vm0, %v71_v35, 0  ;;  %v11003_v35 = vand.u32 4294901760, %v10989_v45 }
  0x81   :  { %v10999_v60 = vand.u32 4294901760, %v10986_v22 }
  0x82   :  { %8346 = vmatmul.mubr.f32.gmra.mrb[20].mxu0 %v10558_v63  ;;  %v69_v63 = vld [vmem:[%s13721_s0 + $0x178] sm:$0xff]  ;;  %14310 = vst [vmem:[#allocation90_spill] sm:$0xff] %v11003_v35 }
  0x83   :  { %8348 = vmatprep.mubr.f32.mxu0 %v10560_v49  ;;  %14309 = vst [vmem:[#allocation89_spill] sm:$0xff] %v10999_v60 }
  0x86   :  { %8349 = vmatmul.mubr.f32.gmra.mrb[22].mxu0 %v10562_v11 }
  0x87   :  { %8351 = vmatprep.mubr.f32.mxu0 %v10595_v24  ;;  %v68_v24 = vld [vmem:[%s13721_s0 + $0x170] sm:$0xff] }
  0x88   :  { %v10949_v49 = vsel %vm98_vm0, %v68_v24, 0  ;;  %v10966_v24 = vsel %vm98_vm0, %v69_v63, 0  ;;  %v10983_v63 = vand.u32 4294901760, %v10969_v17 }
  0x89   :  { %v10979_v16 = vand.u32 4294901760, %v10966_v24 }
  0x8a   :  { %8352 = vmatmul.mubr.f32.gmra.mrb[24].mxu0 %v10621_v21  ;;  %v67_v21 = vld [vmem:[%s13721_s0 + $0x168] sm:$0xff]  ;;  %14308 = vst [vmem:[#allocation88_spill] sm:$0xff] %v10983_v63 }
  0x8b   :  { %8354 = vmatprep.mubr.f32.mxu0 %v10633_v5  ;;  %14307 = vst [vmem:[#allocation87_spill] sm:$0xff] %v10979_v16 }
  0x8e   :  { %8355 = vmatmul.mubr.f32.gmra.mrb[26].mxu0 %v14293_v42 }
  0x8f   :  { %8357 = vmatprep.mubr.f32.mxu0 %v14294_v1  ;;  %v66_v1 = vld [vmem:[%s13721_s0 + $0x160] sm:$0xff] }
  0x90   :  { %v10929_v5 = vsel %vm98_vm0, %v66_v1, 0  ;;  %v10946_v1 = vsel %vm98_vm0, %v67_v21, 0  ;;  %v10963_v21 = vand.u32 4294901760, %v10949_v49 }
  0x91   :  { %v10959_v41 = vand.u32 4294901760, %v10946_v1 }
  0x92   :  { %8358 = vmatmul.mubr.f32.gmra.mrb[28].mxu0 %v10699_v19  ;;  %v65_v19 = vld [vmem:[%s13721_s0 + $0x158] sm:$0xff]  ;;  %14306 = vst [vmem:[#allocation86_spill] sm:$0xff] %v10963_v21 }
  0x93   :  { %8360 = vmatprep.mubr.f32.mxu0 %v10701_v46  ;;  %14305 = vst [vmem:[#allocation85_spill] sm:$0xff] %v10959_v41 }
  0x96   :  { %8361 = vmatmul.mubr.f32.gmra.mrb[30].mxu0 %v10739_v53  ;;  %v10899_v53 = vand.u32 4294901760, %v10886_v43 }
  0x97   :  { %8363 = vmatprep.mubr.f32.mxu0 %v10741_v61  ;;  %v64_v61 = vld [vmem:[%s13721_s0 + $0x150] sm:$0xff] }
  0x98   :  { %14299 = vst [vmem:[#allocation79_spill] sm:$0xff] %v10899_v53  ;;  %v10909_v46 = vsel %vm98_vm0, %v64_v61, 0  ;;  %v10926_v61 = vsel %vm98_vm0, %v65_v19, 0  ;;  %v10943_v19 = vand.u32 4294901760, %v10929_v5 }
  0x99   :  { %v10939_v11 = vand.u32 4294901760, %v10926_v61 }
  0x9a   :  { %8364 = vmatmul.mubr.f32.gmra.mrb[32].mxu0 %v10758_v52  ;;  %v63_v52 = vld [vmem:[%s13721_s0 + $0x148] sm:$0xff]  ;;  %14304 = vst [vmem:[#allocation84_spill] sm:$0xff] %v10943_v19 }
  0x9b   :  { %8366 = vmatprep.mubr.f32.mxu0 %v10843_v57  ;;  %v10906_v2 = vsel %vm98_vm0, %v63_v52, 0  ;;  %v10923_v52 = vand.u32 4294901760, %v10909_v46  ;;  %14303 = vst [vmem:[#allocation83_spill] sm:$0xff] %v10939_v11 }
  0x9c   :  { %v10919_v42 = vand.u32 4294901760, %v10906_v2 }
  0x9d   :  { %14302 = vst [vmem:[#allocation82_spill] sm:$0xff] %v10923_v52 }
  0x9e   :  { %8367 = vmatmul.mubr.f32.gmra.mrb[34].mxu0 %v10859_v3  ;;  %14301 = vst [vmem:[#allocation81_spill] sm:$0xff] %v10919_v42 }
  0x9f   :  { %8369 = vmatprep.mubr.f32.mxu0 %v10863_v36 }
  0xa2   :  { %8370 = vmatmul.mubr.f32.gmra.mrb[36].mxu0 %v10879_v28 }
  0xa3   :  { %8372 = vmatprep.mubr.f32.mxu0 %v10883_v56 }
  0xa6   :  { %8373 = vmatmul.mubr.f32.gmra.mrb[38].mxu0 %v10899_v53 }
  0xa7   :  { %8375 = vmatprep.mubr.f32.mxu0 %v10903_v8 }
  0xaa   :  { %8376 = vmatmul.mubr.f32.gmra.mrb[40].mxu0 %v10919_v42 }
  0xab   :  { %8378 = vmatprep.mubr.f32.mxu0 %v10923_v52 }
  0xae   :  { %8379 = vmatmul.mubr.f32.gmra.mrb[42].mxu0 %v10939_v11 }
  0xaf   :  { %8381 = vmatprep.mubr.f32.mxu0 %v10943_v19 }
  0xb2   :  { %8382 = vmatmul.mubr.f32.gmra.mrb[44].mxu0 %v10959_v41 }
  0xb3   :  { %8384 = vmatprep.mubr.f32.mxu0 %v10963_v21 }
  0xb6   :  { %8385 = vmatmul.mubr.f32.gmra.mrb[46].mxu0 %v10979_v16 }
  0xb7   :  { %8387 = vmatprep.mubr.f32.mxu0 %v10983_v63 }
  0xba   :  { %8388 = vmatmul.mubr.f32.gmra.mrb[48].mxu0 %v10999_v60 }
  0xbb   :  { %8390 = vmatprep.mubr.f32.mxu0 %v11003_v35 }
  0xbe   :  { %8391 = vmatmul.mubr.f32.gmra.mrb[50].mxu0 %v11019_v54 }
  0xbf   :  { %8393 = vmatprep.mubr.f32.mxu0 %v11023_v26 }
  0xc2   :  { %8394 = vmatmul.mubr.f32.gmra.mrb[52].mxu0 %v11039_v34 }
  0xc3   :  { %8396 = vmatprep.mubr.f32.mxu0 %v11043_v40 }
  0xc6   :  { %8397 = vmatmul.mubr.f32.gmra.mrb[54].mxu0 %v11059_v58 }
  0xc7   :  { %8399 = vmatprep.mubr.f32.mxu0 %v11063_v44  ;;  %v11099_v44 = vand.u32 4294901760, %v11086_v23  ;;  %v11116_v23 = vand.u32 4294901760, %v11106_v59  ;;  %v14334_v59 = vld [vmem:[#allocation10_spill] sm:$0xff] }
  0xc9   :  { %14325 = vst [vmem:[#allocation105_spill] sm:$0xff] %v11099_v44  ;;  %14329 = vst [vmem:[#allocation109_spill] sm:$0xff] %v11116_v23 }
  0xca   :  { %8400 = vmatmul.mubr.f32.gmra.mrb[56].mxu0 %v11079_v27 }
  0xcb   :  { %8402 = vmatprep.mubr.f32.mxu0 %v11083_v29 }
  0xce   :  { %8403 = vmatmul.mubr.f32.gmra.mrb[58].mxu0 %v11099_v44  ;;  %v14333_v44 = vld [vmem:[#allocation7_spill] sm:$0xff] }
  0xcf   :  { %8405 = vmatprep.mubr.f32.mxu0 %v11103_v0  ;;  %v14335_v0 = vld [vmem:[#allocation12_spill] sm:$0xff] }
  0xd2   :  { %8406 = vmatmul.mubr.f32.gmra.mrb[60].mxu0 %v11116_v23  ;;  %v14338_v23 = vld [vmem:[#allocation15_spill] sm:$0xff] }
  0xd3   :  { %8408 = vmatprep.mubr.f32.mxu0 %v11120_v14  ;;  %v14340_v14 = vld [vmem:[#allocation18_spill] sm:$0xff] }
  0xd6   :  { %8409 = vmatmul.mubr.f32.gmra.mrb[62].mxu0 %v11127_v38  ;;  %v14341_v38 = vld [vmem:[#allocation20_spill] sm:$0xff] }
  0xd7   :  { %8427 = vmatprep.mubr.f32.mxu0 %v14333_v44  ;;  %v14348_v44 = vld [vmem:[#allocation33_spill] sm:$0xff] }
  0xda   :  { %8428 = vmatmul.mubr.f32.vlgmr.msra.gmra.mrb[0].mxu0 %v14334_v59  ;;  %v14342_v59 = vld [vmem:[#allocation17_spill] sm:$0xff] }
  0xdb   :  { %8430 = vmatprep.mubr.f32.mxu0 %v14335_v0  ;;  %9024 = vmatpush3.bf16.msra.mxu0 %v10239_v15  ;;  %v14343_v0 = vld [vmem:[#allocation21_spill] sm:$0xff]  ;;  %v14344_v15 = vld [vmem:[#allocation23_spill] sm:$0xff] }
  0xdc   :  { %9026 = vmatprep.subr.bf16.mxu0 %v14336_v37 }
  0xde   :  { %8431 = vmatmul.mubr.f32.gmra.mrb[2].mxu0 %v14337_v20  ;;  %v14345_v20 = vld [vmem:[#allocation27_spill] sm:$0xff] }
  0xdf   :  { %8433 = vmatprep.mubr.f32.mxu0 %v14338_v23  ;;  %9028 = vmatpush3.bf16.msra.mxu0 %v14336_v37  ;;  %v14346_v23 = vld [vmem:[#allocation29_spill] sm:$0xff]  ;;  %v14347_v37 = vld [vmem:[#allocation32_spill] sm:$0xff] }
  0xe0   :  { %9030 = vmatprep.subr.bf16.mxu0 %v14339_v33 }
  0xe2   :  { %8434 = vmatmul.mubr.f32.gmra.mrb[4].mxu0 %v14340_v14  ;;  %v14349_v14 = vld [vmem:[#allocation34_spill] sm:$0xff] }
  0xe3   :  { %8436 = vmatprep.mubr.f32.mxu0 %v14341_v38  ;;  %9032 = vmatpush3.bf16.msra.mxu0 %v14339_v33  ;;  %v14350_v38 = vld [vmem:[#allocation35_spill] sm:$0xff]  ;;  %v14351_v33 = vand.u32 4294901760, %v10430_v25 }
  0xe4   :  { %9034 = vmatprep.subr.bf16.mxu0 %v14342_v59  ;;  %v14360_v25 = vld [vmem:[#allocation55_spill] sm:$0xff] }
  0xe6   :  { %8437 = vmatmul.mubr.f32.gmra.mrb[6].mxu0 %v14343_v0  ;;  %v14352_v0 = vand.u32 4294901760, %v10452_v30  ;;  %v14361_v30 = vld [vmem:[#allocation56_spill] sm:$0xff] }
  0xe7   :  { %8439 = vmatprep.mubr.f32.mxu0 %v14344_v15  ;;  %9036 = vmatpush3.bf16.msra.mxu0 %v14342_v59  ;;  %v14353_v59 = vld [vmem:[#allocation38_spill] sm:$0xff] }
  0xe8   :  { %v11157_v29 = vpack.c.bf16 %v14352_v0, %v14351_v33  ;;  %v14362_v0 = vld [vmem:[#allocation58_spill] sm:$0xff]  ;;  %v14363_v33 = vld [vmem:[#allocation61_spill] sm:$0xff] }
  0xea   :  { %8440 = vmatmul.mubr.f32.gmra.mrb[8].mxu0 %v14345_v20  ;;  %9038 = vmatprep.subr.bf16.mxu0 %v11157_v29  ;;  %v14354_v20 = vld [vmem:[#allocation39_spill] sm:$0xff] }
  0xeb   :  { %8442 = vmatprep.mubr.f32.mxu0 %v14346_v23  ;;  %v14355_v23 = vld [vmem:[#allocation43_spill] sm:$0xff] }
  0xee   :  { %8443 = vmatmul.mubr.f32.gmra.mrb[10].mxu0 %v14347_v37  ;;  %v14356_v37 = vld [vmem:[#allocation45_spill] sm:$0xff] }
  0xef   :  { %8445 = vmatprep.mubr.f32.mxu0 %v14348_v44  ;;  %v14357_v44 = vld [vmem:[#allocation46_spill] sm:$0xff] }
  0xf2   :  { %8446 = vmatmul.mubr.f32.gmra.mrb[12].mxu0 %v14349_v14  ;;  %v14358_v14 = vld [vmem:[#allocation52_spill] sm:$0xff] }
  0xf3   :  { %8448 = vmatprep.mubr.f32.mxu0 %v14350_v38  ;;  %v14359_v38 = vld [vmem:[#allocation53_spill] sm:$0xff] }
  0xf6   :  { %8449 = vmatmul.mubr.f32.gmra.mrb[14].mxu0 %v14353_v59 }
  0xf7   :  { %8451 = vmatprep.mubr.f32.mxu0 %v14354_v20  ;;  %v14364_v20 = vld [vmem:[#allocation65_spill] sm:$0xff] }
  0xfa   :  { %8452 = vmatmul.mubr.f32.gmra.mrb[16].mxu0 %v14355_v23 }
  0xfb   :  { %8454 = vmatprep.mubr.f32.mxu0 %v14356_v37 }
  0xfe   :  { %8455 = vmatmul.mubr.f32.gmra.mrb[18].mxu0 %v14357_v44 }
  0xff   :  { %8457 = vmatprep.mubr.f32.mxu0 %v14358_v14 }
 0x102   :  { %8458 = vmatmul.mubr.f32.gmra.mrb[20].mxu0 %v14359_v38 }
 0x103   :  { %8460 = vmatprep.mubr.f32.mxu0 %v14360_v25 }
 0x106   :  { %8461 = vmatmul.mubr.f32.gmra.mrb[22].mxu0 %v14361_v30  ;;  %v11180_v30 = vsub.f32 %v10832_v4, %v10843_v57  ;;  %v11200_v4 = vsub.f32 %v10869_v12, %v10883_v56  ;;  %v11220_v12 = vsub.f32 %v10909_v46, %v10923_v52  ;;  %v11240_v46 = vsub.f32 %v10949_v49, %v10963_v21  ;;  %v14393_v56 = vld [vmem:[#allocation64_spill] sm:$0xff] }
 0x107   :  { %8463 = vmatprep.mubr.f32.mxu0 %v14362_v0  ;;  %v11260_v49 = vsub.f32 %v10989_v45, %v11003_v35  ;;  %v11280_v45 = vsub.f32 %v11029_v47, %v11043_v40  ;;  %v14369_v47 = vld [vmem:[#allocation102_spill] sm:$0xff]  ;;  %v14370_v40 = vld [vmem:[#allocation100_spill] sm:$0xff] }
 0x10a   :  { %8464 = vmatmul.mubr.f32.gmra.mrb[24].mxu0 %v10643_v31 }
 0x10b   :  { %8466 = vmatprep.mubr.f32.mxu0 %v14363_v33  ;;  %v11185_v33 = vsub.f32 %v10846_v6, %v10859_v3  ;;  %v11205_v6 = vsub.f32 %v10886_v43, %v10899_v53  ;;  %v11225_v43 = vsub.f32 %v10926_v61, %v10939_v11  ;;  %v11245_v61 = vsub.f32 %v10966_v24, %v10979_v16  ;;  %v14385_v11 = vld [vmem:[#allocation51_spill] sm:$0xff] }
 0x10c   :  { %v11265_v24 = vsub.f32 %v11006_v10, %v11019_v54  ;;  %v14365_v10 = vld [vmem:[#allocation95_spill] sm:$0xff]  ;;  %v14386_v52 = vand.u32 4294901760, %v14385_v11 }
 0x10d   :  { %v11285_v54 = vsub.f32 %v14365_v10, %v11059_v58  ;;  %v14371_v10 = vld [vmem:[#allocation105_spill] sm:$0xff]  ;;  %v14372_v58 = vld [vmem:[#allocation103_spill] sm:$0xff] }
 0x10e   :  { %8467 = vmatmul.mubr.f32.gmra.mrb[26].mxu0 %v14364_v20 }
 0x10f   :  { %8469 = vmatprep.mubr.f32.mxu0 %v10694_v18 }
 0x112   :  { %8470 = vmatmul.mubr.f32.gmra.mrb[28].mxu0 %v10734_v7  ;;  %v11190_v7 = vsub.f32 %v10849_v32, %v10863_v36  ;;  %v11210_v32 = vsub.f32 %v10889_v48, %v10903_v8  ;;  %v11230_v48 = vsub.f32 %v10929_v5, %v10943_v19  ;;  %v11250_v5 = vsub.f32 %v10969_v17, %v10983_v63  ;;  %v14389_v8 = vld [vmem:[#allocation12_spill] sm:$0xff] }
 0x113   :  { %8472 = vmatprep.mubr.f32.mxu0 %v10737_v9  ;;  %v11270_v17 = vsub.f32 %v11009_v55, %v11023_v26  ;;  %v14366_v55 = vld [vmem:[#allocation98_spill] sm:$0xff]  ;;  %v14367_v26 = vld [vmem:[#allocation96_spill] sm:$0xff]  ;;  %v11305_v63 = vsub.f32 %v14372_v58, %v14371_v10  ;;  %v14380_v10 = vld [vmem:[#allocation111_spill] sm:$0xff]  ;;  %v14390_v53 = vand.u32 4294901760, %v14389_v8 }
 0x114   :  { %v11290_v35 = vsub.f32 %v14367_v26, %v14366_v55  ;;  %v14373_v26 = vld [vmem:[#allocation106_spill] sm:$0xff]  ;;  %v14374_v55 = vld [vmem:[#allocation104_spill] sm:$0xff]  ;;  %v14401_v8 = vld [vmem:[#allocation69_spill] sm:$0xff] }
 0x115   :  { %v11310_v16 = vsub.f32 %v14374_v55, %v14373_v26  ;;  %v14379_v58 = vld [vmem:[#allocation112_spill] sm:$0xff]  ;;  %v14381_v55 = vld [vmem:[#allocation7_spill] sm:$0xff] }
 0x116   :  { %8473 = vmatmul.mubr.f32.gmra.mrb[30].mxu0 %v10756_v62  ;;  %v11325_v19 = vsub.f32 %v14380_v10, %v14379_v58  ;;  %v14382_v26 = vand.u32 4294901760, %v14381_v55  ;;  %v14391_v10 = vld [vmem:[#allocation63_spill] sm:$0xff] }
 0x117   :  { %8475 = vmatprep.mubr.f32.mxu0 %v10765_v13  ;;  %v11195_v13 = vsub.f32 %v10866_v51, %v10879_v28  ;;  %v11215_v51 = vsub.f32 %v10906_v2, %v10919_v42  ;;  %v11235_v2 = vsub.f32 %v10946_v1, %v10959_v41  ;;  %v11255_v1 = vsub.f32 %v10986_v22, %v10999_v60 }
 0x118   :  { %v11275_v22 = vsub.f32 %v11026_v50, %v11039_v34  ;;  %v14368_v50 = vld [vmem:[#allocation99_spill] sm:$0xff]  ;;  %v11300_v60 = vsub.f32 %v14370_v40, %v14369_v47  ;;  %v14377_v40 = vld [vmem:[#allocation110_spill] sm:$0xff]  ;;  %v14378_v47 = vld [vmem:[#allocation108_spill] sm:$0xff]  ;;  %v14392_v58 = vand.u32 4294901760, %v14391_v10  ;;  %v14394_v28 = vand.u32 4294901760, %v14393_v56 }
 0x119   :  { %v11295_v34 = vsub.f32 %v14368_v50, %v11079_v27  ;;  %v14375_v50 = vld [vmem:[#allocation109_spill] sm:$0xff]  ;;  %v14376_v27 = vld [vmem:[#allocation107_spill] sm:$0xff]  ;;  %v11320_v41 = vsub.f32 %v14378_v47, %v14377_v40  ;;  %v14387_v47 = vld [vmem:[#allocation10_spill] sm:$0xff]  ;;  %v14409_v56 = vand.u32 4294901760, %v14344_v15 }
 0x11a   :  { %8476 = vmatmul.mubr.f32.gmra.mrb[32].mxu0 %v10774_v39  ;;  %v11315_v21 = vsub.f32 %v14376_v27, %v14375_v50  ;;  %v14383_v27 = vld [vmem:[#allocation50_spill] sm:$0xff]  ;;  %v14388_v40 = vand.u32 4294901760, %v14387_v47  ;;  %v9045_v55 = vpack.c.bf16 %v14394_v28, %v14392_v58  ;;  %v14405_v10 = vld [vmem:[#allocation20_spill] sm:$0xff]  ;;  %v14407_v28 = vld [vmem:[#allocation21_spill] sm:$0xff] }
 0x11b   :  { %8478 = vmatprep.mubr.f32.mxu0 %v11180_v30  ;;  %v14384_v50 = vand.u32 4294901760, %v14383_v27  ;;  %v14397_v27 = vld [vmem:[#allocation15_spill] sm:$0xff]  ;;  %v14406_v3 = vand.u32 4294901760, %v14405_v10 }
 0x11c   :  { %v14398_v11 = vand.u32 4294901760, %v14397_v27  ;;  %v14411_v58 = vld [vmem:[#allocation27_spill] sm:$0xff]  ;;  %v14413_v27 = vld [vmem:[#allocation29_spill] sm:$0xff] }
 0x11d   :  { %v9041_v42 = vpack.c.bf16 %v14386_v52, %v14384_v50  ;;  %v14399_v52 = vld [vmem:[#allocation68_spill] sm:$0xff]  ;;  %v14421_v15 = vld [vmem:[#allocation35_spill] sm:$0xff] }
 0x11e   :  { %8479 = vmatmul.mubr.f32.gmra.mrb[34].mxu0 %v11185_v33  ;;  %v14400_v50 = vand.u32 4294901760, %v14399_v52  ;;  %v14415_v52 = vld [vmem:[#allocation32_spill] sm:$0xff] }
 0x11f   :  { %8481 = vmatprep.mubr.f32.mxu0 %v11190_v7 }
 0x122   :  { %8482 = vmatmul.mubr.f32.gmra.mrb[36].mxu0 %v11195_v13 }
 0x123   :  { %8484 = vmatprep.mubr.f32.mxu0 %v11200_v4 }
 0x126   :  { %8485 = vmatmul.mubr.f32.gmra.mrb[38].mxu0 %v11205_v6 }
 0x127   :  { %8487 = vmatprep.mubr.f32.mxu0 %v11210_v32 }
 0x12a   :  { %8488 = vmatmul.mubr.f32.gmra.mrb[40].mxu0 %v11215_v51 }
 0x12b   :  { %8490 = vmatprep.mubr.f32.mxu0 %v11220_v12 }
 0x12e   :  { %8491 = vmatmul.mubr.f32.gmra.mrb[42].mxu0 %v11225_v43 }
 0x12f   :  { %8493 = vmatprep.mubr.f32.mxu0 %v11230_v48 }
 0x132   :  { %8494 = vmatmul.mubr.f32.gmra.mrb[44].mxu0 %v11235_v2 }
 0x133   :  { %8496 = vmatprep.mubr.f32.mxu0 %v11240_v46 }
 0x136   :  { %8497 = vmatmul.mubr.f32.gmra.mrb[46].mxu0 %v11245_v61 }
 0x137   :  { %8499 = vmatprep.mubr.f32.mxu0 %v11250_v5 }
 0x13a   :  { %8500 = vmatmul.mubr.f32.gmra.mrb[48].mxu0 %v11255_v1 }
 0x13b   :  { %8502 = vmatprep.mubr.f32.mxu0 %v11260_v49 }
 0x13e   :  { %8503 = vmatmul.mubr.f32.gmra.mrb[50].mxu0 %v11265_v24 }
 0x13f   :  { %8505 = vmatprep.mubr.f32.mxu0 %v11270_v17 }
 0x142   :  { %8506 = vmatmul.mubr.f32.gmra.mrb[52].mxu0 %v11275_v22 }
 0x143   :  { %8508 = vmatprep.mubr.f32.mxu0 %v11280_v45 }
 0x146   :  { %8509 = vmatmul.mubr.f32.gmra.mrb[54].mxu0 %v11285_v54 }
 0x147   :  { %8511 = vmatprep.mubr.f32.mxu0 %v11290_v35 }
 0x14a   :  { %8512 = vmatmul.mubr.f32.gmra.mrb[56].mxu0 %v11295_v34 }
 0x14b   :  { %8514 = vmatprep.mubr.f32.mxu0 %v11300_v60 }
 0x14e   :  { %8515 = vmatmul.mubr.f32.gmra.mrb[58].mxu0 %v11305_v63 }
 0x14f   :  { %8517 = vmatprep.mubr.f32.mxu0 %v11310_v16 }
 0x152   :  { %8518 = vmatmul.mubr.f32.gmra.mrb[60].mxu0 %v11315_v21 }
 0x153   :  { %8520 = vmatprep.mubr.f32.mxu0 %v11320_v41 }
 0x156   :  { %8521 = vmatmul.mubr.f32.gmra.mrb[62].mxu0 %v11325_v19 }
 0x157   :  { %8539 = vmatprep.mubr.f32.mxu0 %v14382_v26  ;;  %v14395_v26 = vld [vmem:[#allocation13_spill] sm:$0xff] }
 0x158   :  { %v14396_v36 = vand.u32 4294901760, %v14395_v26  ;;  %v14412_v26 = vand.u32 4294901760, %v14411_v58  ;;  %v14429_v58 = vand.u32 4294901760, %v14358_v14  ;;  %v14438_v14 = vand.u32 4294901760, %v14364_v20 }
 0x159   :  { %v14446_v20 = vand.u32 4294901760, %v10774_v39  ;;  %v13986_v39 = vand.u32 4294901760, %v11205_v6 }
 0x15a   :  { %8540 = vmatmul.mubr.f32.vlgmr.msra.gmra.mrb[0].mxu0 %v14388_v40 }
 0x15b   :  { %8542 = vmatprep.mubr.f32.mxu0 %v14390_v53  ;;  %9040 = vmatpush3.bf16.msra.mxu0 %v11157_v29  ;;  %v14402_v53 = vand.u32 4294901760, %v14401_v8  ;;  %v14403_v29 = vld [vmem:[#allocation18_spill] sm:$0xff] }
 0x15c   :  { %9042 = vmatprep.subr.bf16.mxu0 %v9041_v42  ;;  %v14404_v47 = vand.u32 4294901760, %v14403_v29  ;;  %v14419_v8 = vld [vmem:[#allocation34_spill] sm:$0xff]  ;;  %v14422_v29 = vand.u32 4294901760, %v14421_v15  ;;  %v13985_v15 = vand.u32 4294901760, %v11210_v32 }
 0x15d   :  { %v9049_v40 = vpack.c.bf16 %v14402_v53, %v14400_v50  ;;  %v14416_v50 = vand.u32 4294901760, %v14415_v52  ;;  %v14420_v53 = vand.u32 4294901760, %v14419_v8  ;;  %v13991_v8 = vand.u32 4294901760, %v11180_v30 }
 0x15e   :  { %8543 = vmatmul.mubr.f32.gmra.mrb[2].mxu0 %v14396_v36  ;;  %v14408_v36 = vand.u32 4294901760, %v14407_v28  ;;  %v14426_v28 = vand.u32 4294901760, %v14355_v23  ;;  %v14434_v23 = vand.u32 4294901760, %v14362_v0  ;;  %v14443_v0 = vand.u32 4294901760, %v10756_v62 }
 0x15f   :  { %8545 = vmatprep.mubr.f32.mxu0 %v14398_v11  ;;  %9044 = vmatpush3.bf16.msra.mxu0 %v9041_v42  ;;  %v14410_v42 = vld [vmem:[#allocation2_spill] sm:$0xff]  ;;  %v14414_v11 = vand.u32 4294901760, %v14413_v27  ;;  %v14432_v27 = vld [vmem:[#allocation56_spill] sm:$0xff]  ;;  %v13987_v62 = vand.u32 4294901760, %v11200_v4 }
 0x160   :  { %9046 = vmatprep.subr.bf16.mxu0 %v9045_v55 }
 0x162   :  { %8546 = vmatmul.mubr.f32.gmra.mrb[4].mxu0 %v14404_v47  ;;  %v14424_v47 = vld [vmem:[#allocation39_spill] sm:$0xff] }
 0x163   :  { %8548 = vmatprep.mubr.f32.mxu0 %v14406_v3  ;;  %9048 = vmatpush3.bf16.msra.mxu0 %v9045_v55  ;;  %v14417_v3 = vld [vmem:[#allocation33_spill] sm:$0xff]  ;;  %v14425_v10 = vand.u32 4294901760, %v14424_v47  ;;  %v13982_v47 = vand.u32 4294901760, %v11225_v43 }
 0x164   :  { %9050 = vmatprep.subr.bf16.mxu0 %v9049_v40  ;;  %v14418_v55 = vand.u32 4294901760, %v14417_v3  ;;  %v14442_v3 = vand.u32 4294901760, %v10737_v9  ;;  %v13988_v9 = vand.u32 4294901760, %v11195_v13 }
 0x166   :  { %8549 = vmatmul.mubr.f32.gmra.mrb[6].mxu0 %v14408_v36  ;;  %v14427_v36 = vand.u32 4294901760, %v14356_v37  ;;  %v14435_v37 = vand.u32 4294901760, %v10643_v31  ;;  %v14444_v31 = vld [vmem:[#allocation74_spill] sm:$0xff] }
 0x167   :  { %8551 = vmatprep.mubr.f32.mxu0 %v14409_v56  ;;  %9052 = vmatpush3.bf16.msra.mxu0 %v9049_v40  ;;  %v14423_v40 = vand.u32 4294901760, %v14353_v59  ;;  %v14428_v56 = vand.u32 4294901760, %v14357_v44  ;;  %v14431_v59 = vand.u32 4294901760, %v14360_v25  ;;  %v14436_v44 = vld [vmem:[#allocation61_spill] sm:$0xff]  ;;  %v14440_v25 = vld [vmem:[#allocation70_spill] sm:$0xff] }
 0x168   :  { %9054 = vmatprep.subr.bf16.mxu0 %v14410_v42  ;;  %v14437_v52 = vand.u32 4294901760, %v14436_v44  ;;  %v13970_v44 = vand.u32 4294901760, %v11285_v54 }
 0x16a   :  { %8552 = vmatmul.mubr.f32.gmra.mrb[8].mxu0 %v14412_v26  ;;  %v14430_v26 = vand.u32 4294901760, %v14359_v38  ;;  %v14439_v38 = vand.u32 4294901760, %v10694_v18  ;;  %v13990_v18 = vand.u32 4294901760, %v11185_v33 }
 0x16b   :  { %8554 = vmatprep.mubr.f32.mxu0 %v14414_v11  ;;  %v14433_v11 = vand.u32 4294901760, %v14432_v27  ;;  %v13974_v27 = vand.u32 4294901760, %v11265_v24 }
 0x16e   :  { %8555 = vmatmul.mubr.f32.gmra.mrb[10].mxu0 %v14416_v50  ;;  %v14441_v50 = vand.u32 4294901760, %v14440_v25  ;;  %v13962_v25 = vand.u32 4294901760, %v11305_v63 }
 0x16f   :  { %8557 = vmatprep.mubr.f32.mxu0 %v14418_v55  ;;  %v14445_v55 = vand.u32 4294901760, %v14444_v31  ;;  %v13968_v31 = vand.u32 4294901760, %v11325_v19 }
 0x172   :  { %8558 = vmatmul.mubr.f32.gmra.mrb[12].mxu0 %v14420_v53  ;;  %v13989_v53 = vand.u32 4294901760, %v11190_v7 }
 0x173   :  { %8560 = vmatprep.mubr.f32.mxu0 %v14422_v29  ;;  %v13984_v29 = vand.u32 4294901760, %v11215_v51 }
 0x176   :  { %8561 = vmatmul.mubr.f32.gmra.mrb[14].mxu0 %v14423_v40  ;;  %v13983_v40 = vand.u32 4294901760, %v11220_v12 }
 0x177   :  { %8563 = vmatprep.mubr.f32.mxu0 %v14425_v10  ;;  %v13981_v10 = vand.u32 4294901760, %v11230_v48 }
 0x17a   :  { %8564 = vmatmul.mubr.f32.gmra.mrb[16].mxu0 %v14426_v28  ;;  %v13980_v28 = vand.u32 4294901760, %v11235_v2 }
 0x17b   :  { %8566 = vmatprep.mubr.f32.mxu0 %v14427_v36  ;;  %v13979_v36 = vand.u32 4294901760, %v11240_v46 }
 0x17e   :  { %8567 = vmatmul.mubr.f32.gmra.mrb[18].mxu0 %v14428_v56  ;;  %v13978_v56 = vand.u32 4294901760, %v11245_v61 }
 0x17f   :  { %8569 = vmatprep.mubr.f32.mxu0 %v14429_v58  ;;  %v13977_v58 = vand.u32 4294901760, %v11250_v5 }
 0x182   :  { %8570 = vmatmul.mubr.f32.gmra.mrb[20].mxu0 %v14430_v26  ;;  %v13976_v26 = vand.u32 4294901760, %v11255_v1 }
 0x183   :  { %8572 = vmatprep.mubr.f32.mxu0 %v14431_v59  ;;  %v13975_v59 = vand.u32 4294901760, %v11260_v49 }
 0x186   :  { %8573 = vmatmul.mubr.f32.gmra.mrb[22].mxu0 %v14433_v11  ;;  %v13973_v11 = vand.u32 4294901760, %v11270_v17 }
 0x187   :  { %8575 = vmatprep.mubr.f32.mxu0 %v14434_v23  ;;  %v13972_v23 = vand.u32 4294901760, %v11275_v22 }
 0x18a   :  { %8576 = vmatmul.mubr.f32.gmra.mrb[24].mxu0 %v14435_v37  ;;  %v13971_v37 = vand.u32 4294901760, %v11280_v45 }
 0x18b   :  { %8578 = vmatprep.mubr.f32.mxu0 %v14437_v52  ;;  %v13969_v52 = vand.u32 4294901760, %v11290_v35 }
 0x18e   :  { %8579 = vmatmul.mubr.f32.gmra.mrb[26].mxu0 %v14438_v14  ;;  %v13967_v14 = vand.u32 4294901760, %v11295_v34 }
 0x18f   :  { %8581 = vmatprep.mubr.f32.mxu0 %v14439_v38  ;;  %v13964_v38 = vand.u32 4294901760, %v11300_v60 }
 0x192   :  { %8582 = vmatmul.mubr.f32.gmra.mrb[28].mxu0 %v14441_v50  ;;  %v13963_v50 = vand.u32 4294901760, %v11310_v16 }
 0x193   :  { %8584 = vmatprep.mubr.f32.mxu0 %v14442_v3  ;;  %v13965_v3 = vand.u32 4294901760, %v11315_v21 }
 0x196   :  { %8585 = vmatmul.mubr.f32.gmra.mrb[30].mxu0 %v14443_v0  ;;  %v13966_v0 = vand.u32 4294901760, %v11320_v41 }
 0x197   :  { %8587 = vmatprep.mubr.f32.mxu0 %v14445_v55  ;;  %v14447_v55 = vld [vmem:[#allocation4_spill] sm:$0xff] }
 0x19a   :  { %8588 = vmatmul.mubr.f32.gmra.mrb[32].mxu0 %v14446_v20  ;;  %v14448_v20 = vld [vmem:[#allocation6_spill] sm:$0xff] }
 0x19b   :  { %8590 = vmatprep.mubr.f32.mxu0 %v13991_v8  ;;  %v14482_v8 = vld [vmem:[#allocation72_spill] sm:$0xff] }
 0x19e   :  { %8591 = vmatmul.mubr.f32.gmra.mrb[34].mxu0 %v13990_v18  ;;  %v14481_v18 = vld [vmem:[#allocation71_spill] sm:$0xff] }
 0x19f   :  { %8593 = vmatprep.mubr.f32.mxu0 %v13989_v53  ;;  %v14480_v53 = vld [vmem:[#allocation67_spill] sm:$0xff] }
 0x1a2   :  { %8594 = vmatmul.mubr.f32.gmra.mrb[36].mxu0 %v13988_v9  ;;  %v14479_v9 = vld [vmem:[#allocation66_spill] sm:$0xff] }
 0x1a3   :  { %8596 = vmatprep.mubr.f32.mxu0 %v13987_v62  ;;  %v14478_v62 = vld [vmem:[#allocation62_spill] sm:$0xff] }
 0x1a6   :  { %8597 = vmatmul.mubr.f32.gmra.mrb[38].mxu0 %v13986_v39  ;;  %v14477_v39 = vld [vmem:[#allocation60_spill] sm:$0xff] }
 0x1a7   :  { %8599 = vmatprep.mubr.f32.mxu0 %v13985_v15  ;;  %v14476_v15 = vld [vmem:[#allocation59_spill] sm:$0xff] }
 0x1aa   :  { %8600 = vmatmul.mubr.f32.gmra.mrb[40].mxu0 %v13984_v29  ;;  %v14475_v29 = vld [vmem:[#allocation57_spill] sm:$0xff] }
 0x1ab   :  { %8602 = vmatprep.mubr.f32.mxu0 %v13983_v40  ;;  %v14474_v40 = vld [vmem:[#allocation54_spill] sm:$0xff] }
 0x1ae   :  { %8603 = vmatmul.mubr.f32.gmra.mrb[42].mxu0 %v13982_v47  ;;  %v14473_v47 = vld [vmem:[#allocation49_spill] sm:$0xff] }
 0x1af   :  { %8605 = vmatprep.mubr.f32.mxu0 %v13981_v10  ;;  %v14472_v10 = vld [vmem:[#allocation48_spill] sm:$0xff] }
 0x1b2   :  { %8606 = vmatmul.mubr.f32.gmra.mrb[44].mxu0 %v13980_v28  ;;  %v14471_v28 = vld [vmem:[#allocation47_spill] sm:$0xff] }
 0x1b3   :  { %8608 = vmatprep.mubr.f32.mxu0 %v13979_v36  ;;  %v14470_v36 = vld [vmem:[#allocation44_spill] sm:$0xff] }
 0x1b6   :  { %8609 = vmatmul.mubr.f32.gmra.mrb[46].mxu0 %v13978_v56  ;;  %v14468_v56 = vld [vmem:[#allocation41_spill] sm:$0xff] }
 0x1b7   :  { %8611 = vmatprep.mubr.f32.mxu0 %v13977_v58  ;;  %v14467_v58 = vld [vmem:[#allocation40_spill] sm:$0xff] }
 0x1ba   :  { %8612 = vmatmul.mubr.f32.gmra.mrb[48].mxu0 %v13976_v26  ;;  %v14466_v26 = vld [vmem:[#allocation37_spill] sm:$0xff] }
 0x1bb   :  { %8614 = vmatprep.mubr.f32.mxu0 %v13975_v59  ;;  %v14464_v59 = vld [vmem:[#allocation31_spill] sm:$0xff] }
 0x1be   :  { %8615 = vmatmul.mubr.f32.gmra.mrb[50].mxu0 %v13974_v27  ;;  %v14463_v27 = vld [vmem:[#allocation30_spill] sm:$0xff] }
 0x1bf   :  { %8617 = vmatprep.mubr.f32.mxu0 %v13973_v11  ;;  %v14462_v11 = vld [vmem:[#allocation28_spill] sm:$0xff] }
 0x1c2   :  { %8618 = vmatmul.mubr.f32.gmra.mrb[52].mxu0 %v13972_v23  ;;  %v14460_v23 = vld [vmem:[#allocation25_spill] sm:$0xff] }
 0x1c3   :  { %8620 = vmatprep.mubr.f32.mxu0 %v13971_v37  ;;  %v14459_v37 = vld [vmem:[#allocation24_spill] sm:$0xff] }
 0x1c6   :  { %8621 = vmatmul.mubr.f32.gmra.mrb[54].mxu0 %v13970_v44  ;;  %v14457_v44 = vld [vmem:[#allocation19_spill] sm:$0xff] }
 0x1c7   :  { %8623 = vmatprep.mubr.f32.mxu0 %v13969_v52  ;;  %v14456_v52 = vld [vmem:[#allocation17_spill] sm:$0xff] }
 0x1ca   :  { %8624 = vmatmul.mubr.f32.gmra.mrb[56].mxu0 %v13967_v14  ;;  %v14454_v14 = vld [vmem:[#allocation14_spill] sm:$0xff] }
 0x1cb   :  { %8626 = vmatprep.mubr.f32.mxu0 %v13964_v38  ;;  %v14451_v38 = vld [vmem:[#allocation9_spill] sm:$0xff] }
 0x1ce   :  { %8627 = vmatmul.mubr.f32.gmra.mrb[58].mxu0 %v13962_v25  ;;  %v14449_v25 = vld [vmem:[#allocation8_spill] sm:$0xff] }
 0x1cf   :  { %8629 = vmatprep.mubr.f32.mxu0 %v13963_v50  ;;  %v14450_v50 = vld [vmem:[#allocation3_spill] sm:$0xff] }
 0x1d2   :  { %8630 = vmatmul.mubr.f32.gmra.mrb[60].mxu0 %v13965_v3  ;;  %v14452_v3 = vld [vmem:[#allocation11_spill] sm:$0xff] }
 0x1d3   :  { %8632 = vmatprep.mubr.f32.mxu0 %v13966_v0  ;;  %v14453_v0 = vld [vmem:[#allocation5_spill] sm:$0xff] }
 0x1d6   :  { %8633 = vmatmul.mubr.f32.gmra.mrb[62].mxu0 %v13968_v31  ;;  %v14455_v31 = vld [vmem:[#allocation16_spill] sm:$0xff] }
 0x1d7   :  { %8651 = vmatprep.mubr.f32.mxu0 %v14447_v55 }
 0x1da   :  { %8652 = vmatmul.mubr.f32.vlgmr.msra.gmra.mrb[0].mxu0 %v14448_v20 }
 0x1db   :  { %8654 = vmatprep.mubr.f32.mxu0 %v14449_v25  ;;  %9056 = vmatpush3.bf16.msra.mxu0 %v14410_v42  ;;  %v14458_v42 = vld [vmem:[#allocation22_spill] sm:$0xff] }
 0x1dc   :  { %9058 = vmatprep.subr.bf16.mxu0 %v14450_v50 }
 0x1de   :  { %8655 = vmatmul.mubr.f32.gmra.mrb[2].mxu0 %v14451_v38 }
 0x1df   :  { %8657 = vmatprep.mubr.f32.mxu0 %v14452_v3  ;;  %9060 = vmatpush3.bf16.msra.mxu0 %v14450_v50  ;;  %v14461_v50 = vld [vmem:[#allocation26_spill] sm:$0xff] }
 0x1e0   :  { %9062 = vmatprep.subr.bf16.mxu0 %v14453_v0 }
 0x1e2   :  { %8658 = vmatmul.mubr.f32.gmra.mrb[4].mxu0 %v14454_v14 }
 0x1e3   :  { %8660 = vmatprep.mubr.f32.mxu0 %v14455_v31  ;;  %9064 = vmatpush3.bf16.msra.mxu0 %v14453_v0  ;;  %v14465_v0 = vld [vmem:[#allocation36_spill] sm:$0xff] }
 0x1e4   :  { %9066 = vmatprep.subr.bf16.mxu0 %v14456_v52 }
 0x1e6   :  { %8661 = vmatmul.mubr.f32.gmra.mrb[6].mxu0 %v14457_v44 }
 0x1e7   :  { %8663 = vmatprep.mubr.f32.mxu0 %v14458_v42  ;;  %9068 = vmatpush3.bf16.msra.mxu0 %v14456_v52  ;;  %v14469_v52 = vld [vmem:[#allocation42_spill] sm:$0xff] }
 0x1ea   :  { %8664 = vmatmul.mubr.f32.gmra.mrb[8].mxu0 %v14459_v37 }
 0x1eb   :  { %8666 = vmatprep.mubr.f32.mxu0 %v14460_v23 }
 0x1ee   :  { %8667 = vmatmul.mubr.f32.gmra.mrb[10].mxu0 %v14461_v50 }
 0x1ef   :  { %8669 = vmatprep.mubr.f32.mxu0 %v14462_v11 }
 0x1f2   :  { %8670 = vmatmul.mubr.f32.gmra.mrb[12].mxu0 %v14463_v27 }
 0x1f3   :  { %8672 = vmatprep.mubr.f32.mxu0 %v14464_v59 }
 0x1f6   :  { %8673 = vmatmul.mubr.f32.gmra.mrb[14].mxu0 %v14465_v0 }
 0x1f7   :  { %8675 = vmatprep.mubr.f32.mxu0 %v14466_v26 }
 0x1fa   :  { %8676 = vmatmul.mubr.f32.gmra.mrb[16].mxu0 %v14467_v58 }
 0x1fb   :  { %8678 = vmatprep.mubr.f32.mxu0 %v14468_v56 }
 0x1fe   :  { %8679 = vmatmul.mubr.f32.gmra.mrb[18].mxu0 %v14469_v52 }
 0x1ff   :  { %8681 = vmatprep.mubr.f32.mxu0 %v14470_v36 }
 0x202   :  { %8682 = vmatmul.mubr.f32.gmra.mrb[20].mxu0 %v14471_v28 }
 0x203   :  { %8684 = vmatprep.mubr.f32.mxu0 %v14472_v10 }
 0x206   :  { %8685 = vmatmul.mubr.f32.gmra.mrb[22].mxu0 %v14473_v47  ;;  %v14483_v47 = vand.u32 4294901760, %v11180_v30 }
 0x207   :  { %8687 = vmatprep.mubr.f32.mxu0 %v14474_v40 }
 0x208   :  { %v707_v40 = vsub.f32 %v11180_v30, %v14483_v47 }
 0x20a   :  { %8688 = vmatmul.mubr.f32.gmra.mrb[24].mxu0 %v14475_v29  ;;  %v14484_v29 = vand.u32 4294901760, %v11185_v33  ;;  %v708_v10 = vand.u32 4294901760, %v707_v40 }
 0x20b   :  { %8690 = vmatprep.mubr.f32.mxu0 %v14476_v15 }
 0x20c   :  { %v717_v15 = vsub.f32 %v11185_v33, %v14484_v29  ;;  %8254 = vmatprep.mubr.f32.mxu1 %v708_v10  ;;  %v14489_v29 = vld [vmem:[#allocation76_spill] sm:$0xff]  ;;  %v14491_v10 = vand.u32 4294901760, %v11205_v6 }
 0x20e   :  { %8691 = vmatmul.mubr.f32.gmra.mrb[26].mxu0 %v14477_v39  ;;  %v14485_v39 = vld [vmem:[#allocation73_spill] sm:$0xff] }
 0x20f   :  { %8693 = vmatprep.mubr.f32.mxu0 %v14478_v62  ;;  %v718_v62 = vand.u32 4294901760, %v717_v15  ;;  %v14490_v15 = vand.u32 4294901760, %v11200_v4 }
 0x211   :  { %8255 = vmatmul.mubr.f32.vlgmr.msra.gmra.mrb[0].mxu1 %v718_v62  ;;  %v747_v40 = vsub.f32 %v11200_v4, %v14490_v15  ;;  %v14492_v62 = vld [vmem:[#allocation77_spill] sm:$0xff]  ;;  %v14496_v15 = vld [vmem:[#allocation79_spill] sm:$0xff] }
 0x212   :  { %8694 = vmatmul.mubr.f32.gmra.mrb[28].mxu0 %v14479_v9  ;;  %v14488_v9 = vld [vmem:[#allocation75_spill] sm:$0xff] }
 0x213   :  { %8696 = vmatprep.mubr.f32.mxu0 %v14480_v53  ;;  %v14486_v53 = vand.u32 4294901760, %v11190_v7 }
 0x216   :  { %8697 = vmatmul.mubr.f32.gmra.mrb[30].mxu0 %v14481_v18  ;;  %v727_v18 = vsub.f32 %v11190_v7, %v14486_v53  ;;  %v757_v7 = vsub.f32 %v11205_v6, %v14491_v10  ;;  %v748_v53 = vand.u32 4294901760, %v747_v40  ;;  %v14497_v40 = vld [vmem:[#allocation80_spill] sm:$0xff]  ;;  %v14498_v10 = vand.u32 4294901760, %v11220_v12 }
 0x217   :  { %8699 = vmatprep.mubr.f32.mxu0 %v14482_v8  ;;  %v14487_v8 = vand.u32 4294901760, %v11195_v13 }
 0x218   :  { %v728_v47 = vand.u32 4294901760, %v727_v18  ;;  %v14494_v18 = vand.u32 4294901760, %v11210_v32 }
 0x219   :  { %v737_v30 = vsub.f32 %v11195_v13, %v14487_v8  ;;  %v758_v13 = vand.u32 4294901760, %v757_v7  ;;  %v14493_v8 = vld [vmem:[#allocation78_spill] sm:$0xff]  ;;  %v787_v7 = vsub.f32 %v11220_v12, %v14498_v10  ;;  %v14504_v10 = vld [vmem:[#allocation83_spill] sm:$0xff] }
 0x21a   :  { %8700 = vmatmul.mubr.f32.gmra.mrb[32].mxu0 %v14485_v39  ;;  %8257 = vmatprep.mubr.f32.mxu1 %v728_v47  ;;  %v14495_v47 = vand.u32 4294901760, %v11215_v51 }
 0x21b   :  { %8702 = vmatprep.mubr.f32.mxu0 %v10843_v57  ;;  %v738_v33 = vand.u32 4294901760, %v737_v30  ;;  %v767_v30 = vsub.f32 %v11210_v32, %v14494_v18  ;;  %v14500_v18 = vld [vmem:[#allocation81_spill] sm:$0xff] }
 0x21c   :  { %v777_v4 = vsub.f32 %v11215_v51, %v14495_v47  ;;  %v14502_v47 = vand.u32 4294901760, %v11230_v48 }
 0x21d   :  { %8258 = vmatmul.mubr.f32.gmra.mrb[2].mxu1 %v738_v33  ;;  %v768_v33 = vand.u32 4294901760, %v767_v30  ;;  %v14501_v30 = vld [vmem:[#allocation82_spill] sm:$0xff] }
 0x21e   :  { %8703 = vmatmul.mubr.f32.gmra.mrb[34].mxu0 %v14488_v9  ;;  %8260 = vmatprep.mubr.f32.mxu1 %v748_v53  ;;  %v778_v6 = vand.u32 4294901760, %v777_v4  ;;  %v14499_v53 = vand.u32 4294901760, %v11225_v43  ;;  %v807_v4 = vsub.f32 %v11230_v48, %v14502_v47  ;;  %v14508_v47 = vld [vmem:[#allocation85_spill] sm:$0xff] }
 0x21f   :  { %8705 = vmatprep.mubr.f32.mxu0 %v14489_v29 }
 0x220   :  { %v797_v32 = vsub.f32 %v11225_v43, %v14499_v53  ;;  %v14506_v53 = vand.u32 4294901760, %v11240_v46 }
 0x221   :  { %8261 = vmatmul.mubr.f32.gmra.mrb[4].mxu1 %v758_v13  ;;  %v788_v13 = vand.u32 4294901760, %v787_v7  ;;  %v14505_v7 = vld [vmem:[#allocation84_spill] sm:$0xff] }
 0x222   :  { %8706 = vmatmul.mubr.f32.gmra.mrb[36].mxu0 %v14492_v62  ;;  %8263 = vmatprep.mubr.f32.mxu1 %v768_v33  ;;  %v798_v51 = vand.u32 4294901760, %v797_v32  ;;  %v14503_v33 = vand.u32 4294901760, %v11235_v2  ;;  %v827_v32 = vsub.f32 %v11240_v46, %v14506_v53  ;;  %v14512_v53 = vld [vmem:[#allocation87_spill] sm:$0xff] }
 0x223   :  { %8708 = vmatprep.mubr.f32.mxu0 %v14493_v8 }
 0x224   :  { %v817_v12 = vsub.f32 %v11235_v2, %v14503_v33  ;;  %v14510_v33 = vand.u32 4294901760, %v11250_v5 }
 0x225   :  { %8264 = vmatmul.mubr.f32.gmra.mrb[6].mxu1 %v778_v6  ;;  %v808_v6 = vand.u32 4294901760, %v807_v4  ;;  %v14509_v4 = vld [vmem:[#allocation86_spill] sm:$0xff] }
 0x226   :  { %8709 = vmatmul.mubr.f32.gmra.mrb[38].mxu0 %v14496_v15  ;;  %8266 = vmatprep.mubr.f32.mxu1 %v788_v13  ;;  %v818_v43 = vand.u32 4294901760, %v817_v12  ;;  %v14507_v13 = vand.u32 4294901760, %v11245_v61  ;;  %v847_v12 = vsub.f32 %v11250_v5, %v14510_v33  ;;  %v14516_v33 = vld [vmem:[#allocation89_spill] sm:$0xff] }
 0x227   :  { %8711 = vmatprep.mubr.f32.mxu0 %v14497_v40 }
 0x228   :  { %v837_v48 = vsub.f32 %v11245_v61, %v14507_v13  ;;  %v14514_v13 = vand.u32 4294901760, %v11260_v49 }
 0x229   :  { %8267 = vmatmul.mubr.f32.gmra.mrb[8].mxu1 %v798_v51  ;;  %v828_v51 = vand.u32 4294901760, %v827_v32  ;;  %v14513_v32 = vld [vmem:[#allocation88_spill] sm:$0xff] }
 0x22a   :  { %8712 = vmatmul.mubr.f32.gmra.mrb[40].mxu0 %v14500_v18  ;;  %8269 = vmatprep.mubr.f32.mxu1 %v808_v6  ;;  %v838_v2 = vand.u32 4294901760, %v837_v48  ;;  %v14511_v6 = vand.u32 4294901760, %v11255_v1  ;;  %v867_v48 = vsub.f32 %v11260_v49, %v14514_v13  ;;  %v14520_v13 = vld [vmem:[#allocation91_spill] sm:$0xff] }
 0x22b   :  { %8714 = vmatprep.mubr.f32.mxu0 %v14501_v30 }
 0x22c   :  { %v857_v46 = vsub.f32 %v11255_v1, %v14511_v6  ;;  %v14518_v6 = vand.u32 4294901760, %v11270_v17 }
 0x22d   :  { %8270 = vmatmul.mubr.f32.gmra.mrb[10].mxu1 %v818_v43  ;;  %v848_v43 = vand.u32 4294901760, %v847_v12  ;;  %v14517_v12 = vld [vmem:[#allocation90_spill] sm:$0xff] }
 0x22e   :  { %8715 = vmatmul.mubr.f32.gmra.mrb[42].mxu0 %v14504_v10  ;;  %8272 = vmatprep.mubr.f32.mxu1 %v828_v51  ;;  %v858_v61 = vand.u32 4294901760, %v857_v46  ;;  %v14515_v51 = vand.u32 4294901760, %v11265_v24  ;;  %v887_v46 = vsub.f32 %v11270_v17, %v14518_v6  ;;  %v14524_v6 = vld [vmem:[#allocation93_spill] sm:$0xff] }
 0x22f   :  { %8717 = vmatprep.mubr.f32.mxu0 %v14505_v7 }
 0x230   :  { %v877_v5 = vsub.f32 %v11265_v24, %v14515_v51  ;;  %v14522_v51 = vand.u32 4294901760, %v11280_v45 }
 0x231   :  { %8273 = vmatmul.mubr.f32.gmra.mrb[12].mxu1 %v838_v2  ;;  %v868_v2 = vand.u32 4294901760, %v867_v48  ;;  %v14521_v48 = vld [vmem:[#allocation92_spill] sm:$0xff] }
 0x232   :  { %8718 = vmatmul.mubr.f32.gmra.mrb[44].mxu0 %v14508_v47  ;;  %8275 = vmatprep.mubr.f32.mxu1 %v848_v43  ;;  %v878_v1 = vand.u32 4294901760, %v877_v5  ;;  %v14519_v43 = vand.u32 4294901760, %v11275_v22  ;;  %v907_v5 = vsub.f32 %v11280_v45, %v14522_v51  ;;  %v14528_v51 = vld [vmem:[#allocation97_spill] sm:$0xff] }
 0x233   :  { %8720 = vmatprep.mubr.f32.mxu0 %v14509_v4 }
 0x234   :  { %v897_v49 = vsub.f32 %v11275_v22, %v14519_v43  ;;  %v14526_v43 = vand.u32 4294901760, %v11290_v35 }
 0x235   :  { %8276 = vmatmul.mubr.f32.gmra.mrb[14].mxu1 %v858_v61  ;;  %v888_v61 = vand.u32 4294901760, %v887_v46  ;;  %v14525_v46 = vld [vmem:[#allocation94_spill] sm:$0xff] }
 0x236   :  { %8721 = vmatmul.mubr.f32.gmra.mrb[46].mxu0 %v14512_v53  ;;  %8278 = vmatprep.mubr.f32.mxu1 %v868_v2  ;;  %v898_v24 = vand.u32 4294901760, %v897_v49  ;;  %v14523_v2 = vand.u32 4294901760, %v11285_v54  ;;  %v927_v49 = vsub.f32 %v11290_v35, %v14526_v43  ;;  %v14532_v43 = vld [vmem:[#allocation101_spill] sm:$0xff] }
 0x237   :  { %8723 = vmatprep.mubr.f32.mxu0 %v14513_v32 }
 0x238   :  { %v917_v17 = vsub.f32 %v11285_v54, %v14523_v2  ;;  %v14530_v2 = vand.u32 4294901760, %v11300_v60 }
 0x239   :  { %8279 = vmatmul.mubr.f32.gmra.mrb[16].mxu1 %v878_v1  ;;  %v908_v1 = vand.u32 4294901760, %v907_v5  ;;  %v14529_v5 = vld [vmem:[#allocation98_spill] sm:$0xff] }
 0x23a   :  { %8724 = vmatmul.mubr.f32.gmra.mrb[48].mxu0 %v14516_v33  ;;  %8281 = vmatprep.mubr.f32.mxu1 %v888_v61  ;;  %v918_v22 = vand.u32 4294901760, %v917_v17  ;;  %v14527_v61 = vand.u32 4294901760, %v11295_v34  ;;  %v947_v17 = vsub.f32 %v11300_v60, %v14530_v2  ;;  %v14536_v2 = vld [vmem:[#allocation105_spill] sm:$0xff] }
 0x23b   :  { %8726 = vmatprep.mubr.f32.mxu0 %v14517_v12 }
 0x23c   :  { %v937_v45 = vsub.f32 %v11295_v34, %v14527_v61  ;;  %v14534_v61 = vand.u32 4294901760, %v11310_v16 }
 0x23d   :  { %8282 = vmatmul.mubr.f32.gmra.mrb[18].mxu1 %v898_v24  ;;  %v928_v24 = vand.u32 4294901760, %v927_v49  ;;  %v14533_v49 = vld [vmem:[#allocation102_spill] sm:$0xff] }
 0x23e   :  { %8727 = vmatmul.mubr.f32.gmra.mrb[50].mxu0 %v14520_v13  ;;  %8284 = vmatprep.mubr.f32.mxu1 %v908_v1  ;;  %v938_v54 = vand.u32 4294901760, %v937_v45  ;;  %v14531_v1 = vand.u32 4294901760, %v11305_v63  ;;  %v967_v45 = vsub.f32 %v11310_v16, %v14534_v61  ;;  %v14540_v61 = vld [vmem:[#allocation109_spill] sm:$0xff] }
 0x23f   :  { %8729 = vmatprep.mubr.f32.mxu0 %v14521_v48 }
 0x240   :  { %v957_v35 = vsub.f32 %v11305_v63, %v14531_v1  ;;  %v14538_v1 = vand.u32 4294901760, %v11320_v41 }
 0x241   :  { %8285 = vmatmul.mubr.f32.gmra.mrb[20].mxu1 %v918_v22  ;;  %v948_v22 = vand.u32 4294901760, %v947_v17  ;;  %v14537_v17 = vld [vmem:[#allocation106_spill] sm:$0xff] }
 0x242   :  { %8730 = vmatmul.mubr.f32.gmra.mrb[52].mxu0 %v14524_v6  ;;  %8287 = vmatprep.mubr.f32.mxu1 %v928_v24  ;;  %v958_v34 = vand.u32 4294901760, %v957_v35  ;;  %v14535_v24 = vand.u32 4294901760, %v11315_v21  ;;  %v987_v35 = vsub.f32 %v11320_v41, %v14538_v1  ;;  %v14543_v41 = vld [vmem:[#allocation48_spill] sm:$0xff] }
 0x243   :  { %8732 = vmatprep.mubr.f32.mxu0 %v14525_v46 }
 0x244   :  { %v977_v60 = vsub.f32 %v11315_v21, %v14535_v24  ;;  %v14542_v24 = vld [vmem:[#allocation112_spill] sm:$0xff] }
 0x245   :  { %8288 = vmatmul.mubr.f32.gmra.mrb[22].mxu1 %v938_v54  ;;  %v968_v54 = vand.u32 4294901760, %v967_v45  ;;  %v14541_v45 = vld [vmem:[#allocation110_spill] sm:$0xff] }
 0x246   :  { %8733 = vmatmul.mubr.f32.gmra.mrb[54].mxu0 %v14528_v51  ;;  %8290 = vmatprep.mubr.f32.mxu1 %v948_v22  ;;  %v978_v63 = vand.u32 4294901760, %v977_v60  ;;  %v14539_v22 = vand.u32 4294901760, %v11325_v19 }
 0x247   :  { %8735 = vmatprep.mubr.f32.mxu0 %v14529_v5 }
 0x248   :  { %v997_v16 = vsub.f32 %v11325_v19, %v14539_v22  ;;  %v14544_v19 = vld [vmem:[#allocation49_spill] sm:$0xff] }
 0x249   :  { %8291 = vmatmul.mubr.f32.gmra.mrb[24].mxu1 %v958_v34  ;;  %v988_v34 = vand.u32 4294901760, %v987_v35 }
 0x24a   :  { %8736 = vmatmul.mubr.f32.gmra.mrb[56].mxu0 %v14532_v43  ;;  %8293 = vmatprep.mubr.f32.mxu1 %v968_v54  ;;  %v998_v21 = vand.u32 4294901760, %v997_v16 }
 0x24b   :  { %8738 = vmatprep.mubr.f32.mxu0 %v14533_v49 }
 0x24d   :  { %8294 = vmatmul.mubr.f32.gmra.mrb[26].mxu1 %v978_v63 }
 0x24e   :  { %8739 = vmatmul.mubr.f32.gmra.mrb[58].mxu0 %v14536_v2  ;;  %8296 = vmatprep.mubr.f32.mxu1 %v988_v34 }
 0x24f   :  { %8741 = vmatprep.mubr.f32.mxu0 %v14537_v17 }
 0x251   :  { %8297 = vmatmul.mubr.f32.gmra.mrb[28].mxu1 %v998_v21 }
 0x252   :  { %8742 = vmatmul.mubr.f32.gmra.mrb[60].mxu0 %v14540_v61 }
 0x253   :  { %8744 = vmatprep.mubr.f32.mxu0 %v14541_v45 }
 0x256   :  { %8745 = vmatmul.mubr.f32.gmra.mrb[62].mxu0 %v14542_v24 }
 0x257   :  { %8763 = vmatprep.mubr.f32.mxu0 %v14447_v55 }
 0x25a   :  { %8764 = vmatmul.mubr.f32.vlgmr.msra.gmra.mrb[0].mxu0 %v14448_v20 }
 0x25b   :  { %8766 = vmatprep.mubr.f32.mxu0 %v14449_v25 }
 0x25e   :  { %8767 = vmatmul.mubr.f32.gmra.mrb[2].mxu0 %v14451_v38 }
 0x25f   :  { %8769 = vmatprep.mubr.f32.mxu0 %v14452_v3 }
 0x262   :  { %8770 = vmatmul.mubr.f32.gmra.mrb[4].mxu0 %v14454_v14 }
 0x263   :  { %8772 = vmatprep.mubr.f32.mxu0 %v14455_v31 }
 0x266   :  { %8773 = vmatmul.mubr.f32.gmra.mrb[6].mxu0 %v14457_v44 }
 0x267   :  { %8775 = vmatprep.mubr.f32.mxu0 %v14458_v42 }
 0x26a   :  { %8776 = vmatmul.mubr.f32.gmra.mrb[8].mxu0 %v14459_v37 }
 0x26b   :  { %8778 = vmatprep.mubr.f32.mxu0 %v14460_v23  ;;  %v14551_v23 = vld [vmem:[#allocation67_spill] sm:$0xff] }
 0x26e   :  { %8779 = vmatmul.mubr.f32.gmra.mrb[10].mxu0 %v14461_v50 }
 0x26f   :  { %8781 = vmatprep.mubr.f32.mxu0 %v14462_v11  ;;  %v14547_v11 = vld [vmem:[#allocation59_spill] sm:$0xff] }
 0x272   :  { %8782 = vmatmul.mubr.f32.gmra.mrb[12].mxu0 %v14463_v27  ;;  %v14545_v27 = vld [vmem:[#allocation54_spill] sm:$0xff] }
 0x273   :  { %8784 = vmatprep.mubr.f32.mxu0 %v14464_v59  ;;  %v14546_v59 = vld [vmem:[#allocation57_spill] sm:$0xff] }
 0x276   :  { %8785 = vmatmul.mubr.f32.gmra.mrb[14].mxu0 %v14465_v0 }
 0x277   :  { %8787 = vmatprep.mubr.f32.mxu0 %v14466_v26  ;;  %v14548_v26 = vld [vmem:[#allocation60_spill] sm:$0xff] }
 0x27a   :  { %8788 = vmatmul.mubr.f32.gmra.mrb[16].mxu0 %v14467_v58  ;;  %v14549_v58 = vld [vmem:[#allocation62_spill] sm:$0xff] }
 0x27b   :  { %8790 = vmatprep.mubr.f32.mxu0 %v14468_v56  ;;  %v14550_v56 = vld [vmem:[#allocation66_spill] sm:$0xff] }
 0x27e   :  { %8791 = vmatmul.mubr.f32.gmra.mrb[18].mxu0 %v14469_v52 }
 0x27f   :  { %8793 = vmatprep.mubr.f32.mxu0 %v14470_v36  ;;  %v14552_v36 = vld [vmem:[#allocation71_spill] sm:$0xff] }
 0x282   :  { %8794 = vmatmul.mubr.f32.gmra.mrb[20].mxu0 %v14471_v28  ;;  %v14553_v28 = vld [vmem:[#allocation72_spill] sm:$0xff] }
 0x283   :  { %8796 = vmatprep.mubr.f32.mxu0 %v14543_v41 }
 0x286   :  { %8797 = vmatmul.mubr.f32.gmra.mrb[22].mxu0 %v14544_v19 }
 0x287   :  { %8799 = vmatprep.mubr.f32.mxu0 %v14545_v27 }
 0x28a   :  { %8800 = vmatmul.mubr.f32.gmra.mrb[24].mxu0 %v14546_v59 }
 0x28b   :  { %8802 = vmatprep.mubr.f32.mxu0 %v14547_v11 }
 0x28e   :  { %8803 = vmatmul.mubr.f32.gmra.mrb[26].mxu0 %v14548_v26 }
 0x28f   :  { %8805 = vmatprep.mubr.f32.mxu0 %v14549_v58 }
 0x292   :  { %8806 = vmatmul.mubr.f32.gmra.mrb[28].mxu0 %v14550_v56 }
 0x293   :  { %8808 = vmatprep.mubr.f32.mxu0 %v14551_v23 }
 0x296   :  { %8809 = vmatmul.mubr.f32.gmra.mrb[30].mxu0 %v14552_v36 }
 0x297   :  { %8811 = vmatprep.mubr.f32.mxu0 %v14553_v28 }
 0x29a   :  { %8812 = vmatmul.mubr.f32.gmra.mrb[32].mxu0 %v14485_v39 }
 0x29b   :  { %8814 = vmatprep.mubr.f32.mxu0 %v10843_v57  ;;  %v18_v57 = vld [vmem:[%s13722_s3 + $0x8] sm:$0xff] }
 0x29e   :  { %8815 = vmatmul.mubr.f32.gmra.mrb[34].mxu0 %v14488_v9  ;;  %v11729_v9 = vand.u32 4294901760, %v18_v57 }
 0x29f   :  { %8817 = vmatprep.mubr.f32.mxu0 %v14489_v29 }
 0x2a0   :  { %14554 = vst [vmem:[#allocation23_spill] sm:$0xff] %v11729_v9  ;;  %v11732_v39 = vsub.f32 %v18_v57, %v11729_v9 }
 0x2a2   :  { %8818 = vmatmul.mubr.f32.gmra.mrb[36].mxu0 %v14492_v62  ;;  %14555 = vst [vmem:[#allocation38_spill] sm:$0xff] %v11732_v39  ;;  %v13994_v14 = vand.u32 4294901760, %v11732_v39 }
 0x2a3   :  { %8820 = vmatprep.mubr.f32.mxu0 %v14493_v8 }
 0x2a4   :  { %v3700_v38 = vsub.f32 %v11732_v39, %v13994_v14 }
 0x2a6   :  { %8821 = vmatmul.mubr.f32.gmra.mrb[38].mxu0 %v14496_v15  ;;  %v3701_v31 = vand.u32 4294901760, %v3700_v38 }
 0x2a7   :  { %8823 = vmatprep.mubr.f32.mxu0 %v14497_v40 }
 0x2a8   :  { %3702 = vmatprep.mubr.f32.mxu1 %v3701_v31 }
 0x2aa   :  { %8824 = vmatmul.mubr.f32.gmra.mrb[40].mxu0 %v14500_v18 }
 0x2ab   :  { %8826 = vmatprep.mubr.f32.mxu0 %v14501_v30 }
 0x2ae   :  { %8827 = vmatmul.mubr.f32.gmra.mrb[42].mxu0 %v14504_v10 }
 0x2af   :  { %8829 = vmatprep.mubr.f32.mxu0 %v14505_v7 }
 0x2b2   :  { %8830 = vmatmul.mubr.f32.gmra.mrb[44].mxu0 %v14508_v47 }
 0x2b3   :  { %8832 = vmatprep.mubr.f32.mxu0 %v14509_v4  ;;  %v94_v4 = vlaneseq }
 0x2b6   :  { %8833 = vmatmul.mubr.f32.gmra.mrb[46].mxu0 %v14512_v53  ;;  %v17_v53 = vld [vmem:[%s13722_s3] sm:$0xff] }
 0x2b7   :  { %8835 = vmatprep.mubr.f32.mxu0 %v14513_v32 }
 0x2ba   :  { %8836 = vmatmul.mubr.f32.gmra.mrb[48].mxu0 %v14516_v33  ;;  %v11749_v33 = vand.u32 4294901760, %v17_v53 }
 0x2bb   :  { %8838 = vmatprep.mubr.f32.mxu0 %v14517_v12 }
 0x2bc   :  { %14556 = vst [vmem:[#allocation43_spill] sm:$0xff] %v11749_v33 }
 0x2be   :  { %8839 = vmatmul.mubr.f32.gmra.mrb[50].mxu0 %v14520_v13  ;;  %v11753_v13 = vshrl.u32 %v94_v4, 7 }
 0x2bf   :  { %8841 = vmatprep.mubr.f32.mxu0 %v14521_v48 }
 0x2c0   :  { %14557 = vst [vmem:[#allocation45_spill] sm:$0xff] %v11753_v13 }
 0x2c2   :  { %8842 = vmatmul.mubr.f32.gmra.mrb[52].mxu0 %v14524_v6  ;;  %v11758_v6 = vsub.f32 %v17_v53, %v11749_v33 }
 0x2c3   :  { %8844 = vmatprep.mubr.f32.mxu0 %v14525_v46 }
 0x2c4   :  { %14558 = vst [vmem:[#allocation46_spill] sm:$0xff] %v11758_v6 }
 0x2c6   :  { %8845 = vmatmul.mubr.f32.gmra.mrb[54].mxu0 %v14528_v51  ;;  %v96_v51 = vsub.s32 2, %v11753_v13 }
 0x2c7   :  { %8847 = vmatprep.mubr.f32.mxu0 %v14529_v5 }
 0x2c8   :  { %v11768_v60 = vrot.slane %v17_v53, %v96_v51 }
 0x2ca   :  { %8848 = vmatmul.mubr.f32.gmra.mrb[56].mxu0 %v14532_v43  ;;  %v13992_v43 = vand.u32 4294901760, %v11758_v6 }
 0x2cb   :  { %8850 = vmatprep.mubr.f32.mxu0 %v14533_v49 }
 0x2ce   :  { %8851 = vmatmul.mubr.f32.gmra.mrb[58].mxu0 %v14536_v2  ;;  %v11775_v2 = vsub.f32 %v11758_v6, %v13992_v43 }
 0x2cf   :  { %8853 = vmatprep.mubr.f32.mxu0 %v14537_v17 }
 0x2d2   :  { %8854 = vmatmul.mubr.f32.gmra.mrb[60].mxu0 %v14540_v61 }
 0x2d3   :  { %8856 = vmatprep.mubr.f32.mxu0 %v14541_v45 }
 0x2d6   :  { %8857 = vmatmul.mubr.f32.gmra.mrb[62].mxu0 %v14542_v24 }
 0x2e4   :  { %v8256_v37 = vpop.f32.mrb[0].mxu1 }
 0x2e5   :  { %v710_v44 = vpop.f32.mrb[1].mxu1  ;;  %v11781_v22 = vadd.f32 %v8256_v37, %v11768_v60 }
 0x2e6   :  { %v11785_v34 = vadd.f32 %v710_v44, %v11768_v60 }
 0x2f0   :  { %v8259_v25 = vpop.f32.mrb[2].mxu1 }
 0x2f1   :  { %v730_v3 = vpop.f32.mrb[3].mxu1  ;;  %v11788_v61 = vadd.f32 %v8259_v25, %v11768_v60 }
 0x2f2   :  { %v11791_v21 = vadd.f32 %v730_v3, %v11768_v60 }
 0x2f4   :  { %v8262_v55 = vpop.f32.mrb[4].mxu1 }
 0x2f5   :  { %v750_v20 = vpop.f32.mrb[5].mxu1  ;;  %v11796_v41 = vadd.f32 %v8262_v55, %v11768_v60 }
 0x2f6   :  { %v11799_v19 = vadd.f32 %v750_v20, %v11768_v60 }
 0x2f8   :  { %v8265_v42 = vpop.f32.mrb[6].mxu1 }
 0x2f9   :  { %v770_v50 = vpop.f32.mrb[7].mxu1  ;;  %v11805_v58 = vadd.f32 %v8265_v42, %v11768_v60 }
 0x2fa   :  { %v11808_v56 = vadd.f32 %v770_v50, %v11768_v60 }
 0x2fc   :  { %v8268_v0 = vpop.f32.mrb[8].mxu1 }
 0x2fd   :  { %v790_v52 = vpop.f32.mrb[9].mxu1  ;;  %v11811_v23 = vadd.f32 %v8268_v0, %v11768_v60 }
 0x2fe   :  { %v11815_v37 = vadd.f32 %v790_v52, %v11768_v60 }
 0x300   :  { %v8271_v29 = vpop.f32.mrb[10].mxu1 }
 0x301   :  { %v810_v62 = vpop.f32.mrb[11].mxu1  ;;  %v11818_v44 = vadd.f32 %v8271_v29, %v11768_v60 }
 0x302   :  { %v11822_v3 = vadd.f32 %v810_v62, %v11768_v60 }
 0x304   :  { %v8274_v8 = vpop.f32.mrb[12].mxu1  ;;  %14559 = vst [vmem:[#allocation52_spill] sm:$0xff] %v11822_v3 }
 0x305   :  { %v830_v15 = vpop.f32.mrb[13].mxu1  ;;  %v11825_v31 = vadd.f32 %v8274_v8, %v11768_v60 }
 0x306   :  { %v11830_v42 = vadd.f32 %v830_v15, %v11768_v60 }
 0x307   :  { %14560 = vst [vmem:[#allocation53_spill] sm:$0xff] %v11825_v31 }
 0x308   :  { %v8277_v40 = vpop.f32.mrb[14].mxu1  ;;  %14562 = vst [vmem:[#allocation58_spill] sm:$0xff] %v11830_v42 }
 0x309   :  { %v850_v18 = vpop.f32.mrb[15].mxu1  ;;  %v11833_v50 = vadd.f32 %v8277_v40, %v11768_v60 }
 0x30a   :  { %v11840_v62 = vadd.f32 %v850_v18, %v11768_v60 }
 0x30b   :  { %14563 = vst [vmem:[#allocation65_spill] sm:$0xff] %v11833_v50 }
 0x30c   :  { %v8280_v30 = vpop.f32.mrb[16].mxu1  ;;  %14566 = vst [vmem:[#allocation99_spill] sm:$0xff] %v11840_v62 }
 0x30d   :  { %v11738_v10 = vpop.f32.mrb[17].mxu1  ;;  %v11845_v15 = vadd.f32 %v8280_v30, %v11768_v60 }
 0x30f   :  { %14567 = vst [vmem:[#allocation100_spill] sm:$0xff] %v11845_v15 }
 0x310   :  { %v11740_v7 = vpop.f32.mrb[18].mxu1 }
 0x311   :  { %v11742_v47 = vpop.f32.mrb[19].mxu1 }
 0x314   :  { %v11747_v32 = vpop.f32.mrb[20].mxu1 }
 0x315   :  { %v11751_v12 = vpop.f32.mrb[21].mxu1 }
 0x318   :  { %v11755_v48 = vpop.f32.mrb[22].mxu1 }
 0x319   :  { %v11760_v46 = vpop.f32.mrb[23].mxu1 }
 0x31c   :  { %v11763_v5 = vpop.f32.mrb[24].mxu1 }
 0x31d   :  { %v11766_v49 = vpop.f32.mrb[25].mxu1 }
 0x320   :  { %v11770_v54 = vpop.f32.mrb[26].mxu1 }
 0x321   :  { %v11777_v63 = vpop.f32.mrb[27].mxu1 }
 0x324   :  { %v11793_v45 = vpop.f32.mrb[28].mxu1 }
 0x325   :  { %v11802_v59 = vpop.f32.mrb[29].mxu1 }
 0x32d   :  { %v8765_v17 = vpop.f32.mrb[0].mxu0 }
 0x32e   :  { %v9725_v1 = vadd.f32 %v8765_v17, %v11768_v60  ;;  %v3155_v35 = vpop.f32.mrb[1].mxu0 }
 0x32f   :  { %v9726_v16 = vadd.f32 %v3155_v35, %v11768_v60 }
 0x330   :  { %v3538_v24 = vmax.f32 %v9725_v1, 0.0 }
 0x331   :  { %v3537_v11 = vmax.f32 %v9726_v16, 0.0  ;;  %v8768_v26 = vpop.f32.mrb[2].mxu0 }
 0x332   :  { %v3605_v36 = vand.u32 4294901760, %v3538_v24  ;;  %v9727_v28 = vadd.f32 %v8768_v26, %v11768_v60  ;;  %v3167_v57 = vpop.f32.mrb[3].mxu0  ;;  %v11858_v26 = vadd.f32 %v11738_v10, %v11768_v60 }
 0x333   :  { %v3602_v38 = vand.u32 4294901760, %v3537_v11  ;;  %v9728_v25 = vadd.f32 %v3167_v57, %v11768_v60 }
 0x334   :  { %v11827_v55 = vsub.f32 %v3538_v24, %v3605_v36  ;;  %v3540_v20 = vmax.f32 %v9727_v28, 0.0  ;;  %14569 = vst [vmem:[#allocation104_spill] sm:$0xff] %v11858_v26 }
 0x335   :  { %v11835_v0 = vpack.c.bf16 %v3605_v36, %v3602_v38  ;;  %v11837_v52 = vsub.f32 %v3537_v11, %v3602_v38  ;;  %v3539_v29 = vmax.f32 %v9728_v25, 0.0  ;;  %v8771_v4 = vpop.f32.mrb[4].mxu0 }
 0x336   :  { %14561 = vst [vmem:[#allocation55_spill] sm:$0xff] %v11827_v55  ;;  %v13993_v8 = vand.u32 4294901760, %v11827_v55  ;;  %v3611_v53 = vand.u32 4294901760, %v3540_v20  ;;  %v9729_v51 = vadd.f32 %v8771_v4, %v11768_v60  ;;  %v3179_v17 = vpop.f32.mrb[5].mxu0 }
 0x337   :  { %14564 = vst [vmem:[#allocation95_spill] sm:$0xff] %v11835_v0  ;;  %14565 = vst [vmem:[#allocation96_spill] sm:$0xff] %v11837_v52  ;;  %v13995_v40 = vand.u32 4294901760, %v11837_v52  ;;  %v3608_v1 = vand.u32 4294901760, %v3539_v29  ;;  %v9730_v35 = vadd.f32 %v3179_v17, %v11768_v60 }
 0x338   :  { %v3724_v18 = vsub.f32 %v11827_v55, %v13993_v8  ;;  %v11854_v24 = vsub.f32 %v3540_v20, %v3611_v53  ;;  %v3542_v11 = vmax.f32 %v9729_v51, 0.0 }
 0x339   :  { %v3717_v30 = vsub.f32 %v11837_v52, %v13995_v40  ;;  %v11863_v36 = vpack.c.bf16 %v3611_v53, %v3608_v1  ;;  %v11865_v28 = vsub.f32 %v3539_v29, %v3608_v1  ;;  %v3541_v57 = vmax.f32 %v9730_v35, 0.0  ;;  %v8774_v38 = vpop.f32.mrb[6].mxu0 }
 0x33a   :  { %14568 = vst [vmem:[#allocation103_spill] sm:$0xff] %v11854_v24  ;;  %v3725_v25 = vand.u32 4294901760, %v3724_v18  ;;  %v13996_v4 = vand.u32 4294901760, %v11854_v24  ;;  %v3617_v20 = vand.u32 4294901760, %v3542_v11  ;;  %v9731_v51 = vadd.f32 %v8774_v38, %v11768_v60  ;;  %v3191_v17 = vpop.f32.mrb[7].mxu0 }
 0x33b   :  { %14570 = vst [vmem:[#allocation107_spill] sm:$0xff] %v11863_v36  ;;  %14571 = vst [vmem:[#allocation108_spill] sm:$0xff] %v11865_v28  ;;  %v3718_v43 = vand.u32 4294901760, %v3717_v30  ;;  %v14003_v10 = vand.u32 4294901760, %v11865_v28  ;;  %v3614_v8 = vand.u32 4294901760, %v3541_v57  ;;  %v9732_v14 = vadd.f32 %v3191_v17, %v11768_v60 }
 0x33c   :  { %v3738_v29 = vsub.f32 %v11854_v24, %v13996_v4  ;;  %v11874_v53 = vsub.f32 %v3542_v11, %v3617_v20  ;;  %v3544_v1 = vmax.f32 %v9731_v51, 0.0 }
 0x33d   :  { %v3731_v18 = vsub.f32 %v11865_v28, %v14003_v10  ;;  %v11881_v30 = vpack.c.bf16 %v3617_v20, %v3614_v8  ;;  %v11883_v38 = vsub.f32 %v3541_v57, %v3614_v8  ;;  %v3543_v40 = vmax.f32 %v9732_v14, 0.0  ;;  %v8777_v17 = vpop.f32.mrb[8].mxu0 }
 0x33e   :  { %14572 = vst [vmem:[#allocation111_spill] sm:$0xff] %v11874_v53  ;;  %v3739_v16 = vand.u32 4294901760, %v3738_v29  ;;  %v14010_v27 = vand.u32 4294901760, %v11874_v53  ;;  %v3623_v4 = vand.u32 4294901760, %v3544_v1  ;;  %v9733_v11 = vadd.f32 %v8777_v17, %v11768_v60  ;;  %v3203_v51 = vpop.f32.mrb[9].mxu0 }
 0x33f   :  { %14573 = vst [vmem:[#allocation7_spill] sm:$0xff] %v11881_v30  ;;  %14574 = vst [vmem:[#allocation50_spill] sm:$0xff] %v11883_v38  ;;  %v3732_v13 = vand.u32 4294901760, %v3731_v18  ;;  %v14013_v35 = vand.u32 4294901760, %v11883_v38  ;;  %v3620_v6 = vand.u32 4294901760, %v3543_v40  ;;  %v9734_v24 = vadd.f32 %v3203_v51, %v11768_v60 }
 0x340   :  { %v3752_v8 = vsub.f32 %v11874_v53, %v14010_v27  ;;  %v11892_v57 = vsub.f32 %v3544_v1, %v3623_v4  ;;  %v3546_v14 = vmax.f32 %v9733_v11, 0.0  ;;  %v11894_v20 = vpack.c.bf16 %v3725_v25, %v3718_v43 }
 0x341   :  { %v3745_v29 = vsub.f32 %v11883_v38, %v14013_v35  ;;  %v11899_v17 = vpack.c.bf16 %v3623_v4, %v3620_v6  ;;  %v11901_v18 = vsub.f32 %v3543_v40, %v3620_v6  ;;  %v3545_v10 = vmax.f32 %v9734_v24, 0.0  ;;  %v8780_v28 = vpop.f32.mrb[10].mxu0 }
 0x342   :  { %14575 = vst [vmem:[#allocation51_spill] sm:$0xff] %v11892_v57  ;;  %v3753_v51 = vand.u32 4294901760, %v3752_v8  ;;  %v14016_v39 = vand.u32 4294901760, %v11892_v57  ;;  %v3629_v52 = vand.u32 4294901760, %v3546_v14  ;;  %v9735_v1 = vadd.f32 %v8780_v28, %v11768_v60  ;;  %v3215_v27 = vpop.f32.mrb[11].mxu0 }
 0x343   :  { %14576 = vst [vmem:[#allocation10_spill] sm:$0xff] %v11899_v17  ;;  %14577 = vst [vmem:[#allocation12_spill] sm:$0xff] %v11901_v18  ;;  %v3746_v11 = vand.u32 4294901760, %v3745_v29  ;;  %v14019_v43 = vand.u32 4294901760, %v11901_v18  ;;  %v3626_v25 = vand.u32 4294901760, %v3545_v10  ;;  %v9736_v55 = vadd.f32 %v3215_v27, %v11768_v60 }
 0x344   :  { %v3766_v6 = vsub.f32 %v11892_v57, %v14016_v39  ;;  %v11910_v40 = vsub.f32 %v3546_v14, %v3629_v52  ;;  %v3548_v24 = vmax.f32 %v9735_v1, 0.0  ;;  %v11912_v4 = vpack.c.bf16 %v3739_v16, %v3732_v13 }
 0x345   :  { %v3759_v28 = vsub.f32 %v11901_v18, %v14019_v43  ;;  %v11917_v8 = vpack.c.bf16 %v3629_v52, %v3626_v25  ;;  %v11919_v29 = vsub.f32 %v3545_v10, %v3626_v25  ;;  %v3547_v35 = vmax.f32 %v9736_v55, 0.0  ;;  %v8783_v33 = vpop.f32.mrb[12].mxu0 }
 0x346   :  { %14578 = vst [vmem:[#allocation63_spill] sm:$0xff] %v11910_v40  ;;  %v3767_v27 = vand.u32 4294901760, %v3766_v6  ;;  %v14022_v26 = vand.u32 4294901760, %v11910_v40  ;;  %v3635_v15 = vand.u32 4294901760, %v3548_v24  ;;  %v9737_v14 = vadd.f32 %v8783_v33, %v11768_v60  ;;  %v3227_v39 = vpop.f32.mrb[13].mxu0 }
 0x347   :  { %14579 = vst [vmem:[#allocation64_spill] sm:$0xff] %v11917_v8  ;;  %14580 = vst [vmem:[#allocation13_spill] sm:$0xff] %v11919_v29  ;;  %v3760_v1 = vand.u32 4294901760, %v3759_v28  ;;  %v14025_v13 = vand.u32 4294901760, %v11919_v29  ;;  %v3632_v16 = vand.u32 4294901760, %v3547_v35  ;;  %v9738_v57 = vadd.f32 %v3227_v39, %v11768_v60 }
 0x348   :  { %v3780_v52 = vsub.f32 %v11910_v40, %v14022_v26  ;;  %v11928_v10 = vsub.f32 %v3548_v24, %v3635_v15  ;;  %v3550_v55 = vmax.f32 %v9737_v14, 0.0  ;;  %v11930_v25 = vpack.c.bf16 %v3753_v51, %v3746_v11 }
 0x349   :  { %v3773_v33 = vsub.f32 %v11919_v29, %v14025_v13  ;;  %v11935_v6 = vpack.c.bf16 %v3635_v15, %v3632_v16  ;;  %v11937_v28 = vsub.f32 %v3547_v35, %v3632_v16  ;;  %v3549_v43 = vmax.f32 %v9738_v57, 0.0  ;;  %v8786_v18 = vpop.f32.mrb[14].mxu0 }
 0x34a   :  { %14581 = vst [vmem:[#allocation15_spill] sm:$0xff] %v11928_v10  ;;  %v3781_v39 = vand.u32 4294901760, %v3780_v52  ;;  %v14032_v62 = vand.u32 4294901760, %v11928_v10  ;;  %v3641_v50 = vand.u32 4294901760, %v3550_v55  ;;  %v9739_v24 = vadd.f32 %v8786_v18, %v11768_v60  ;;  %v3239_v26 = vpop.f32.mrb[15].mxu0 }
 0x34b   :  { %14582 = vst [vmem:[#allocation68_spill] sm:$0xff] %v11935_v6  ;;  %14583 = vst [vmem:[#allocation69_spill] sm:$0xff] %v11937_v28  ;;  %v3774_v14 = vand.u32 4294901760, %v3773_v33  ;;  %v14035_v51 = vand.u32 4294901760, %v11937_v28  ;;  %v3638_v11 = vand.u32 4294901760, %v3549_v43  ;;  %v9740_v40 = vadd.f32 %v3239_v26, %v11768_v60 }
 0x34c   :  { %v3794_v15 = vsub.f32 %v11928_v10, %v14032_v62  ;;  %v11946_v35 = vsub.f32 %v3550_v55, %v3641_v50  ;;  %v3552_v57 = vmax.f32 %v9739_v24, 0.0  ;;  %v11948_v16 = vpack.c.bf16 %v3767_v27, %v3760_v1 }
 0x34d   :  { %v3787_v18 = vsub.f32 %v11937_v28, %v14035_v51  ;;  %v11953_v52 = vpack.c.bf16 %v3641_v50, %v3638_v11  ;;  %v11955_v33 = vsub.f32 %v3549_v43, %v3638_v11  ;;  %v3551_v13 = vmax.f32 %v9740_v40, 0.0  ;;  %v8789_v29 = vpop.f32.mrb[16].mxu0 }
 0x34e   :  { %14584 = vst [vmem:[#allocation18_spill] sm:$0xff] %v11946_v35  ;;  %v3795_v26 = vand.u32 4294901760, %v3794_v15  ;;  %v14038_v53 = vand.u32 4294901760, %v11946_v35  ;;  %v3647_v38 = vand.u32 4294901760, %v3552_v57  ;;  %v9741_v55 = vadd.f32 %v8789_v29, %v11768_v60  ;;  %v3251_v62 = vpop.f32.mrb[17].mxu0 }
 0x34f   :  { %14585 = vst [vmem:[#allocation20_spill] sm:$0xff] %v11953_v52  ;;  %14586 = vst [vmem:[#allocation21_spill] sm:$0xff] %v11955_v33  ;;  %v3788_v24 = vand.u32 4294901760, %v3787_v18  ;;  %v14041_v27 = vand.u32 4294901760, %v11955_v33  ;;  %v3644_v1 = vand.u32 4294901760, %v3551_v13  ;;  %v9742_v10 = vadd.f32 %v3251_v62, %v11768_v60 }
 0x350   :  { %v3808_v50 = vsub.f32 %v11946_v35, %v14038_v53  ;;  %v11964_v43 = vsub.f32 %v3552_v57, %v3647_v38  ;;  %v3554_v40 = vmax.f32 %v9741_v55, 0.0  ;;  %v11966_v11 = vpack.c.bf16 %v3781_v39, %v3774_v14 }
 0x351   :  { %v3801_v29 = vsub.f32 %v11955_v33, %v14041_v27  ;;  %v11971_v15 = vpack.c.bf16 %v3647_v38, %v3644_v1  ;;  %v11973_v18 = vsub.f32 %v3551_v13, %v3644_v1  ;;  %v3553_v51 = vmax.f32 %v9742_v10, 0.0  ;;  %v8792_v28 = vpop.f32.mrb[18].mxu0 }
 0x352   :  { %14587 = vst [vmem:[#allocation2_spill] sm:$0xff] %v11964_v43  ;;  %14588 = vst [vmem:[#allocation27_spill] sm:$0xff] %v11966_v11  ;;  %v3809_v62 = vand.u32 4294901760, %v3808_v50  ;;  %v14044_v42 = vand.u32 4294901760, %v11964_v43  ;;  %v3653_v31 = vand.u32 4294901760, %v3554_v40  ;;  %v9743_v57 = vadd.f32 %v8792_v28, %v11768_v60  ;;  %v3263_v53 = vpop.f32.mrb[19].mxu0 }
 0x353   :  { %14589 = vst [vmem:[#allocation29_spill] sm:$0xff] %v11971_v15  ;;  %14590 = vst [vmem:[#allocation32_spill] sm:$0xff] %v11973_v18  ;;  %v3802_v55 = vand.u32 4294901760, %v3801_v29  ;;  %v14047_v39 = vand.u32 4294901760, %v11973_v18  ;;  %v3650_v14 = vand.u32 4294901760, %v3553_v51  ;;  %v9744_v35 = vadd.f32 %v3263_v53, %v11768_v60 }
 0x354   :  { %v3822_v38 = vsub.f32 %v11964_v43, %v14044_v42  ;;  %v11982_v13 = vsub.f32 %v3554_v40, %v3653_v31  ;;  %v3556_v10 = vmax.f32 %v9743_v57, 0.0  ;;  %v11984_v1 = vpack.c.bf16 %v3795_v26, %v3788_v24 }
 0x355   :  { %v3815_v28 = vsub.f32 %v11973_v18, %v14047_v39  ;;  %v11989_v50 = vsub.f32 %v3553_v51, %v3650_v14  ;;  %v3555_v29 = vmax.f32 %v9744_v35, 0.0  ;;  %v8795_v27 = vpop.f32.mrb[20].mxu0  ;;  %v11991_v33 = vpack.c.bf16 %v3653_v31, %v3650_v14 }
 0x356   :  { %14591 = vst [vmem:[#allocation33_spill] sm:$0xff] %v11982_v13  ;;  %14592 = vst [vmem:[#allocation34_spill] sm:$0xff] %v11984_v1  ;;  %v3823_v53 = vand.u32 4294901760, %v3822_v38  ;;  %v14054_v11 = vand.u32 4294901760, %v11982_v13  ;;  %v3659_v3 = vand.u32 4294901760, %v3556_v10  ;;  %v9745_v40 = vadd.f32 %v8795_v27, %v11768_v60  ;;  %v3275_v42 = vpop.f32.mrb[21].mxu0 }
 0x357   :  { %14593 = vst [vmem:[#allocation35_spill] sm:$0xff] %v11989_v50  ;;  %14594 = vst [vmem:[#allocation39_spill] sm:$0xff] %v11991_v33  ;;  %v3816_v57 = vand.u32 4294901760, %v3815_v28  ;;  %v14055_v26 = vand.u32 4294901760, %v11989_v50  ;;  %v3656_v24 = vand.u32 4294901760, %v3555_v29  ;;  %v9746_v43 = vadd.f32 %v3275_v42, %v11768_v60  ;;  %9070 = vmatprep.subr.bf16.mxu1 %v11991_v33 }
 0x358   :  { %v11998_v51 = vsub.f32 %v3556_v10, %v3659_v3  ;;  %v3558_v35 = vmax.f32 %v9745_v40, 0.0  ;;  %9072 = vmatpush3.bf16.msra.mxu1 %v11835_v0  ;;  %v3836_v31 = vsub.f32 %v11982_v13, %v14054_v11  ;;  %v12004_v14 = vpack.c.bf16 %v3809_v62, %v3802_v55 }
 0x359   :  { %v12006_v27 = vsub.f32 %v3555_v29, %v3656_v24  ;;  %v3557_v38 = vmax.f32 %v9746_v43, 0.0  ;;  %v8798_v28 = vpop.f32.mrb[22].mxu0  ;;  %v12008_v39 = vpack.c.bf16 %v3659_v3, %v3656_v24  ;;  %v3829_v42 = vsub.f32 %v11989_v50, %v14055_v26 }
 0x35a   :  { %14595 = vst [vmem:[#allocation56_spill] sm:$0xff] %v11998_v51  ;;  %14596 = vst [vmem:[#allocation61_spill] sm:$0xff] %v12004_v14  ;;  %v14060_v10 = vand.u32 4294901760, %v11998_v51  ;;  %v3665_v40 = vand.u32 4294901760, %v3558_v35  ;;  %v9747_v0 = vadd.f32 %v8798_v28, %v11768_v60  ;;  %v3287_v33 = vpop.f32.mrb[23].mxu0  ;;  %v3837_v18 = vand.u32 4294901760, %v3836_v31 }
 0x35b   :  { %14597 = vst [vmem:[#allocation70_spill] sm:$0xff] %v12006_v27  ;;  %14598 = vst [vmem:[#allocation74_spill] sm:$0xff] %v12008_v39  ;;  %v3662_v55 = vand.u32 4294901760, %v3557_v38  ;;  %v9748_v29 = vadd.f32 %v3287_v33, %v11768_v60  ;;  %9074 = vmatprep.subr.bf16.mxu1 %v12008_v39  ;;  %v3830_v3 = vand.u32 4294901760, %v3829_v42  ;;  %v12024_v28 = vpack.c.bf16 %v3823_v53, %v3816_v57 }
 0x35c   :  { %v12018_v43 = vsub.f32 %v3558_v35, %v3665_v40  ;;  %v3560_v24 = vmax.f32 %v9747_v0, 0.0  ;;  %9076 = vmatpush3.bf16.msra.mxu1 %v11863_v36  ;;  %v3850_v11 = vsub.f32 %v11998_v51, %v14060_v10  ;;  %v14602_v39 = vand.u32 4294901760, %v12006_v27 }
 0x35d   :  { %14600 = vst [vmem:[#allocation6_spill] sm:$0xff] %v12024_v28  ;;  %v12026_v31 = vsub.f32 %v3557_v38, %v3662_v55  ;;  %v3559_v26 = vmax.f32 %v9748_v29, 0.0  ;;  %v8801_v62 = vpop.f32.mrb[24].mxu0  ;;  %v12028_v14 = vpack.c.bf16 %v3665_v40, %v3662_v55  ;;  %v12030_v33 = vpack.c.bf16 %v3837_v18, %v3830_v3 }
 0x35e   :  { %14599 = vst [vmem:[#allocation4_spill] sm:$0xff] %v12018_v43  ;;  %v14065_v35 = vand.u32 4294901760, %v12018_v43  ;;  %v3671_v42 = vand.u32 4294901760, %v3560_v24  ;;  %v9749_v0 = vadd.f32 %v8801_v62, %v11768_v60  ;;  %v3299_v36 = vpop.f32.mrb[25].mxu0  ;;  %v3843_v10 = vsub.f32 %v12006_v27, %v14602_v39 }
 0x35f   :  { %14601 = vst [vmem:[#allocation8_spill] sm:$0xff] %v12028_v14  ;;  %v3668_v57 = vand.u32 4294901760, %v3559_v26  ;;  %v9750_v38 = vadd.f32 %v3299_v36, %v11768_v60  ;;  %9078 = vmatprep.subr.bf16.mxu1 %v12028_v14  ;;  %v3851_v40 = vand.u32 4294901760, %v3850_v11  ;;  %v14606_v36 = vand.u32 4294901760, %v12026_v31 }
 0x360   :  { %v12040_v18 = vsub.f32 %v3560_v24, %v3671_v42  ;;  %v3562_v55 = vmax.f32 %v9749_v0, 0.0  ;;  %9080 = vmatpush3.bf16.msra.mxu1 %v11881_v30  ;;  %v3844_v29 = vand.u32 4294901760, %v3843_v10  ;;  %v3864_v62 = vsub.f32 %v12018_v43, %v14065_v35 }
 0x361   :  { %v12046_v3 = vsub.f32 %v3559_v26, %v3668_v57  ;;  %v3561_v39 = vmax.f32 %v9750_v38, 0.0  ;;  %v8804_v53 = vpop.f32.mrb[26].mxu0  ;;  %v12048_v28 = vpack.c.bf16 %v3671_v42, %v3668_v57  ;;  %v3857_v11 = vsub.f32 %v12026_v31, %v14606_v36 }
 0x362   :  { %14603 = vst [vmem:[#allocation3_spill] sm:$0xff] %v12040_v18  ;;  %v14072_v24 = vand.u32 4294901760, %v12040_v18  ;;  %v3677_v0 = vand.u32 4294901760, %v3562_v55  ;;  %v9751_v30 = vadd.f32 %v8804_v53, %v11768_v60  ;;  %v3311_v10 = vpop.f32.mrb[27].mxu0  ;;  %v12055_v14 = vpack.c.bf16 %v3851_v40, %v3844_v29 }
 0x363   :  { %14604 = vst [vmem:[#allocation9_spill] sm:$0xff] %v12046_v3  ;;  %14605 = vst [vmem:[#allocation11_spill] sm:$0xff] %v12048_v28  ;;  %v3674_v26 = vand.u32 4294901760, %v3561_v39  ;;  %v9752_v38 = vadd.f32 %v3311_v10, %v11768_v60  ;;  %9082 = vmatprep.subr.bf16.mxu1 %v12048_v28  ;;  %v3858_v42 = vand.u32 4294901760, %v3857_v11  ;;  %v3865_v36 = vand.u32 4294901760, %v3864_v62 }
 0x364   :  { %v12060_v57 = vsub.f32 %v3562_v55, %v3677_v0  ;;  %v3564_v1 = vmax.f32 %v9751_v30, 0.0  ;;  %9084 = vmatpush3.bf16.msra.mxu1 %v11899_v17  ;;  %v3878_v53 = vsub.f32 %v12040_v18, %v14072_v24  ;;  %v14610_v10 = vand.u32 4294901760, %v12046_v3 }
 0x365   :  { %v12066_v40 = vsub.f32 %v3561_v39, %v3674_v26  ;;  %v3563_v29 = vmax.f32 %v9752_v38, 0.0  ;;  %v8807_v35 = vpop.f32.mrb[28].mxu0  ;;  %v12068_v43 = vpack.c.bf16 %v3677_v0, %v3674_v26  ;;  %v12075_v28 = vpack.c.bf16 %v3865_v36, %v3858_v42 }
 0x366   :  { %14607 = vst [vmem:[#allocation5_spill] sm:$0xff] %v12060_v57  ;;  %v3871_v11 = vsub.f32 %v12046_v3, %v14610_v10  ;;  %v14081_v55 = vand.u32 4294901760, %v12060_v57  ;;  %v3683_v30 = vand.u32 4294901760, %v3564_v1  ;;  %v9753_v17 = vadd.f32 %v8807_v35, %v11768_v60  ;;  %v3323_v62 = vpop.f32.mrb[29].mxu0 }
 0x367   :  { %14608 = vst [vmem:[#allocation14_spill] sm:$0xff] %v12066_v40  ;;  %14609 = vst [vmem:[#allocation16_spill] sm:$0xff] %v12068_v43  ;;  %v3680_v39 = vand.u32 4294901760, %v3563_v29  ;;  %v9754_v38 = vadd.f32 %v3323_v62, %v11768_v60  ;;  %9086 = vmatprep.subr.bf16.mxu1 %v12068_v43  ;;  %v3879_v10 = vand.u32 4294901760, %v3878_v53  ;;  %v14614_v62 = vand.u32 4294901760, %v12066_v40 }
 0x368   :  { %v3872_v0 = vand.u32 4294901760, %v3871_v11  ;;  %v12080_v26 = vsub.f32 %v3564_v1, %v3683_v30  ;;  %v3566_v18 = vmax.f32 %v9753_v17, 0.0  ;;  %9088 = vmatpush3.bf16.msra.mxu1 %v11917_v8  ;;  %v3892_v35 = vsub.f32 %v12060_v57, %v14081_v55 }
 0x369   :  { %v12086_v42 = vsub.f32 %v3563_v29, %v3680_v39  ;;  %v3565_v36 = vmax.f32 %v9754_v38, 0.0  ;;  %v8810_v24 = vpop.f32.mrb[30].mxu0  ;;  %v12088_v3 = vpack.c.bf16 %v3683_v30, %v3680_v39  ;;  %v3885_v11 = vsub.f32 %v12066_v40, %v14614_v62 }
 0x36a   :  { %14611 = vst [vmem:[#allocation17_spill] sm:$0xff] %v12080_v26  ;;  %v14090_v1 = vand.u32 4294901760, %v12080_v26  ;;  %v3689_v17 = vand.u32 4294901760, %v3566_v18  ;;  %v9755_v8 = vadd.f32 %v8810_v24, %v11768_v60  ;;  %v3335_v53 = vpop.f32.mrb[31].mxu0  ;;  %v12095_v43 = vpack.c.bf16 %v3879_v10, %v3872_v0 }
 0x36b   :  { %14612 = vst [vmem:[#allocation19_spill] sm:$0xff] %v12086_v42  ;;  %14613 = vst [vmem:[#allocation22_spill] sm:$0xff] %v12088_v3  ;;  %v3686_v29 = vand.u32 4294901760, %v3565_v36  ;;  %v9756_v38 = vadd.f32 %v3335_v53, %v11768_v60  ;;  %9090 = vmatprep.subr.bf16.mxu1 %v12088_v3  ;;  %v3886_v30 = vand.u32 4294901760, %v3885_v11  ;;  %v3893_v62 = vand.u32 4294901760, %v3892_v35 }
 0x36c   :  { %v12100_v39 = vsub.f32 %v3566_v18, %v3689_v17  ;;  %v3568_v57 = vmax.f32 %v9755_v8, 0.0  ;;  %9092 = vmatpush3.bf16.msra.mxu1 %v11935_v6  ;;  %v3906_v24 = vsub.f32 %v12080_v26, %v14090_v1  ;;  %v14617_v53 = vand.u32 4294901760, %v12086_v42 }
 0x36d   :  { %v12106_v0 = vsub.f32 %v3565_v36, %v3686_v29  ;;  %v3567_v10 = vmax.f32 %v9756_v38, 0.0  ;;  %v8813_v55 = vpop.f32.mrb[32].mxu0  ;;  %v12108_v40 = vpack.c.bf16 %v3689_v17, %v3686_v29  ;;  %v12115_v3 = vpack.c.bf16 %v3893_v62, %v3886_v30 }
 0x36e   :  { %14615 = vst [vmem:[#allocation24_spill] sm:$0xff] %v12100_v39  ;;  %v3899_v11 = vsub.f32 %v12086_v42, %v14617_v53  ;;  %v14099_v18 = vand.u32 4294901760, %v12100_v39  ;;  %v3695_v8 = vand.u32 4294901760, %v3568_v57  ;;  %v9757_v6 = vadd.f32 %v8813_v55, %v11768_v60  ;;  %v3347_v35 = vpop.f32.mrb[33].mxu0 }
 0x36f   :  { %14616 = vst [vmem:[#allocation25_spill] sm:$0xff] %v12108_v40  ;;  %v3692_v36 = vand.u32 4294901760, %v3567_v10  ;;  %v9758_v38 = vadd.f32 %v3347_v35, %v11768_v60  ;;  %9094 = vmatprep.subr.bf16.mxu1 %v12108_v40  ;;  %v3907_v53 = vand.u32 4294901760, %v3906_v24  ;;  %v14619_v35 = vand.u32 4294901760, %v12106_v0 }
 0x370   :  { %v3900_v17 = vand.u32 4294901760, %v3899_v11  ;;  %v12120_v29 = vsub.f32 %v3568_v57, %v3695_v8  ;;  %v3570_v26 = vmax.f32 %v9757_v6, 0.0  ;;  %9096 = vmatpush3.bf16.msra.mxu1 %v11953_v52  ;;  %v3920_v55 = vsub.f32 %v12100_v39, %v14099_v18 }
 0x371   :  { %v12126_v30 = vsub.f32 %v3567_v10, %v3692_v36  ;;  %v3569_v62 = vmax.f32 %v9758_v38, 0.0  ;;  %v8816_v1 = vpop.f32.mrb[34].mxu0  ;;  %v12128_v42 = vpack.c.bf16 %v3695_v8, %v3692_v36  ;;  %v3913_v11 = vsub.f32 %v12106_v0, %v14619_v35 }
 0x372   :  { %v14102_v57 = vand.u32 4294901760, %v12120_v29  ;;  %v4467_v6 = vand.u32 4294901760, %v3570_v26  ;;  %v9760_v52 = vadd.f32 %v8816_v1, %v11781_v22  ;;  %v3359_v24 = vpop.f32.mrb[35].mxu0  ;;  %v12135_v40 = vpack.c.bf16 %v3907_v53, %v3900_v17 }
 0x373   :  { %14618 = vst [vmem:[#allocation26_spill] sm:$0xff] %v12128_v42  ;;  %v14104_v18 = vand.u32 4294901760, %v12126_v30  ;;  %v4464_v10 = vand.u32 4294901760, %v3569_v62  ;;  %v9762_v38 = vadd.f32 %v3359_v24, %v11785_v34  ;;  %9098 = vmatprep.subr.bf16.mxu1 %v12128_v42  ;;  %v3914_v8 = vand.u32 4294901760, %v3913_v11 }
 0x374   :  { %v3572_v36 = vmax.f32 %v9760_v52, 0.0  ;;  %9100 = vmatpush3.bf16.msra.mxu1 %v11971_v15  ;;  %v3921_v35 = vand.u32 4294901760, %v3920_v55  ;;  %v3934_v39 = vsub.f32 %v12120_v29, %v14102_v57  ;;  %v12146_v22 = vadd.f32 %v11740_v7, %v11768_v60 }
 0x375   :  { %v12148_v1 = vpack.c.bf16 %v4467_v6, %v4464_v10  ;;  %v3571_v17 = vmax.f32 %v9762_v38, 0.0  ;;  %v8819_v53 = vpop.f32.mrb[36].mxu0  ;;  %9102 = vmatprep.subr.bf16.mxu1 %v12030_v33  ;;  %v3927_v34 = vsub.f32 %v12126_v30, %v14104_v18  ;;  %v12156_v52 = vadd.f32 %v11742_v47, %v11768_v60 }
 0x376   :  { %v4473_v55 = vand.u32 4294901760, %v3572_v36  ;;  %v9764_v11 = vadd.f32 %v8819_v53, %v11788_v61  ;;  %v3371_v24 = vpop.f32.mrb[37].mxu0  ;;  %v12159_v7 = vpack.c.bf16 %v3921_v35, %v3914_v8  ;;  %v12163_v38 = vadd.f32 %v11747_v32, %v11768_v60 }
 0x377   :  { %14620 = vst [vmem:[#allocation28_spill] sm:$0xff] %v12148_v1  ;;  %v12165_v57 = vsub.f32 %v3570_v26, %v4467_v6  ;;  %v4470_v33 = vand.u32 4294901760, %v3571_v17  ;;  %v9766_v1 = vadd.f32 %v3371_v24, %v11791_v21  ;;  %v14622_v18 = vand.u32 4294901760, %v11775_v2 }
 0x378   :  { %v12172_v47 = vadd.f32 %v11751_v12, %v11768_v60  ;;  %v12174_v61 = vsub.f32 %v3569_v62, %v4464_v10  ;;  %v3574_v8 = vmax.f32 %v9764_v11, 0.0  ;;  %v3928_v35 = vand.u32 4294901760, %v3927_v34 }
 0x379   :  { %14621 = vst [vmem:[#allocation30_spill] sm:$0xff] %v12165_v57  ;;  %3708 = vmatmul.mubr.f32.vlgmr.msra.gmra.mrb[30].mxu1 %v14622_v18  ;;  %v3935_v32 = vand.u32 4294901760, %v3934_v39  ;;  %v12178_v26 = vsub.f32 %v3572_v36, %v4473_v55  ;;  %v12180_v6 = vpack.c.bf16 %v4473_v55, %v4470_v33  ;;  %v12182_v21 = vsub.f32 %v3571_v17, %v4470_v33  ;;  %v8822_v18 = vpop.f32.mrb[38].mxu0 }
 0x37a   :  { %14623 = vst [vmem:[#allocation31_spill] sm:$0xff] %v12174_v61  ;;  %9104 = vmatpush3.bf16.msra.mxu1 %v11894_v20  ;;  %3938 = vmatprep.mubr.f32.mxu1 %v11729_v9  ;;  %v3573_v2 = vmax.f32 %v9766_v1, 0.0  ;;  %v4479_v12 = vand.u32 4294901760, %v3574_v8  ;;  %v9768_v62 = vadd.f32 %v8822_v18, %v11796_v41  ;;  %v3383_v10 = vpop.f32.mrb[39].mxu0  ;;  %v12188_v20 = vadd.f32 %v11755_v48, %v11768_v60 }
 0x37b   :  { %14624 = vst [vmem:[#allocation36_spill] sm:$0xff] %v12178_v26  ;;  %14625 = vst [vmem:[#allocation37_spill] sm:$0xff] %v12180_v6  ;;  %9106 = vmatprep.subr.bf16.mxu1 %v12055_v14  ;;  %v12192_v39 = vadd.f32 %v11760_v46, %v11768_v60  ;;  %v14107_v36 = vand.u32 4294901760, %v12165_v57  ;;  %v9770_v1 = vadd.f32 %v3383_v10, %v11799_v19  ;;  %v14108_v41 = vand.u32 4294901760, %v12174_v61 }
 0x37c   :  { %14626 = vst [vmem:[#allocation40_spill] sm:$0xff] %v12182_v21  ;;  %v4476_v17 = vand.u32 4294901760, %v3573_v2  ;;  %v12198_v14 = vadd.f32 %v11763_v5, %v11768_v60  ;;  %v3576_v53 = vmax.f32 %v9768_v62, 0.0  ;;  %v12202_v48 = vpack.c.bf16 %v3935_v32, %v3928_v35 }
 0x37d   :  { %v12206_v46 = vadd.f32 %v11766_v49, %v11768_v60  ;;  %v14105_v34 = vand.u32 4294901760, %v12178_v26  ;;  %v14106_v55 = vand.u32 4294901760, %v12182_v21  ;;  %v3575_v11 = vmax.f32 %v9770_v1, 0.0  ;;  %v8825_v5 = vpop.f32.mrb[40].mxu0 }
 0x37e   :  { %9108 = vmatpush3.bf16.msra.mxu1 %v11912_v4  ;;  %v12210_v19 = vpack.c.bf16 %v4479_v12, %v4476_v17  ;;  %v12213_v24 = vsub.f32 %v3574_v8, %v4479_v12  ;;  %v4485_v33 = vand.u32 4294901760, %v3576_v53  ;;  %v9772_v4 = vadd.f32 %v8825_v5, %v11805_v58  ;;  %v3395_v35 = vpop.f32.mrb[41].mxu0 }
 0x37f   :  { %9110 = vmatprep.subr.bf16.mxu1 %v12075_v28  ;;  %v12218_v49 = vadd.f32 %v11770_v54, %v11768_v60  ;;  %v12223_v32 = vsub.f32 %v12165_v57, %v14107_v36  ;;  %v4482_v18 = vand.u32 4294901760, %v3575_v11  ;;  %v9774_v62 = vadd.f32 %v3395_v35, %v11808_v56  ;;  %v14692_v57 = vld [vmem:[#allocation19_spill] sm:$0xff] }
 0x380   :  { %14627 = vst [vmem:[#allocation41_spill] sm:$0xff] %v12210_v19  ;;  %14628 = vst [vmem:[#allocation42_spill] sm:$0xff] %v12213_v24  ;;  %v12228_v28 = vadd.f32 %v11777_v63, %v11768_v60  ;;  %v12233_v58 = vsub.f32 %v12174_v61, %v14108_v41  ;;  %v12235_v8 = vsub.f32 %v3573_v2, %v4476_v17  ;;  %v3578_v54 = vmax.f32 %v9772_v4, 0.0 }
 0x381   :  { %v12243_v56 = vsub.f32 %v12178_v26, %v14105_v34  ;;  %v12248_v63 = vsub.f32 %v12182_v21, %v14106_v55  ;;  %v12250_v10 = vpack.c.bf16 %v4485_v33, %v4482_v18  ;;  %v3577_v2 = vmax.f32 %v9774_v62, 0.0  ;;  %v8828_v17 = vpop.f32.mrb[42].mxu0  ;;  %v14691_v26 = vld [vmem:[#allocation63_spill] sm:$0xff] }
 0x382   :  { %14629 = vst [vmem:[#allocation44_spill] sm:$0xff] %v12235_v8  ;;  %9112 = vmatpush3.bf16.msra.mxu1 %v11930_v25  ;;  %v14110_v25 = vand.u32 4294901760, %v12213_v24  ;;  %v4491_v1 = vand.u32 4294901760, %v3578_v54  ;;  %v9776_v5 = vadd.f32 %v8828_v17, %v11811_v23  ;;  %v3407_v4 = vpop.f32.mrb[43].mxu0  ;;  %v12257_v35 = vadd.f32 %v11793_v45, %v11768_v60 }
 0x383   :  { %14630 = vst [vmem:[#allocation47_spill] sm:$0xff] %v12250_v10  ;;  %9114 = vmatprep.subr.bf16.mxu1 %v12095_v43  ;;  %v4488_v55 = vand.u32 4294901760, %v3577_v2  ;;  %v9778_v36 = vadd.f32 %v3407_v4, %v11815_v37  ;;  %v12263_v62 = vadd.f32 %v11802_v59, %v11768_v60  ;;  %v12280_v59 = vsub.f32 %v3576_v53, %v4485_v33  ;;  %v14639_v33 = vld [vmem:[#allocation27_spill] sm:$0xff]  ;;  %v14647_v10 = vld [vmem:[#allocation34_spill] sm:$0xff] }
 0x384   :  { %v3580_v12 = vmax.f32 %v9776_v5, 0.0  ;;  %v12278_v60 = vsub.f32 %v12213_v24, %v14110_v25  ;;  %v12283_v23 = vsub.f32 %v3575_v11, %v4482_v18  ;;  %v12285_v17 = vsub.f32 %v3578_v54, %v4491_v1  ;;  %v14690_v24 = vld [vmem:[#allocation13_spill] sm:$0xff] }
 0x385   :  { %v12272_v34 = vpack.c.bf16 %v4491_v1, %v4488_v55  ;;  %v3579_v37 = vmax.f32 %v9778_v36, 0.0  ;;  %v8831_v4 = vpop.f32.mrb[44].mxu0  ;;  %14633 = vst [vmem:[#allocation76_spill] sm:$0xff] %v12280_v59  ;;  %v14636_v36 = vld [vmem:[#allocation52_spill] sm:$0xff]  ;;  %v12293_v25 = vsub.f32 %v3577_v2, %v4488_v55  ;;  %v14649_v55 = vld [vmem:[#allocation111_spill] sm:$0xff]  ;;  %v14653_v19 = vand.u32 4294901760, %v12280_v59 }
 0x386   :  { %9116 = vmatpush3.bf16.msra.mxu1 %v11948_v16  ;;  %14632 = vst [vmem:[#allocation75_spill] sm:$0xff] %v12278_v60  ;;  %v4497_v16 = vand.u32 4294901760, %v3580_v12  ;;  %v9780_v5 = vadd.f32 %v8831_v4, %v11818_v44  ;;  %v3419_v43 = vpop.f32.mrb[45].mxu0  ;;  %14634 = vst [vmem:[#allocation77_spill] sm:$0xff] %v12283_v23  ;;  %v14640_v44 = vld [vmem:[#allocation4_spill] sm:$0xff] }
 0x387   :  { %14631 = vst [vmem:[#allocation73_spill] sm:$0xff] %v12272_v34  ;;  %9118 = vmatprep.subr.bf16.mxu1 %v12115_v3  ;;  %14635 = vst [vmem:[#allocation78_spill] sm:$0xff] %v12285_v17  ;;  %v4494_v45 = vand.u32 4294901760, %v3579_v37  ;;  %v9782_v41 = vadd.f32 %v3419_v43, %v14636_v36  ;;  %v14637_v3 = vand.u32 4294901760, %v12235_v8  ;;  %v14648_v36 = vld [vmem:[#allocation50_spill] sm:$0xff] }
 0x388   :  { %14638 = vst [vmem:[#allocation79_spill] sm:$0xff] %v12293_v25  ;;  %v3582_v53 = vmax.f32 %v9780_v5, 0.0  ;;  %v12298_v11 = vsub.f32 %v3580_v12, %v4497_v16  ;;  %v14644_v5 = vld [vmem:[#allocation53_spill] sm:$0xff] }
 0x389   :  { %v12291_v34 = vsub.f32 %v12235_v8, %v14637_v3  ;;  %v12300_v18 = vpack.c.bf16 %v4497_v16, %v4494_v45  ;;  %v12302_v54 = vsub.f32 %v3579_v37, %v4494_v45  ;;  %v3581_v1 = vmax.f32 %v9782_v41, 0.0  ;;  %v8834_v43 = vpop.f32.mrb[46].mxu0 }
 0x38a   :  { %9120 = vmatpush3.bf16.msra.mxu1 %v14639_v33  ;;  %14641 = vst [vmem:[#allocation80_spill] sm:$0xff] %v12298_v11  ;;  %v4503_v2 = vand.u32 4294901760, %v3582_v53  ;;  %v9784_v3 = vadd.f32 %v8834_v43, %v14644_v5  ;;  %v3431_v33 = vpop.f32.mrb[47].mxu0  ;;  %v12329_v43 = vsub.f32 %v12280_v59, %v14653_v19  ;;  %v14661_v19 = vld [vmem:[#allocation61_spill] sm:$0xff] }
 0x38b   :  { %14642 = vst [vmem:[#allocation81_spill] sm:$0xff] %v12300_v18  ;;  %14643 = vst [vmem:[#allocation82_spill] sm:$0xff] %v12302_v54  ;;  %9122 = vmatprep.subr.bf16.mxu1 %v12135_v40  ;;  %v4500_v16 = vand.u32 4294901760, %v3581_v1  ;;  %v14645_v18 = vld [vmem:[#allocation58_spill] sm:$0xff] }
 0x38c   :  { %v9786_v45 = vadd.f32 %v3431_v33, %v14645_v18  ;;  %v12312_v37 = vsub.f32 %v3582_v53, %v4503_v2  ;;  %v3584_v40 = vmax.f32 %v9784_v3, 0.0  ;;  %v14652_v33 = vld [vmem:[#allocation65_spill] sm:$0xff]  ;;  %14654 = vst [vmem:[#allocation86_spill] sm:$0xff] %v12329_v43 }
 0x38d   :  { %v12319_v4 = vpack.c.bf16 %v4503_v2, %v4500_v16  ;;  %v8837_v6 = vpop.f32.mrb[48].mxu0  ;;  %v12323_v53 = vsub.f32 %v3581_v1, %v4500_v16  ;;  %v14658_v16 = vand.u32 4294901760, %v12285_v17  ;;  %v14662_v18 = vld [vmem:[#allocation9_spill] sm:$0xff]  ;;  %v14663_v2 = vld [vmem:[#allocation3_spill] sm:$0xff] }
 0x38e   :  { %14646 = vst [vmem:[#allocation83_spill] sm:$0xff] %v12312_v37  ;;  %9124 = vmatpush3.bf16.msra.mxu1 %v14647_v10  ;;  %v3583_v12 = vmax.f32 %v9786_v45, 0.0  ;;  %v4509_v3 = vand.u32 4294901760, %v3584_v40  ;;  %v9788_v10 = vadd.f32 %v8837_v6, %v14652_v33  ;;  %v3443_v41 = vpop.f32.mrb[49].mxu0  ;;  %v14655_v45 = vld [vmem:[#allocation99_spill] sm:$0xff] }
 0x38f   :  { %14650 = vst [vmem:[#allocation84_spill] sm:$0xff] %v12319_v4  ;;  %9126 = vmatprep.subr.bf16.mxu1 %v12159_v7  ;;  %14651 = vst [vmem:[#allocation85_spill] sm:$0xff] %v12323_v53  ;;  %v12333_v4 = vadd.f32 %v3443_v41, %v14655_v45  ;;  %v14656_v7 = vand.u32 4294901760, %v12283_v23  ;;  %v12343_v6 = vsub.f32 %v12285_v17, %v14658_v16  ;;  %v14664_v41 = vand.u32 4294901760, %v12293_v25 }
 0x390   :  { %v4506_v5 = vand.u32 4294901760, %v3583_v12  ;;  %v12345_v33 = vsub.f32 %v3584_v40, %v4509_v3  ;;  %v14668_v16 = vand.u32 4294901760, %v12302_v54 }
 0x391   :  { %v12338_v1 = vsub.f32 %v12283_v23, %v14656_v7  ;;  %14659 = vst [vmem:[#allocation88_spill] sm:$0xff] %v12343_v6  ;;  %v12353_v45 = vsub.f32 %v12293_v25, %v14664_v41  ;;  %v14666_v7 = vand.u32 4294901760, %v12298_v11  ;;  %v3586_v41 = vmax.f32 %v9788_v10, 0.0  ;;  %v14672_v25 = vld [vmem:[#allocation100_spill] sm:$0xff]  ;;  %v14676_v10 = vld [vmem:[#allocation6_spill] sm:$0xff]  ;;  %v14702_v6 = vld [vmem:[#allocation103_spill] sm:$0xff] }
 0x392   :  { %14660 = vst [vmem:[#allocation89_spill] sm:$0xff] %v12345_v33  ;;  %9128 = vmatpush3.bf16.msra.mxu1 %v14661_v19  ;;  %v12363_v40 = vsub.f32 %v12302_v54, %v14668_v16  ;;  %v12365_v42 = vpack.c.bf16 %v4509_v3, %v4506_v5  ;;  %v8840_v19 = vpop.f32.mrb[50].mxu0  ;;  %v12369_v17 = vsub.f32 %v3583_v12, %v4506_v5  ;;  %v14673_v23 = vand.u32 4294901760, %v12312_v37  ;;  %v14681_v5 = vld [vmem:[#allocation5_spill] sm:$0xff] }
 0x393   :  { %14657 = vst [vmem:[#allocation87_spill] sm:$0xff] %v12338_v1  ;;  %14665 = vst [vmem:[#allocation90_spill] sm:$0xff] %v12353_v45  ;;  %v12358_v15 = vsub.f32 %v12298_v11, %v14666_v7  ;;  %9130 = vmatprep.subr.bf16.mxu1 %v12202_v48  ;;  %v12372_v59 = vadd.f32 %v8840_v19, %v14672_v25  ;;  %v3455_v7 = vpop.f32.mrb[51].mxu0  ;;  %v3585_v3 = vmax.f32 %v12333_v4, 0.0  ;;  %v14677_v19 = vld [vmem:[#allocation12_spill] sm:$0xff]  ;;  %v14678_v11 = vld [vmem:[#allocation51_spill] sm:$0xff] }
 0x394   :  { %14669 = vst [vmem:[#allocation92_spill] sm:$0xff] %v12363_v40  ;;  %14670 = vst [vmem:[#allocation93_spill] sm:$0xff] %v12365_v42  ;;  %v12378_v16 = vsub.f32 %v12312_v37, %v14673_v23  ;;  %v14675_v42 = vld [vmem:[#allocation104_spill] sm:$0xff]  ;;  %v14682_v25 = vand.u32 4294901760, %v12323_v53  ;;  %v12404_v54 = vand.u32 4294901760, %v3586_v41  ;;  %v14699_v21 = vand.u32 4294901760, %v12369_v17 }
 0x395   :  { %14667 = vst [vmem:[#allocation91_spill] sm:$0xff] %v12358_v15  ;;  %14671 = vst [vmem:[#allocation94_spill] sm:$0xff] %v12369_v17  ;;  %v12382_v48 = vadd.f32 %v3455_v7, %v14675_v42  ;;  %v8843_v37 = vpop.f32.mrb[52].mxu0  ;;  %v14679_v42 = vpack.c.bf16 %v11982_v13, %v11989_v50  ;;  %v14680_v7 = vld [vmem:[#allocation14_spill] sm:$0xff]  ;;  %v12408_v8 = vand.u32 4294901760, %v3585_v3  ;;  %v14684_v13 = vld [vmem:[#allocation43_spill] sm:$0xff]  ;;  %v14707_v40 = vpack.c.bf16 %v14640_v44, %v12026_v31 }
 0x396   :  { %14674 = vst [vmem:[#allocation97_spill] sm:$0xff] %v12378_v16  ;;  %9132 = vmatpush3.bf16.msra.mxu1 %v14676_v10  ;;  %v12401_v10 = vsub.f32 %v12323_v53, %v14682_v25  ;;  %v9796_v23 = vadd.f32 %v8843_v37, %v12146_v22  ;;  %v3467_v4 = vpop.f32.mrb[53].mxu0  ;;  %v14685_v25 = vand.u32 4294901760, %v12345_v33  ;;  %v14687_v53 = vld [vmem:[#allocation55_spill] sm:$0xff]  ;;  %v14688_v22 = vld [vmem:[#allocation96_spill] sm:$0xff]  ;;  %v12440_v61 = vsub.f32 %v3586_v41, %v12404_v54 }
 0x397   :  { %9134 = vmatprep.subr.bf16.mxu1 %v14679_v42  ;;  %v3588_v42 = vmax.f32 %v12372_v59, 0.0  ;;  %v9798_v12 = vadd.f32 %v3467_v4, %v12156_v52  ;;  %v3587_v9 = vmax.f32 %v12382_v48, 0.0  ;;  %v14689_v37 = vpack.c.bf16 %v14687_v53, %v14688_v22  ;;  %v14693_v59 = vld [vmem:[#allocation17_spill] sm:$0xff]  ;;  %v14694_v52 = vld [vmem:[#allocation38_spill] sm:$0xff] }
 0x398   :  { %14683 = vst [vmem:[#allocation98_spill] sm:$0xff] %v12401_v10  ;;  %v12416_v50 = vsub.f32 %v12345_v33, %v14685_v25  ;;  %v3590_v4 = vmax.f32 %v9796_v23, 0.0  ;;  %v14695_v25 = vpack.c.bf16 %v11998_v51, %v12006_v27  ;;  %v14696_v48 = vld [vmem:[#allocation69_spill] sm:$0xff]  ;;  %v14697_v33 = vld [vmem:[#allocation15_spill] sm:$0xff]  ;;  %v12437_v22 = vsub.f32 %v12369_v17, %v14699_v21  ;;  %v14701_v51 = vld [vmem:[#allocation18_spill] sm:$0xff] }
 0x399   :  { %3940 = vmatmul.mubr.f32.vlgmr.msra.gmra.mrb[32].mxu1 %v14684_v13  ;;  %v3589_v13 = vmax.f32 %v9798_v12, 0.0  ;;  %v8846_v16 = vpop.f32.mrb[54].mxu0  ;;  %v12446_v15 = vand.u32 4294901760, %v3588_v42  ;;  %v12452_v21 = vsub.f32 %v3585_v3, %v12408_v8  ;;  %v4518_v41 = vand.u32 4294901760, %v3587_v9 }
 0x39a   :  { %14686 = vst [vmem:[#allocation101_spill] sm:$0xff] %v12416_v50  ;;  %9136 = vmatpush3.bf16.msra.mxu1 %v14689_v37  ;;  %4075 = vmatprep.mubr.f32.mxu1 %v14694_v52  ;;  %v14698_v37 = vld [vmem:[#allocation24_spill] sm:$0xff]  ;;  %v9800_v12 = vadd.f32 %v8846_v16, %v12163_v38  ;;  %v3479_v23 = vpop.f32.mrb[55].mxu0  ;;  %v14700_v52 = vld [vmem:[#allocation21_spill] sm:$0xff]  ;;  %v4527_v10 = vand.u32 4294901760, %v3590_v4  ;;  %v14709_v50 = vand.u32 4294901760, %v14640_v44 }
 0x39b   :  { %9138 = vmatprep.subr.bf16.mxu1 %v14695_v25  ;;  %v9802_v53 = vadd.f32 %v3479_v23, %v12172_v47  ;;  %v14703_v38 = vld [vmem:[#allocation108_spill] sm:$0xff]  ;;  %v14706_v25 = vld [vmem:[#allocation2_spill] sm:$0xff]  ;;  %v4524_v1 = vand.u32 4294901760, %v3589_v13  ;;  %v12467_v43 = vsub.f32 %v3588_v42, %v12446_v15  ;;  %v12477_v3 = vsub.f32 %v3587_v9, %v4518_v41 }
 0x39c   :  { %v3592_v17 = vmax.f32 %v9800_v12, 0.0  ;;  %v14704_v16 = vpack.c.bf16 %v14702_v6, %v14703_v38  ;;  %v14711_v42 = vand.u32 4294901760, %v14662_v18  ;;  %v14714_v9 = vpack.c.bf16 %v14663_v2, %v14662_v18 }
 0x39d   :  { %v3591_v47 = vmax.f32 %v9802_v53, 0.0  ;;  %v8849_v23 = vpop.f32.mrb[56].mxu0  ;;  %v14708_v53 = vand.u32 4294901760, %v12026_v31  ;;  %v12488_v31 = vsub.f32 %v3590_v4, %v4527_v10  ;;  %v12490_v44 = vsub.f32 %v3589_v13, %v4524_v1 }
 0x39e   :  { %9140 = vmatpush3.bf16.msra.mxu1 %v14704_v16  ;;  %v4533_v60 = vand.u32 4294901760, %v3592_v17  ;;  %v9804_v16 = vadd.f32 %v8849_v23, %v12188_v20  ;;  %v3491_v6 = vpop.f32.mrb[57].mxu0  ;;  %v14710_v20 = vpack.c.bf16 %v14649_v55, %v14648_v36  ;;  %v14712_v23 = vand.u32 4294901760, %v14663_v2 }
 0x39f   :  { %9142 = vmatprep.subr.bf16.mxu1 %v14707_v40  ;;  %v4530_v27 = vand.u32 4294901760, %v3591_v47  ;;  %v9806_v38 = vadd.f32 %v3491_v6, %v12192_v39  ;;  %v12474_v45 = vpack.c.bf16 %v14709_v50, %v14708_v53  ;;  %v14716_v53 = vand.u32 4294901760, %v14681_v5 }
 0x3a0   :  { %v3594_v12 = vmax.f32 %v9804_v16, 0.0  ;;  %v12486_v39 = vpack.c.bf16 %v14712_v23, %v14711_v42  ;;  %v14715_v16 = vand.u32 4294901760, %v14680_v7  ;;  %v12501_v40 = vsub.f32 %v3592_v17, %v4533_v60 }
 0x3a1   :  { %v3593_v50 = vmax.f32 %v9806_v38, 0.0  ;;  %v8852_v6 = vpop.f32.mrb[58].mxu0  ;;  %v12503_v42 = vsub.f32 %v3591_v47, %v4530_v27  ;;  %v14717_v2 = vand.u32 4294901760, %v14692_v57 }
 0x3a2   :  { %9144 = vmatpush3.bf16.msra.mxu1 %v14710_v20  ;;  %14713 = vst [vmem:[#allocation102_spill] sm:$0xff] %v12486_v39  ;;  %v12499_v20 = vpack.c.bf16 %v14716_v53, %v14715_v16  ;;  %v4539_v4 = vand.u32 4294901760, %v3594_v12  ;;  %v9808_v13 = vadd.f32 %v8852_v6, %v12198_v14  ;;  %v3503_v23 = vpop.f32.mrb[59].mxu0  ;;  %v14720_v14 = vpack.c.bf16 %v14678_v11, %v14677_v19 }
 0x3a3   :  { %9146 = vmatprep.subr.bf16.mxu1 %v14714_v9  ;;  %v4536_v39 = vand.u32 4294901760, %v3593_v50  ;;  %v9810_v18 = vadd.f32 %v3503_v23, %v12206_v46  ;;  %v14718_v9 = vand.u32 4294901760, %v14693_v59  ;;  %v14721_v6 = vand.u32 4294901760, %v12106_v0 }
 0x3a4   :  { %v12515_v16 = vsub.f32 %v3594_v12, %v4539_v4  ;;  %v3596_v47 = vmax.f32 %v9808_v13, 0.0  ;;  %v14722_v53 = vand.u32 4294901760, %v14698_v37  ;;  %v14724_v12 = vpack.c.bf16 %v14681_v5, %v14680_v7 }
 0x3a5   :  { %v12512_v55 = vpack.c.bf16 %v14718_v9, %v14717_v2  ;;  %v3595_v9 = vmax.f32 %v9810_v18, 0.0  ;;  %v8855_v38 = vpop.f32.mrb[60].mxu0  ;;  %v14725_v13 = vand.u32 4294901760, %v12126_v30  ;;  %v12540_v18 = vsub.f32 %v3593_v50, %v4536_v39 }
 0x3a6   :  { %9148 = vmatpush3.bf16.msra.mxu1 %v14720_v14  ;;  %v12524_v46 = vpack.c.bf16 %v14722_v53, %v14721_v6  ;;  %v14726_v14 = vand.u32 4294901760, %v12120_v29  ;;  %v14170_v6 = vand.u32 4294901760, %v12503_v42  ;;  %v4545_v53 = vand.u32 4294901760, %v3596_v47  ;;  %v3515_v2 = vpop.f32.mrb[61].mxu0 }
 0x3a7   :  { %14719 = vst [vmem:[#allocation105_spill] sm:$0xff] %v12512_v55  ;;  %9150 = vmatprep.subr.bf16.mxu1 %v14724_v12  ;;  %v9812_v23 = vadd.f32 %v8855_v38, %v12218_v49  ;;  %14727 = vst [vmem:[#allocation109_spill] sm:$0xff] %v12540_v18  ;;  %v9814_v5 = vadd.f32 %v3515_v2, %v12228_v28  ;;  %v12545_v7 = vpack.c.bf16 %v12404_v54, %v12408_v8 }
 0x3a8   :  { %14723 = vst [vmem:[#allocation106_spill] sm:$0xff] %v12524_v46  ;;  %v12535_v17 = vpack.c.bf16 %v14726_v14, %v14725_v13  ;;  %v4542_v46 = vand.u32 4294901760, %v3595_v9  ;;  %v14172_v12 = vand.u32 4294901760, %v12515_v16  ;;  %v14728_v14 = vpack.c.bf16 %v14691_v26, %v14690_v24 }
 0x3a9   :  { %v3598_v13 = vmax.f32 %v9812_v23, 0.0  ;;  %v12552_v55 = vpack.c.bf16 %v12446_v15, %v4518_v41  ;;  %v12554_v49 = vpack.c.bf16 %v4527_v10, %v4524_v1  ;;  %v12556_v50 = vsub.f32 %v3596_v47, %v4545_v53  ;;  %v8858_v28 = vpop.f32.mrb[62].mxu0 }
 0x3aa   :  { %9152 = vmatpush3.bf16.msra.mxu1 %v14728_v14  ;;  %v3597_v38 = vmax.f32 %v9814_v5, 0.0  ;;  %v14730_v8 = vpack.c.bf16 %v14693_v59, %v14692_v57  ;;  %v12561_v54 = vpack.c.bf16 %v4533_v60, %v4530_v27  ;;  %v12563_v23 = vpack.c.bf16 %v4539_v4, %v4536_v39  ;;  %v3527_v41 = vpop.f32.mrb[63].mxu0 }
 0x3ab   :  { %14729 = vst [vmem:[#allocation110_spill] sm:$0xff] %v12556_v50  ;;  %v12565_v2 = vsub.f32 %v3595_v9, %v4542_v46  ;;  %v4551_v14 = vand.u32 4294901760, %v3598_v13  ;;  %v9816_v15 = vadd.f32 %v8858_v28, %v12257_v35  ;;  %v12568_v1 = vpack.c.bf16 %v4545_v53, %v4542_v46 }
 0x3ac   :  { %9154 = vmatprep.subr.bf16.mxu1 %v14730_v8  ;;  %14731 = vst [vmem:[#allocation112_spill] sm:$0xff] %v12563_v23  ;;  %v14171_v10 = vand.u32 4294901760, %v12540_v18  ;;  %v4548_v47 = vand.u32 4294901760, %v3597_v38  ;;  %v9818_v5 = vadd.f32 %v3527_v41, %v12263_v62  ;;  %v14734_v57 = vand.u32 4294901760, %v12452_v21 }
 0x3ad   :  { %14732 = vst [vmem:[#allocation48_spill] sm:$0xff] %v12565_v2  ;;  %14733 = vst [vmem:[#allocation49_spill] sm:$0xff] %v12568_v1  ;;  %v12575_v60 = vsub.f32 %v3598_v13, %v4551_v14  ;;  %v3600_v59 = vmax.f32 %v9816_v15, 0.0  ;;  %v14736_v39 = vpack.c.bf16 %v14697_v33, %v14696_v48  ;;  %v14737_v35 = vand.u32 4294901760, %v12440_v61 }
 0x3ae   :  { %v4691_v27 = vsub.f32 %v12452_v21, %v14734_v57  ;;  %v14738_v46 = vand.u32 4294901760, %v12233_v58  ;;  %v14739_v9 = vand.u32 4294901760, %v12223_v32  ;;  %v3599_v28 = vmax.f32 %v9818_v5, 0.0 }
 0x3af   :  { %14735 = vst [vmem:[#allocation54_spill] sm:$0xff] %v12575_v60  ;;  %9156 = vmatpush3.bf16.msra.mxu1 %v14736_v39  ;;  %v4698_v4 = vsub.f32 %v12440_v61, %v14737_v35  ;;  %v14741_v13 = vpack.c.bf16 %v14698_v37, %v12106_v0  ;;  %v12593_v8 = vpack.c.bf16 %v4551_v14, %v4548_v47  ;;  %v14173_v41 = vand.u32 4294901760, %v12565_v2 }
 0x3b0   :  { %v12587_v62 = vpack.c.bf16 %v14739_v9, %v14738_v46  ;;  %v4692_v15 = vand.u32 4294901760, %v4691_v27  ;;  %v4557_v57 = vand.u32 4294901760, %v3600_v59  ;;  %v14743_v58 = vand.u32 4294901760, %v12477_v3  ;;  %v14758_v27 = vld [vmem:[#allocation75_spill] sm:$0xff] }
 0x3b1   :  { %9158 = vmatprep.subr.bf16.mxu1 %v14741_v13  ;;  %14742 = vst [vmem:[#allocation59_spill] sm:$0xff] %v12593_v8  ;;  %v4699_v39 = vand.u32 4294901760, %v4698_v4  ;;  %v12599_v35 = vsub.f32 %v3597_v38, %v4548_v47  ;;  %v4554_v46 = vand.u32 4294901760, %v3599_v28  ;;  %v14745_v5 = vand.u32 4294901760, %v12467_v43 }
 0x3b2   :  { %14740 = vst [vmem:[#allocation57_spill] sm:$0xff] %v12587_v62  ;;  %v4705_v32 = vsub.f32 %v12477_v3, %v14743_v58  ;;  %v14746_v0 = vand.u32 4294901760, %v12248_v63  ;;  %v14747_v37 = vand.u32 4294901760, %v12243_v56  ;;  %v14749_v4 = vpack.c.bf16 %v14701_v51, %v14700_v52 }
 0x3b3   :  { %14744 = vst [vmem:[#allocation60_spill] sm:$0xff] %v12599_v35  ;;  %v4712_v9 = vsub.f32 %v12467_v43, %v14745_v5  ;;  %v12614_v13 = vpack.c.bf16 %v4699_v39, %v4692_v15  ;;  %v14751_v47 = vand.u32 4294901760, %v12490_v44  ;;  %v12619_v5 = vsub.f32 %v3600_v59, %v4557_v57 }
 0x3b4   :  { %v12608_v14 = vpack.c.bf16 %v14747_v37, %v14746_v0  ;;  %9160 = vmatpush3.bf16.msra.mxu1 %v14749_v4  ;;  %v4706_v38 = vand.u32 4294901760, %v4705_v32  ;;  %v14753_v56 = vpack.c.bf16 %v12120_v29, %v12126_v30  ;;  %v12624_v63 = vpack.c.bf16 %v4557_v57, %v4554_v46 }
 0x3b5   :  { %14750 = vst [vmem:[#allocation66_spill] sm:$0xff] %v12614_v13  ;;  %v4719_v58 = vsub.f32 %v12490_v44, %v14751_v47  ;;  %14752 = vst [vmem:[#allocation67_spill] sm:$0xff] %v12619_v5  ;;  %v4713_v0 = vand.u32 4294901760, %v4712_v9  ;;  %v14755_v37 = vand.u32 4294901760, %v12488_v31  ;;  %v12629_v15 = vsub.f32 %v3599_v28, %v4554_v46  ;;  %v14763_v46 = vld [vmem:[#allocation32_spill] sm:$0xff] }
 0x3b6   :  { %14748 = vst [vmem:[#allocation62_spill] sm:$0xff] %v12608_v14  ;;  %9162 = vmatprep.subr.bf16.mxu1 %v14753_v56  ;;  %14754 = vst [vmem:[#allocation71_spill] sm:$0xff] %v12624_v63  ;;  %v14757_v32 = vand.u32 4294901760, %v12291_v34  ;;  %v14759_v47 = vand.u32 4294901760, %v14758_v27  ;;  %v4733_v29 = vsub.f32 %v12503_v42, %v14170_v6  ;;  %v14762_v56 = vand.u32 4294901760, %v12501_v40  ;;  %v14786_v14 = vld [vmem:[#allocation38_spill] sm:$0xff] }
 0x3b7   :  { %v4726_v4 = vsub.f32 %v12488_v31, %v14755_v37  ;;  %14756 = vst [vmem:[#allocation72_spill] sm:$0xff] %v12629_v15  ;;  %v4720_v39 = vand.u32 4294901760, %v4719_v58  ;;  %v12641_v57 = vpack.c.bf16 %v4713_v0, %v4706_v38  ;;  %v14764_v34 = vpack.c.bf16 %v14706_v25, %v14763_v46  ;;  %v14765_v58 = vld [vmem:[#allocation87_spill] sm:$0xff] }
 0x3b8   :  { %v12635_v59 = vpack.c.bf16 %v14759_v47, %v14757_v32  ;;  %v4740_v28 = vsub.f32 %v12501_v40, %v14762_v56  ;;  %v4734_v27 = vand.u32 4294901760, %v4733_v29  ;;  %v14766_v37 = vand.u32 4294901760, %v14765_v58  ;;  %v14767_v32 = vld [vmem:[#allocation86_spill] sm:$0xff]  ;;  %v14774_v58 = vld [vmem:[#allocation88_spill] sm:$0xff] }
 0x3b9   :  { %14761 = vst [vmem:[#allocation27_spill] sm:$0xff] %v12641_v57  ;;  %v4727_v9 = vand.u32 4294901760, %v4726_v4  ;;  %9164 = vmatpush3.bf16.msra.mxu1 %v14764_v34  ;;  %v14768_v47 = vand.u32 4294901760, %v14767_v32  ;;  %v4747_v38 = vsub.f32 %v12540_v18, %v14171_v10  ;;  %v4754_v0 = vsub.f32 %v12515_v16, %v14172_v12  ;;  %v14770_v4 = vld [vmem:[#allocation39_spill] sm:$0xff]  ;;  %v14772_v29 = vld [vmem:[#allocation90_spill] sm:$0xff] }
 0x3ba   :  { %14760 = vst [vmem:[#allocation52_spill] sm:$0xff] %v12635_v59  ;;  %9166 = vmatprep.subr.bf16.mxu1 %v14770_v4  ;;  %v4741_v34 = vand.u32 4294901760, %v4740_v28  ;;  %v14773_v6 = vand.u32 4294901760, %v14772_v29  ;;  %v14775_v30 = vand.u32 4294901760, %v14774_v58  ;;  %v4788_v10 = vand.u32 4294901760, %v12629_v15  ;;  %v14777_v59 = vld [vmem:[#allocation46_spill] sm:$0xff] }
 0x3bb   :  { %v12653_v53 = vpack.c.bf16 %v14768_v47, %v14766_v37  ;;  %v12662_v56 = vpack.c.bf16 %v4727_v9, %v4720_v39  ;;  %v4761_v37 = vsub.f32 %v12565_v2, %v14173_v41  ;;  %v4795_v47 = vand.u32 4294901760, %v12619_v5  ;;  %v14782_v58 = vld [vmem:[#allocation91_spill] sm:$0xff] }
 0x3bc   :  { %v12668_v32 = vpack.c.bf16 %v14775_v30, %v14773_v6  ;;  %v4748_v12 = vand.u32 4294901760, %v4747_v38  ;;  %4078 = vmatmul.mubr.f32.vlgmr.msra.gmra.mrb[34].mxu1 %v14777_v59  ;;  %v12676_v39 = vpack.c.bf16 %v4741_v34, %v4734_v27  ;;  %v14779_v28 = vand.u32 4294901760, %v12556_v50  ;;  %v14780_v30 = vld [vmem:[#allocation92_spill] sm:$0xff]  ;;  %v14789_v27 = vld [vmem:[#allocation74_spill] sm:$0xff] }
 0x3bd   :  { %14769 = vst [vmem:[#allocation4_spill] sm:$0xff] %v12653_v53  ;;  %14771 = vst [vmem:[#allocation53_spill] sm:$0xff] %v12662_v56  ;;  %v4755_v53 = vand.u32 4294901760, %v4754_v0  ;;  %v4762_v9 = vand.u32 4294901760, %v4761_v37  ;;  %v14781_v29 = vand.u32 4294901760, %v14780_v30  ;;  %v14785_v56 = vld [vmem:[#allocation95_spill] sm:$0xff] }
 0x3be   :  { %14776 = vst [vmem:[#allocation58_spill] sm:$0xff] %v12668_v32  ;;  %14778 = vst [vmem:[#allocation34_spill] sm:$0xff] %v12676_v39  ;;  %v4768_v6 = vsub.f32 %v12556_v50, %v14779_v28  ;;  %v14783_v32 = vand.u32 4294901760, %v14782_v58  ;;  %9168 = vmatpush3.bf16.msra.mxu1 %v14785_v56  ;;  %v14787_v38 = vand.u32 4294901760, %v14786_v14  ;;  %v14790_v37 = vand.u32 4294901760, %v12599_v35 }
 0x3bf   :  { %v12690_v0 = vpack.c.bf16 %v4755_v53, %v4748_v12  ;;  %9170 = vmatprep.subr.bf16.mxu1 %v14789_v27  ;;  %v14791_v30 = vand.u32 4294901760, %v12575_v60  ;;  %v4789_v12 = vsub.f32 %v12629_v15, %v4788_v10  ;;  %v4796_v53 = vsub.f32 %v12619_v5, %v4795_v47 }
 0x3c0   :  { %v12685_v41 = vpack.c.bf16 %v14783_v32, %v14781_v29  ;;  %4182 = vmatprep.mubr.f32.mxu1 %v14787_v38  ;;  %v4769_v34 = vand.u32 4294901760, %v4768_v6  ;;  %v4775_v28 = vsub.f32 %v12599_v35, %v14790_v37  ;;  %v14792_v32 = vld [vmem:[#allocation98_spill] sm:$0xff]  ;;  %v14798_v37 = vand.u32 4294901760, %v12437_v22 }
 0x3c1   :  { %14788 = vst [vmem:[#allocation65_spill] sm:$0xff] %v12690_v0  ;;  %v4782_v58 = vsub.f32 %v12575_v60, %v14791_v30  ;;  %v14793_v29 = vand.u32 4294901760, %v14792_v32  ;;  %v14799_v0 = vld [vmem:[#allocation101_spill] sm:$0xff]  ;;  %v14802_v30 = vld [vmem:[#allocation107_spill] sm:$0xff]  ;;  %v4790_v32 = vand.u32 4294901760, %v4789_v12  ;;  %v14816_v22 = vld [vmem:[#allocation78_spill] sm:$0xff] }
 0x3c2   :  { %14784 = vst [vmem:[#allocation50_spill] sm:$0xff] %v12685_v41  ;;  %v14794_v41 = vld [vmem:[#allocation97_spill] sm:$0xff]  ;;  %v12707_v14 = vpack.c.bf16 %v4769_v34, %v4762_v9  ;;  %v4776_v6 = vand.u32 4294901760, %v4775_v28  ;;  %v14800_v62 = vand.u32 4294901760, %v14799_v0  ;;  %9172 = vmatpush3.bf16.msra.mxu1 %v14802_v30  ;;  %v14814_v34 = vld [vmem:[#allocation7_spill] sm:$0xff]  ;;  %v14824_v63 = vand.u32 4294901760, %v12452_v21 }
 0x3c3   :  { %v14795_v39 = vand.u32 4294901760, %v14794_v41  ;;  %v4783_v38 = vand.u32 4294901760, %v4782_v58  ;;  %v4797_v41 = vand.u32 4294901760, %v4796_v53  ;;  %v14819_v53 = vld [vmem:[#allocation11_spill] sm:$0xff]  ;;  %v14820_v58 = vld [vmem:[#allocation85_spill] sm:$0xff]  ;;  %v14825_v12 = vand.u32 4294901760, %v12440_v61 }
 0x3c4   :  { %14797 = vst [vmem:[#allocation61_spill] sm:$0xff] %v12707_v14  ;;  %v12713_v13 = vpack.c.bf16 %v14800_v62, %v14798_v37  ;;  %v14817_v62 = vld [vmem:[#allocation82_spill] sm:$0xff]  ;;  %v14818_v37 = vld [vmem:[#allocation80_spill] sm:$0xff]  ;;  %v14823_v14 = vld [vmem:[#allocation89_spill] sm:$0xff]  ;;  %v14828_v1 = vand.u32 4294901760, %v12467_v43  ;;  %v14830_v28 = vand.u32 4294901760, %v12490_v44 }
 0x3c5   :  { %v12703_v57 = vpack.c.bf16 %v14795_v39, %v14793_v29  ;;  %v14803_v39 = vld [vmem:[#allocation8_spill] sm:$0xff]  ;;  %v12717_v29 = vpack.c.bf16 %v4783_v38, %v4776_v6  ;;  %v12725_v0 = vpack.c.bf16 %v4797_v41, %v4790_v32  ;;  %v14815_v41 = vld [vmem:[#allocation79_spill] sm:$0xff]  ;;  %v12759_v8 = vpack.c.bf16 %v14825_v12, %v14824_v63 }
 0x3c6   :  { %14801 = vst [vmem:[#allocation9_spill] sm:$0xff] %v12713_v13  ;;  %9174 = vmatprep.subr.bf16.mxu1 %v14803_v39  ;;  %v14821_v6 = vld [vmem:[#allocation83_spill] sm:$0xff]  ;;  %v14827_v38 = vand.u32 4294901760, %v12477_v3  ;;  %v14831_v23 = vand.u32 4294901760, %v12488_v31  ;;  %v14833_v13 = vand.u32 4294901760, %v12503_v42  ;;  %v14834_v15 = vand.u32 4294901760, %v12501_v40 }
 0x3c7   :  { %14796 = vst [vmem:[#allocation99_spill] sm:$0xff] %v12703_v57  ;;  %14804 = vst [vmem:[#allocation3_spill] sm:$0xff] %v12717_v29  ;;  %v14812_v57 = vld [vmem:[#allocation77_spill] sm:$0xff]  ;;  %v14813_v29 = vld [vmem:[#allocation76_spill] sm:$0xff]  ;;  %9176 = vmatpush3.bf16.msra.mxu1 %v14814_v34 }
 0x3c8   :  { %14807 = vst [vmem:[#allocation100_spill] sm:$0xff] %v12725_v0  ;;  %9178 = vmatprep.subr.bf16.mxu1 %v14819_v53  ;;  %v14822_v0 = vld [vmem:[#allocation94_spill] sm:$0xff]  ;;  %14826 = vst [vmem:[#allocation104_spill] sm:$0xff] %v12759_v8  ;;  %v12765_v9 = vpack.c.bf16 %v14828_v1, %v14827_v38  ;;  %v12771_v32 = vpack.c.bf16 %v14831_v23, %v14830_v28  ;;  %v12777_v5 = vpack.c.bf16 %v14834_v15, %v14833_v13 }
 0x3c9   :  { %v14836_v63 = vand.u32 4294901760, %v14812_v57  ;;  %v14837_v12 = vand.u32 4294901760, %v14813_v29  ;;  %v14839_v1 = vld [vmem:[#allocation10_spill] sm:$0xff]  ;;  %v14840_v38 = vand.u32 4294901760, %v12540_v18  ;;  %v14843_v28 = vand.u32 4294901760, %v14815_v41 }
 0x3ca   :  { %14829 = vst [vmem:[#allocation6_spill] sm:$0xff] %v12765_v9  ;;  %14832 = vst [vmem:[#allocation12_spill] sm:$0xff] %v12771_v32  ;;  %v14841_v9 = vand.u32 4294901760, %v12515_v16  ;;  %v14844_v32 = vand.u32 4294901760, %v14816_v22  ;;  %v14846_v15 = vand.u32 4294901760, %v12565_v2 }
 0x3cb   :  { %14835 = vst [vmem:[#allocation51_spill] sm:$0xff] %v12777_v5  ;;  %v12783_v8 = vpack.c.bf16 %v14837_v12, %v14836_v63  ;;  %9180 = vmatpush3.bf16.msra.mxu1 %v14839_v1  ;;  %v14847_v5 = vand.u32 4294901760, %v12556_v50  ;;  %v14849_v12 = vand.u32 4294901760, %v14817_v62 }
 0x3cc   :  { %v12790_v23 = vpack.c.bf16 %v14841_v9, %v14840_v38  ;;  %v12796_v13 = vpack.c.bf16 %v14844_v32, %v14843_v28  ;;  %v14852_v9 = vld [vmem:[#allocation16_spill] sm:$0xff]  ;;  %v14853_v38 = vand.u32 4294901760, %v12599_v35  ;;  %v14856_v28 = vand.u32 4294901760, %v14820_v58  ;;  %v14864_v35 = vld [vmem:[#allocation22_spill] sm:$0xff] }
 0x3cd   :  { %14838 = vst [vmem:[#allocation14_spill] sm:$0xff] %v12783_v8  ;;  %v12802_v63 = vpack.c.bf16 %v14847_v5, %v14846_v15  ;;  %v14850_v8 = vand.u32 4294901760, %v14818_v37  ;;  %9182 = vmatprep.subr.bf16.mxu1 %v14852_v9  ;;  %v12823_v15 = vpack.c.bf16 %v4795_v47, %v4788_v10  ;;  %v14869_v10 = vld [vmem:[#allocation35_spill] sm:$0xff]  ;;  %v14881_v37 = vld [vmem:[#allocation56_spill] sm:$0xff] }
 0x3ce   :  { %14842 = vst [vmem:[#allocation5_spill] sm:$0xff] %v12790_v23  ;;  %14845 = vst [vmem:[#allocation13_spill] sm:$0xff] %v12796_v13  ;;  %v14854_v23 = vand.u32 4294901760, %v12575_v60  ;;  %v14857_v13 = vand.u32 4294901760, %v14821_v6  ;;  %v14870_v47 = vand.u32 4294901760, %v14869_v10  ;;  %v14878_v6 = vand.u32 4294901760, %v14777_v59 }
 0x3cf   :  { %14848 = vst [vmem:[#allocation63_spill] sm:$0xff] %v12802_v63  ;;  %v12808_v18 = vpack.c.bf16 %v14850_v8, %v14849_v12  ;;  %14859 = vst [vmem:[#allocation15_spill] sm:$0xff] %v12823_v15  ;;  %v14860_v63 = vand.u32 4294901760, %v14822_v0  ;;  %v14861_v8 = vand.u32 4294901760, %v14823_v14  ;;  %v14873_v0 = vld [vmem:[#allocation29_spill] sm:$0xff]  ;;  %v14879_v60 = vld [vmem:[#allocation70_spill] sm:$0xff] }
 0x3d0   :  { %v12815_v32 = vpack.c.bf16 %v14854_v23, %v14853_v38  ;;  %v12821_v5 = vpack.c.bf16 %v14857_v13, %v14856_v28  ;;  %v14865_v23 = vld [vmem:[#allocation68_spill] sm:$0xff]  ;;  %v14866_v38 = vld [vmem:[#allocation25_spill] sm:$0xff]  ;;  %v14868_v13 = vld [vmem:[#allocation26_spill] sm:$0xff]  ;;  %v14880_v62 = vand.u32 4294901760, %v14879_v60  ;;  %v14882_v2 = vand.u32 4294901760, %v14881_v37 }
 0x3d1   :  { %14851 = vst [vmem:[#allocation19_spill] sm:$0xff] %v12808_v18  ;;  %v12829_v12 = vpack.c.bf16 %v14861_v8, %v14860_v63  ;;  %v14863_v18 = vld [vmem:[#allocation64_spill] sm:$0xff]  ;;  %v14871_v28 = vld [vmem:[#allocation33_spill] sm:$0xff]  ;;  %v14883_v10 = vld [vmem:[#allocation23_spill] sm:$0xff]  ;;  %v14888_v59 = vand.u32 4294901760, %v14648_v36 }
 0x3d2   :  { %14855 = vst [vmem:[#allocation17_spill] sm:$0xff] %v12815_v32  ;;  %14858 = vst [vmem:[#allocation69_spill] sm:$0xff] %v12821_v5  ;;  %9184 = vmatpush3.bf16.msra.mxu1 %v14863_v18  ;;  %v14867_v32 = vld [vmem:[#allocation20_spill] sm:$0xff]  ;;  %v14872_v15 = vand.u32 4294901760, %v14871_v28  ;;  %v9201_v50 = vpack.c.bf16 %v14882_v2, %v14880_v62  ;;  %v14891_v37 = vld [vmem:[#allocation102_spill] sm:$0xff]  ;;  %v14892_v2 = vand.u32 4294901760, %v14677_v19 }
 0x3d3   :  { %14862 = vst [vmem:[#allocation24_spill] sm:$0xff] %v12829_v12  ;;  %9186 = vmatprep.subr.bf16.mxu1 %v14864_v35  ;;  %v14874_v63 = vld [vmem:[#allocation96_spill] sm:$0xff]  ;;  %v14876_v12 = vld [vmem:[#allocation55_spill] sm:$0xff]  ;;  %v14894_v62 = vand.u32 4294901760, %v14690_v24  ;;  %v14896_v36 = vld [vmem:[#allocation105_spill] sm:$0xff]  ;;  %v14903_v24 = vand.u32 4294901760, %v14706_v25 }
 0x3d4   :  { %v9197_v5 = vpack.c.bf16 %v14872_v15, %v14870_v47  ;;  %v14875_v8 = vand.u32 4294901760, %v14874_v63  ;;  %v14877_v14 = vand.u32 4294901760, %v14876_v12  ;;  %v14884_v15 = vld [vmem:[#allocation108_spill] sm:$0xff]  ;;  %v14899_v19 = vld [vmem:[#allocation106_spill] sm:$0xff] }
 0x3d5   :  { %v14885_v47 = vand.u32 4294901760, %v14884_v15  ;;  %v14898_v15 = vand.u32 4294901760, %v14697_v33  ;;  %v14904_v33 = vld [vmem:[#allocation43_spill] sm:$0xff] }
 0x3d6   :  { %9188 = vmatpush3.bf16.msra.mxu1 %v14865_v23  ;;  %v9199_v58 = vpack.c.bf16 %v14877_v14, %v14875_v8  ;;  %v14889_v14 = vld [vmem:[#allocation111_spill] sm:$0xff]  ;;  %v14897_v8 = vand.u32 4294901760, %v14696_v48 }
 0x3d7   :  { %9190 = vmatprep.subr.bf16.mxu1 %v14866_v38 }
 0x3da   :  { %9192 = vmatpush3.bf16.msra.mxu1 %v14867_v32 }
 0x3db   :  { %9194 = vmatprep.subr.bf16.mxu1 %v14868_v13 }
 0x3de   :  { %9196 = vmatpush3.bf16.msra.mxu1 %v14873_v0 }
 0x3df   :  { %9198 = vmatprep.subr.bf16.mxu1 %v9197_v5  ;;  %v14886_v5 = vld [vmem:[#allocation103_spill] sm:$0xff] }
 0x3e0   :  { %v14887_v28 = vand.u32 4294901760, %v14886_v5 }
 0x3e1   :  { %4186 = vmatmul.mubr.f32.vlgmr.msra.gmra.mrb[36].mxu1 %v14878_v6  ;;  %v14890_v6 = vand.u32 4294901760, %v14889_v14  ;;  %v14918_v14 = vld [vmem:[#allocation57_spill] sm:$0xff] }
 0x3e2   :  { %9200 = vmatpush3.bf16.msra.mxu1 %v9199_v58  ;;  %4352 = vmatprep.mubr.f32.mxu1 %v14883_v10  ;;  %v9203_v63 = vpack.c.bf16 %v14887_v28, %v14885_v47  ;;  %v9219_v47 = vpack.c.bf16 %v14898_v15, %v14897_v8  ;;  %v14928_v15 = vld [vmem:[#allocation50_spill] sm:$0xff] }
 0x3e3   :  { %9202 = vmatprep.subr.bf16.mxu1 %v9201_v50  ;;  %v9207_v60 = vpack.c.bf16 %v14890_v6, %v14888_v59  ;;  %v14893_v50 = vand.u32 4294901760, %v14678_v11  ;;  %v14900_v11 = vand.u32 4294901760, %v14700_v52  ;;  %v14917_v59 = vld [vmem:[#allocation66_spill] sm:$0xff]  ;;  %v14919_v6 = vld [vmem:[#allocation27_spill] sm:$0xff] }
 0x3e5   :  { %v9211_v58 = vpack.c.bf16 %v14893_v50, %v14892_v2  ;;  %v14922_v2 = vld [vmem:[#allocation52_spill] sm:$0xff]  ;;  %v14923_v50 = vld [vmem:[#allocation34_spill] sm:$0xff] }
 0x3e6   :  { %9204 = vmatpush3.bf16.msra.mxu1 %v9203_v63  ;;  %v14916_v63 = vld [vmem:[#allocation93_spill] sm:$0xff] }
 0x3e7   :  { %9206 = vmatprep.subr.bf16.mxu1 %v12474_v45  ;;  %v14895_v45 = vand.u32 4294901760, %v14691_v26  ;;  %v14902_v26 = vand.u32 4294901760, %v14763_v46  ;;  %v14906_v46 = vld [vmem:[#allocation37_spill] sm:$0xff] }
 0x3e9   :  { %v9215_v12 = vpack.c.bf16 %v14895_v45, %v14894_v62  ;;  %v9227_v28 = vpack.c.bf16 %v14903_v24, %v14902_v26  ;;  %v14925_v62 = vld [vmem:[#allocation65_spill] sm:$0xff]  ;;  %v14926_v45 = vld [vmem:[#allocation58_spill] sm:$0xff]  ;;  %v14933_v26 = vpack.c.bf16 %v12440_v61, %v12452_v21  ;;  %v14941_v61 = vpack.c.bf16 %v12488_v31, %v12490_v44 }
 0x3ea   :  { %9208 = vmatpush3.bf16.msra.mxu1 %v9207_v60  ;;  %v14920_v60 = vld [vmem:[#allocation62_spill] sm:$0xff]  ;;  %v14949_v31 = vpack.c.bf16 %v14816_v22, %v14815_v41  ;;  %v14962_v41 = vld [vmem:[#allocation67_spill] sm:$0xff] }
 0x3eb   :  { %9210 = vmatprep.subr.bf16.mxu1 %v14891_v37  ;;  %v14921_v37 = vld [vmem:[#allocation53_spill] sm:$0xff]  ;;  %v14934_v24 = vld [vmem:[#allocation30_spill] sm:$0xff] }
 0x3ec   :  { %v14942_v21 = vld [vmem:[#allocation42_spill] sm:$0xff] }
 0x3ed   :  { %v14950_v44 = vld [vmem:[#allocation110_spill] sm:$0xff] }
 0x3ee   :  { %9212 = vmatpush3.bf16.msra.mxu1 %v9211_v58  ;;  %v14924_v58 = vld [vmem:[#allocation4_spill] sm:$0xff] }
 0x3ef   :  { %9214 = vmatprep.subr.bf16.mxu1 %v12499_v20  ;;  %v14901_v20 = vand.u32 4294901760, %v14701_v51  ;;  %v20_v51 = vld [vmem:[%s13722_s3 + $0x18] sm:$0xff] }
 0x3f0   :  { %v12900_v52 = vand.u32 4294901760, %v20_v51 }
 0x3f1   :  { %v9223_v5 = vpack.c.bf16 %v14901_v20, %v14900_v11  ;;  %v14930_v11 = vld [vmem:[#allocation99_spill] sm:$0xff]  ;;  %v14931_v20 = vld [vmem:[#allocation100_spill] sm:$0xff] }
 0x3f2   :  { %9216 = vmatpush3.bf16.msra.mxu1 %v9215_v12  ;;  %v12905_v48 = vsub.f32 %v20_v51, %v12900_v52  ;;  %v14927_v12 = vld [vmem:[#allocation61_spill] sm:$0xff]  ;;  %v14937_v51 = vpack.c.bf16 %v12467_v43, %v12477_v3  ;;  %v14946_v43 = vpack.c.bf16 %v14813_v29, %v14812_v57  ;;  %v14956_v57 = vld [vmem:[#allocation54_spill] sm:$0xff]  ;;  %v14957_v29 = vld [vmem:[#allocation60_spill] sm:$0xff] }
 0x3f3   :  { %9218 = vmatprep.subr.bf16.mxu1 %v14896_v36  ;;  %v14947_v3 = vld [vmem:[#allocation109_spill] sm:$0xff] }
 0x3f4   :  { %v4561_v25 = vand.u32 4294901760, %v12905_v48 }
 0x3f6   :  { %9220 = vmatpush3.bf16.msra.mxu1 %v9219_v47 }
 0x3f7   :  { %9222 = vmatprep.subr.bf16.mxu1 %v14899_v19  ;;  %v14929_v19 = vld [vmem:[#allocation3_spill] sm:$0xff] }
 0x3fa   :  { %9224 = vmatpush3.bf16.msra.mxu1 %v9223_v5  ;;  %v14932_v5 = vld [vmem:[#allocation9_spill] sm:$0xff] }
 0x3fb   :  { %9226 = vmatprep.subr.bf16.mxu1 %v12535_v17  ;;  %v4562_v17 = vsub.f32 %v12905_v48, %v4561_v25 }
 0x3fe   :  { %9228 = vmatpush3.bf16.msra.mxu1 %v9227_v28  ;;  %v14935_v28 = vld [vmem:[#allocation31_spill] sm:$0xff] }
 0x3ff   :  { %9230 = vmatprep.subr.bf16.mxu1 %v14770_v4  ;;  %v14907_v4 = vld [vmem:[#allocation41_spill] sm:$0xff] }
 0x401   :  { %4354 = vmatmul.mubr.f32.vlgmr.msra.gmra.mrb[38].mxu1 %v14904_v33 }
 0x402   :  { %9232 = vmatpush3.bf16.msra.mxu1 %v14785_v56  ;;  %4456 = vmatprep.mubr.f32.mxu1 %v14883_v10  ;;  %v19_v56 = vld [vmem:[%s13722_s3 + $0x10] sm:$0xff] }
 0x403   :  { %9234 = vmatprep.subr.bf16.mxu1 %v14789_v27  ;;  %v12928_v27 = vand.u32 4294901760, %v19_v56 }
 0x406   :  { %9236 = vmatpush3.bf16.msra.mxu1 %v14802_v30  ;;  %v14908_v30 = vld [vmem:[#allocation47_spill] sm:$0xff] }
 0x407   :  { %9238 = vmatprep.subr.bf16.mxu1 %v14803_v39  ;;  %v14909_v39 = vld [vmem:[#allocation112_spill] sm:$0xff] }
 0x40a   :  { %9240 = vmatpush3.bf16.msra.mxu1 %v14814_v34  ;;  %v12933_v34 = vsub.f32 %v19_v56, %v12928_v27 }
 0x40b   :  { %9242 = vmatprep.subr.bf16.mxu1 %v14819_v53  ;;  %v14911_v53 = vld [vmem:[#allocation49_spill] sm:$0xff] }
 0x40e   :  { %9244 = vmatpush3.bf16.msra.mxu1 %v14839_v1  ;;  %v4567_v1 = vand.u32 4294901760, %v12933_v34 }
 0x40f   :  { %9246 = vmatprep.subr.bf16.mxu1 %v14852_v9  ;;  %v14912_v9 = vld [vmem:[#allocation81_spill] sm:$0xff] }
 0x412   :  { %9248 = vmatpush3.bf16.msra.mxu1 %v14863_v18  ;;  %v4563_v18 = vand.u32 4294901760, %v4562_v17  ;;  %v14938_v17 = vld [vmem:[#allocation36_spill] sm:$0xff] }
 0x413   :  { %9250 = vmatprep.subr.bf16.mxu1 %v14864_v35  ;;  %v14905_v35 = vld [vmem:[#allocation28_spill] sm:$0xff] }
 0x416   :  { %9252 = vmatpush3.bf16.msra.mxu1 %v14865_v23  ;;  %v4568_v23 = vsub.f32 %v12933_v34, %v4567_v1 }
 0x417   :  { %9254 = vmatprep.subr.bf16.mxu1 %v14866_v38  ;;  %v14914_v38 = vld [vmem:[#allocation84_spill] sm:$0xff] }
 0x418   :  { %v4569_v10 = vand.u32 4294901760, %v4568_v23  ;;  %v14943_v23 = vld [vmem:[#allocation44_spill] sm:$0xff] }
 0x41a   :  { %9256 = vmatpush3.bf16.msra.mxu1 %v14867_v32  ;;  %v14913_v32 = vld [vmem:[#allocation59_spill] sm:$0xff] }
 0x41b   :  { %9258 = vmatprep.subr.bf16.mxu1 %v14868_v13  ;;  %v14915_v13 = vld [vmem:[#allocation71_spill] sm:$0xff] }
 0x41e   :  { %9260 = vmatpush3.bf16.msra.mxu1 %v14873_v0  ;;  %v14910_v0 = vld [vmem:[#allocation73_spill] sm:$0xff] }
 0x41f   :  { %9262 = vmatprep.subr.bf16.mxu1 %v12545_v7 }
 0x421   :  { %4458 = vmatmul.mubr.f32.vlgmr.msra.gmra.mrb[40].mxu1 %v14904_v33  ;;  %v14936_v33 = vpack.c.bf16 %v14934_v24, %v14935_v28 }
 0x422   :  { %9264 = vmatpush3.bf16.msra.mxu1 %v14905_v35  ;;  %4564 = vmatprep.mubr.f32.mxu1 %v4563_v18  ;;  %v14939_v18 = vld [vmem:[#allocation40_spill] sm:$0xff] }
 0x423   :  { %9266 = vmatprep.subr.bf16.mxu1 %v12552_v55  ;;  %v14940_v56 = vpack.c.bf16 %v14938_v17, %v14939_v18 }
 0x426   :  { %9268 = vmatpush3.bf16.msra.mxu1 %v14906_v46 }
 0x427   :  { %9270 = vmatprep.subr.bf16.mxu1 %v12554_v49 }
 0x42a   :  { %9272 = vmatpush3.bf16.msra.mxu1 %v14907_v4 }
 0x42b   :  { %9274 = vmatprep.subr.bf16.mxu1 %v12561_v54 }
 0x42e   :  { %9276 = vmatpush3.bf16.msra.mxu1 %v14908_v30 }
 0x42f   :  { %9278 = vmatprep.subr.bf16.mxu1 %v14909_v39 }
 0x432   :  { %9280 = vmatpush3.bf16.msra.mxu1 %v14910_v0 }
 0x433   :  { %9282 = vmatprep.subr.bf16.mxu1 %v14911_v53 }
 0x436   :  { %9284 = vmatpush3.bf16.msra.mxu1 %v14912_v9 }
 0x437   :  { %9286 = vmatprep.subr.bf16.mxu1 %v14913_v32 }
 0x43a   :  { %9288 = vmatpush3.bf16.msra.mxu1 %v14914_v38 }
 0x43b   :  { %9290 = vmatprep.subr.bf16.mxu1 %v14915_v13 }
 0x43e   :  { %9292 = vmatpush3.bf16.msra.mxu1 %v14916_v63 }
 0x43f   :  { %9294 = vmatprep.subr.bf16.mxu1 %v14917_v59  ;;  %v14945_v59 = vpack.c.bf16 %v12501_v40, %v12503_v42  ;;  %v14953_v42 = vld [vmem:[#allocation80_spill] sm:$0xff] }
 0x441   :  { %4570 = vmatmul.mubr.f32.vlgmr.msra.gmra.mrb[42].mxu1 %v4569_v10  ;;  %v14944_v10 = vpack.c.bf16 %v14942_v21, %v14943_v23 }
 0x442   :  { %9296 = vmatpush3.bf16.msra.mxu1 %v14918_v14  ;;  %4800 = vmatprep.mubr.f32.mxu1 %v12900_v52  ;;  %v14948_v14 = vpack.c.bf16 %v12515_v16, %v14947_v3 }
 0x443   :  { %9298 = vmatprep.subr.bf16.mxu1 %v14919_v6  ;;  %v14951_v6 = vld [vmem:[#allocation48_spill] sm:$0xff] }
 0x446   :  { %9300 = vmatpush3.bf16.msra.mxu1 %v14920_v60  ;;  %v14952_v60 = vpack.c.bf16 %v14950_v44, %v14951_v6 }
 0x447   :  { %9302 = vmatprep.subr.bf16.mxu1 %v14921_v37 }
 0x44a   :  { %9304 = vmatpush3.bf16.msra.mxu1 %v14922_v2 }
 0x44b   :  { %9306 = vmatprep.subr.bf16.mxu1 %v14923_v50  ;;  %v14954_v50 = vld [vmem:[#allocation82_spill] sm:$0xff] }
 0x44c   :  { %v7745_v36 = vpop.f32.mrb[30].mxu1 }
 0x44d   :  { %v7746_v8 = vpop.f32.mrb[31].mxu1 }
 0x44e   :  { %9308 = vmatpush3.bf16.msra.mxu1 %v14924_v58  ;;  %v7747_v47 = vadd.f32 %v7746_v8, %v7745_v36  ;;  %v14955_v58 = vpack.c.bf16 %v14953_v42, %v14954_v50  ;;  %v14963_v36 = vld [vmem:[#allocation72_spill] sm:$0xff] }
 0x44f   :  { %9310 = vmatprep.subr.bf16.mxu1 %v14925_v62  ;;  %v14958_v62 = vpack.c.bf16 %v14956_v57, %v14957_v29  ;;  %v14964_v8 = vpack.c.bf16 %v14962_v41, %v14963_v36 }
 0x452   :  { %9312 = vmatpush3.bf16.msra.mxu1 %v14926_v45  ;;  %v14959_v45 = vld [vmem:[#allocation83_spill] sm:$0xff] }
 0x453   :  { %9314 = vmatprep.subr.bf16.mxu1 %v14927_v12  ;;  %v14960_v12 = vld [vmem:[#allocation85_spill] sm:$0xff] }
 0x454   :  { %v14961_v22 = vpack.c.bf16 %v14959_v45, %v14960_v12  ;;  %v5336_v45 = vld [vmem:[%s13723_s2 + $0x58] sm:$0xff] }
 0x456   :  { %9316 = vmatpush3.bf16.msra.mxu1 %v14928_v15  ;;  %v14965_v15 = vld [vmem:[#allocation89_spill] sm:$0xff] }
 0x457   :  { %9318 = vmatprep.subr.bf16.mxu1 %v14929_v19  ;;  %v14966_v19 = vld [vmem:[#allocation94_spill] sm:$0xff] }
 0x45a   :  { %9320 = vmatpush3.bf16.msra.mxu1 %v14930_v11  ;;  %v14967_v11 = vpack.c.bf16 %v14965_v15, %v14966_v19  ;;  %v5396_v15 = vand.u32 4294901760, %v5336_v45  ;;  %v5335_v19 = vld [vmem:[%s13723_s2 + $0x50] sm:$0xff] }
 0x45b   :  { %9322 = vmatprep.subr.bf16.mxu1 %v14931_v20 }
 0x45e   :  { %9324 = vmatpush3.bf16.msra.mxu1 %v14932_v5  ;;  %v14968_v5 = vld [vmem:[#allocation104_spill] sm:$0xff] }
 0x45f   :  { %9326 = vmatprep.subr.bf16.mxu1 %v14933_v26  ;;  %v14969_v26 = vand.u32 4294901760, %v14935_v28  ;;  %v14975_v28 = vand.u32 4294901760, %v14943_v23  ;;  %v14983_v23 = vld [vmem:[#allocation17_spill] sm:$0xff] }
 0x461   :  { %4802 = vmatmul.mubr.f32.vlgmr.msra.gmra.mrb[44].mxu1 %v12928_v27 }
 0x462   :  { %9328 = vmatpush3.bf16.msra.mxu1 %v14936_v33  ;;  %4937 = vmatprep.mubr.f32.mxu1 %v12905_v48  ;;  %v14970_v33 = vand.u32 4294901760, %v14934_v24  ;;  %v14976_v24 = vand.u32 4294901760, %v14942_v21 }
 0x463   :  { %9330 = vmatprep.subr.bf16.mxu1 %v14937_v51 }
 0x464   :  { %v9391_v51 = vpack.c.bf16 %v14970_v33, %v14969_v26  ;;  %v9399_v3 = vpack.c.bf16 %v14976_v24, %v14975_v28  ;;  %v5351_v26 = vld [vmem:[%s13723_s2 + $0xd0] sm:$0xff]  ;;  %v5345_v33 = vld [vmem:[%s13723_s2 + $0xa0] sm:$0xff]  ;;  %v5356_v28 = vld [vmem:[%s13723_s2 + $0xf8] sm:$0xff] }
 0x465   :  { %v5361_v24 = vld [vmem:[%s13723_s2 + $0x120] sm:$0xff] }
 0x466   :  { %9332 = vmatpush3.bf16.msra.mxu1 %v14940_v56  ;;  %v14971_v56 = vld [vmem:[#allocation6_spill] sm:$0xff] }
 0x467   :  { %9334 = vmatprep.subr.bf16.mxu1 %v14941_v61  ;;  %v14972_v61 = vand.u32 4294901760, %v14939_v18  ;;  %v14981_v18 = vld [vmem:[#allocation63_spill] sm:$0xff] }
 0x46a   :  { %9336 = vmatpush3.bf16.msra.mxu1 %v14944_v10  ;;  %v14973_v10 = vand.u32 4294901760, %v14938_v17 }
 0x46b   :  { %9338 = vmatprep.subr.bf16.mxu1 %v14945_v59 }
 0x46c   :  { %v7780_v37 = vpop.f32.mrb[32].mxu1  ;;  %v9395_v59 = vpack.c.bf16 %v14973_v10, %v14972_v61 }
 0x46d   :  { %v7781_v2 = vpop.f32.mrb[33].mxu1 }
 0x46e   :  { %9340 = vmatpush3.bf16.msra.mxu1 %v14946_v43  ;;  %v7782_v40 = vadd.f32 %v7781_v2, %v7780_v37  ;;  %v14974_v43 = vld [vmem:[#allocation12_spill] sm:$0xff]  ;;  %v14984_v37 = vld [vmem:[#allocation69_spill] sm:$0xff]  ;;  %v14985_v2 = vld [vmem:[#allocation15_spill] sm:$0xff] }
 0x46f   :  { %9342 = vmatprep.subr.bf16.mxu1 %v14948_v14  ;;  %v14979_v14 = vld [vmem:[#allocation5_spill] sm:$0xff] }
 0x470   :  { %v3942_v16 = vadd.f32 %v7782_v40, %v7747_v47  ;;  %v14986_v40 = vld [vmem:[#allocation24_spill] sm:$0xff] }
 0x472   :  { %9344 = vmatpush3.bf16.msra.mxu1 %v14949_v31  ;;  %v14980_v31 = vld [vmem:[#allocation13_spill] sm:$0xff] }
 0x473   :  { %9346 = vmatprep.subr.bf16.mxu1 %v14952_v60  ;;  %v14982_v60 = vld [vmem:[#allocation19_spill] sm:$0xff] }
 0x476   :  { %9348 = vmatpush3.bf16.msra.mxu1 %v14955_v58 }
 0x477   :  { %9350 = vmatprep.subr.bf16.mxu1 %v14958_v62  ;;  %v5325_v62 = vld [vmem:[%s13723_s2] sm:$0xff] }
 0x478   :  { %v5390_v41 = vand.u32 4294901760, %v5325_v62 }
 0x47a   :  { %9352 = vmatpush3.bf16.msra.mxu1 %v14961_v22  ;;  %v13129_v61 = vsub.f32 %v5325_v62, %v5390_v41 }
 0x47b   :  { %9354 = vmatprep.subr.bf16.mxu1 %v14964_v8  ;;  %v5341_v8 = vld [vmem:[%s13723_s2 + $0x80] sm:$0xff] }
 0x47e   :  { %9356 = vmatpush3.bf16.msra.mxu1 %v14967_v11  ;;  %v5340_v11 = vld [vmem:[%s13723_s2 + $0x78] sm:$0xff] }
 0x47f   :  { %9358 = vmatprep.subr.bf16.mxu1 %v12545_v7 }
 0x481   :  { %4940 = vmatmul.mubr.f32.vlgmr.msra.gmra.mrb[46].mxu1 %v12933_v34  ;;  %v14977_v34 = vld [vmem:[#allocation51_spill] sm:$0xff] }
 0x482   :  { %9360 = vmatpush3.bf16.msra.mxu1 %v14905_v35  ;;  %5044 = vmatprep.mubr.f32.mxu1 %v4561_v25 }
 0x483   :  { %9362 = vmatprep.subr.bf16.mxu1 %v12552_v55 }
 0x486   :  { %9364 = vmatpush3.bf16.msra.mxu1 %v14906_v46 }
 0x487   :  { %9366 = vmatprep.subr.bf16.mxu1 %v12554_v49 }
 0x48a   :  { %9368 = vmatpush3.bf16.msra.mxu1 %v14907_v4 }
 0x48b   :  { %9370 = vmatprep.subr.bf16.mxu1 %v12561_v54 }
 0x48e   :  { %9372 = vmatpush3.bf16.msra.mxu1 %v14908_v30 }
 0x48f   :  { %9374 = vmatprep.subr.bf16.mxu1 %v14909_v39  ;;  %v7815_v48 = vpop.f32.mrb[34].mxu1 }
 0x490   :  { %v7816_v25 = vpop.f32.mrb[35].mxu1 }
 0x491   :  { %v7817_v47 = vadd.f32 %v7816_v25, %v7815_v48  ;;  %v14191_v48 = vmov 0.0   ;;  %v5400_v25 = vand.u32 4294901760, %v5341_v8 }
 0x492   :  { %9376 = vmatpush3.bf16.msra.mxu1 %v14910_v0 }
 0x493   :  { %9378 = vmatprep.subr.bf16.mxu1 %v14911_v53  ;;  %v4080_v20 = vadd.f32 %v7817_v47, %v3942_v16  ;;  %v5330_v16 = vld [vmem:[%s13723_s2 + $0x28] sm:$0xff]  ;;  %v5398_v47 = vand.u32 4294901760, %v5335_v19 }
 0x494   :  { %v5394_v36 = vand.u32 4294901760, %v5330_v16 }
 0x496   :  { %9380 = vmatpush3.bf16.msra.mxu1 %v14912_v9  ;;  %v13131_v10 = vsub.f32 %v5330_v16, %v5394_v36 }
 0x497   :  { %9382 = vmatprep.subr.bf16.mxu1 %v14913_v32 }
 0x49a   :  { %9384 = vmatpush3.bf16.msra.mxu1 %v14914_v38 }
 0x49b   :  { %9386 = vmatprep.subr.bf16.mxu1 %v14915_v13 }
 0x49e   :  { %9388 = vmatpush3.bf16.msra.mxu1 %v14916_v63 }
 0x49f   :  { %9390 = vmatprep.subr.bf16.mxu1 %v14968_v5  ;;  %v5346_v5 = vld [vmem:[%s13723_s2 + $0xa8] sm:$0xff] }
 0x4a1   :  { %5048 = vmatmul.mubr.f32.vlgmr.msra.gmra.mrb[48].mxu1 %v4567_v1  ;;  %v14978_v1 = vld [vmem:[#allocation14_spill] sm:$0xff] }
 0x4a2   :  { %9392 = vmatpush3.bf16.msra.mxu1 %v9391_v51  ;;  %5214 = vmatprep.mubr.f32.mxu1 %v12900_v52 }
 0x4a3   :  { %9394 = vmatprep.subr.bf16.mxu1 %v14971_v56  ;;  %v13127_v56 = vpack.c.bf16 %v5394_v36, %v5390_v41 }
 0x4a6   :  { %9396 = vmatpush3.bf16.msra.mxu1 %v9395_v59  ;;  %v13133_v59 = vsub.f32 %v5336_v45, %v5396_v15 }
 0x4a7   :  { %9398 = vmatprep.subr.bf16.mxu1 %v14974_v43  ;;  %v5350_v43 = vld [vmem:[%s13723_s2 + $0xc8] sm:$0xff] }
 0x4aa   :  { %9400 = vmatpush3.bf16.msra.mxu1 %v9399_v3  ;;  %v13144_v3 = vpack.c.bf16 %v5400_v25, %v5396_v15 }
 0x4ab   :  { %9402 = vmatprep.subr.bf16.mxu1 %v14977_v34  ;;  %v13146_v34 = vsub.f32 %v5341_v8, %v5400_v25 }
 0x4ae   :  { %9404 = vmatpush3.bf16.msra.mxu1 %v14978_v1 }
 0x4af   :  { %9406 = vmatprep.subr.bf16.mxu1 %v14979_v14  ;;  %v13150_v14 = vsub.f32 %v5335_v19, %v5398_v47 }
 0x4b2   :  { %9408 = vmatpush3.bf16.msra.mxu1 %v14980_v31  ;;  %v5355_v31 = vld [vmem:[%s13723_s2 + $0xf0] sm:$0xff] }
 0x4b3   :  { %9410 = vmatprep.subr.bf16.mxu1 %v14981_v18 }
 0x4b4   :  { %v7850_v17 = vpop.f32.mrb[36].mxu1 }
 0x4b5   :  { %v7851_v44 = vpop.f32.mrb[37].mxu1 }
 0x4b6   :  { %v7852_v6 = vadd.f32 %v7851_v44, %v7850_v17  ;;  %9412 = vmatpush3.bf16.msra.mxu1 %v14982_v60  ;;  %v5404_v17 = vand.u32 4294901760, %v5346_v5  ;;  %v5408_v44 = vand.u32 4294901760, %v5351_v26  ;;  %v5410_v60 = vand.u32 4294901760, %v5350_v43 }
 0x4b7   :  { %9414 = vmatprep.subr.bf16.mxu1 %v14983_v23  ;;  %v5412_v23 = vand.u32 4294901760, %v5356_v28 }
 0x4b8   :  { %v4188_v21 = vadd.f32 %v7852_v6, %v4080_v20  ;;  %v5402_v20 = vand.u32 4294901760, %v5340_v11  ;;  %v5406_v6 = vand.u32 4294901760, %v5345_v33 }
 0x4ba   :  { %9416 = vmatpush3.bf16.msra.mxu1 %v14984_v37  ;;  %v13148_v1 = vpack.c.bf16 %v5402_v20, %v5398_v47  ;;  %v13156_v18 = vsub.f32 %v5340_v11, %v5402_v20  ;;  %v5360_v37 = vld [vmem:[%s13723_s2 + $0x118] sm:$0xff] }
 0x4bb   :  { %9418 = vmatprep.subr.bf16.mxu1 %v14985_v2  ;;  %v5414_v2 = vand.u32 4294901760, %v5355_v31 }
 0x4bc   :  { %v5524_v15 = vand.u32 4294901760, %v13156_v18 }
 0x4be   :  { %9420 = vmatpush3.bf16.msra.mxu1 %v14986_v40  ;;  %v13162_v40 = vpack.c.bf16 %v5408_v44, %v5404_v17 }
 0x4bf   :  { %9422 = vmatprep.subr.bf16.mxu1 %v12545_v7 }
 0x4c1   :  { %5216 = vmatmul.mubr.f32.vlgmr.msra.gmra.mrb[50].mxu1 %v12928_v27 }
 0x4c2   :  { %9424 = vmatpush3.bf16.msra.mxu1 %v14905_v35  ;;  %5318 = vmatprep.mubr.f32.mxu1 %v12900_v52 }
 0x4c3   :  { %9426 = vmatprep.subr.bf16.mxu1 %v12552_v55 }
 0x4c6   :  { %9428 = vmatpush3.bf16.msra.mxu1 %v14906_v46 }
 0x4c7   :  { %9430 = vmatprep.subr.bf16.mxu1 %v12554_v49 }
 0x4ca   :  { %9432 = vmatpush3.bf16.msra.mxu1 %v14907_v4 }
 0x4cb   :  { %9434 = vmatprep.subr.bf16.mxu1 %v12561_v54 }
 0x4ce   :  { %9436 = vmatpush3.bf16.msra.mxu1 %v14908_v30 }
 0x4cf   :  { %9438 = vmatprep.subr.bf16.mxu1 %v14909_v39 }
 0x4d2   :  { %9440 = vmatpush3.bf16.msra.mxu1 %v14910_v0 }
 0x4d3   :  { %9442 = vmatprep.subr.bf16.mxu1 %v14911_v53 }
 0x4d4   :  { %v7885_v7 = vpop.f32.mrb[38].mxu1 }
 0x4d5   :  { %v7886_v52 = vpop.f32.mrb[39].mxu1 }
 0x4d6   :  { %v7887_v35 = vadd.f32 %v7886_v52, %v7885_v7  ;;  %9444 = vmatpush3.bf16.msra.mxu1 %v14912_v9  ;;  %v13164_v7 = vsub.f32 %v5346_v5, %v5404_v17  ;;  %v13166_v52 = vsub.f32 %v5351_v26, %v5408_v44 }
 0x4d7   :  { %9446 = vmatprep.subr.bf16.mxu1 %v14913_v32  ;;  %v5326_v32 = vld [vmem:[%s13723_s2 + $0x8] sm:$0xff] }
 0x4d8   :  { %v4356_v55 = vadd.f32 %v7887_v35, %v4188_v21  ;;  %v5416_v21 = vand.u32 4294901760, %v5361_v24  ;;  %v13168_v35 = vsub.f32 %v5345_v33, %v5406_v6  ;;  %v5530_v19 = vand.u32 4294901760, %v13164_v7 }
 0x4d9   :  { %v5525_v33 = vsub.f32 %v13156_v18, %v5524_v15 }
 0x4da   :  { %9448 = vmatpush3.bf16.msra.mxu1 %v14914_v38  ;;  %v5331_v38 = vld [vmem:[%s13723_s2 + $0x30] sm:$0xff] }
 0x4db   :  { %9450 = vmatprep.subr.bf16.mxu1 %v14915_v13  ;;  %v5526_v44 = vand.u32 4294901760, %v5525_v33 }
 0x4de   :  { %9452 = vmatpush3.bf16.msra.mxu1 %v14916_v63  ;;  %v5392_v63 = vand.u32 4294901760, %v5331_v38 }
 0x4e0   :  { %v13091_v29 = vsub.f32 %v5331_v38, %v5392_v63 }
 0x4e1   :  { %5320 = vmatmul.mubr.f32.vlgmr.msra.gmra.mrb[52].mxu1 %v12928_v27  ;;  %v5388_v27 = vand.u32 4294901760, %v5326_v32 }
 0x4e2   :  { %v5494_v22 = vand.u32 4294901760, %v13091_v29  ;;  %5468 = vmatprep.mubr.f32.mxu1 %v14191_v48 }
 0x4e3   :  { %v13087_v58 = vpack.c.bf16 %v5392_v63, %v5388_v27  ;;  %v13089_v57 = vsub.f32 %v5326_v32, %v5388_v27  ;;  %v5506_v32 = vand.u32 4294901760, %v13133_v59  ;;  %v5518_v27 = vand.u32 4294901760, %v13146_v34 }
 0x4e4   :  { %v14193_v63 = vand.u32 4294901760, %v13150_v14 }
 0x4e5   :  { %9454 = vmatprep.subr.bf16.mxu1 %v13087_v58  ;;  %v5482_v12 = vand.u32 4294901760, %v13089_v57  ;;  %v5507_v41 = vsub.f32 %v13133_v59, %v5506_v32  ;;  %v5519_v36 = vsub.f32 %v13146_v34, %v5518_v27 }
 0x4e6   :  { %9456 = vmatpush1.bf16.msra.mxu1 %v13127_v56  ;;  %v5513_v8 = vsub.f32 %v13150_v14, %v14193_v63  ;;  %v9489_v63 = vpack.c.bf16 %v13146_v34, %v13133_v59 }
 0x4e7   :  { %v5483_v51 = vsub.f32 %v13089_v57, %v5482_v12  ;;  %9458 = vmatprep.subr.bf16.mxu1 %v13144_v3  ;;  %v5508_v20 = vand.u32 4294901760, %v5507_v41  ;;  %v5520_v5 = vand.u32 4294901760, %v5519_v36 }
 0x4e8   :  { %v5514_v26 = vand.u32 4294901760, %v5513_v8 }
 0x4e9   :  { %v13223_v17 = vpack.c.bf16 %v5520_v5, %v5508_v20 }
 0x4ea   :  { %9460 = vmatpush1.bf16.msra.mxu1 %v13148_v1 }
 0x4eb   :  { %9462 = vmatprep.subr.bf16.mxu1 %v13162_v40 }
 0x4f4   :  { %v7920_v49 = vpop.f32.mrb[40].mxu1 }
 0x4f5   :  { %v7921_v54 = vpop.f32.mrb[41].mxu1 }
 0x4f6   :  { %v7922_v46 = vadd.f32 %v7921_v54, %v7920_v49  ;;  %v13172_v49 = vsub.f32 %v5350_v43, %v5410_v60  ;;  %v13174_v54 = vpack.c.bf16 %v5416_v21, %v5412_v23 }
 0x4f8   :  { %v4460_v4 = vadd.f32 %v7922_v46, %v4356_v55  ;;  %v13170_v55 = vpack.c.bf16 %v5410_v60, %v5406_v6  ;;  %v13176_v46 = vsub.f32 %v5356_v28, %v5412_v23  ;;  %v5542_v28 = vand.u32 4294901760, %v13166_v52 }
 0x4fa   :  { %9464 = vmatpush1.bf16.msra.mxu1 %v13170_v55  ;;  %v5554_v60 = vand.u32 4294901760, %v13176_v46  ;;  %v5543_v23 = vsub.f32 %v13166_v52, %v5542_v28 }
 0x4fb   :  { %9466 = vmatprep.subr.bf16.mxu1 %v13174_v54 }
 0x514   :  { %v7955_v30 = vpop.f32.mrb[42].mxu1 }
 0x515   :  { %v7956_v39 = vpop.f32.mrb[43].mxu1 }
 0x516   :  { %v7957_v0 = vadd.f32 %v7956_v39, %v7955_v30  ;;  %v5418_v30 = vand.u32 4294901760, %v5360_v37  ;;  %v13181_v39 = vsub.f32 %v5355_v31, %v5414_v2  ;;  %v5548_v31 = vand.u32 4294901760, %v13172_v49 }
 0x518   :  { %v4572_v53 = vadd.f32 %v7957_v0, %v4460_v4  ;;  %v13179_v4 = vsub.f32 %v5361_v24, %v5416_v21  ;;  %v5484_v0 = vand.u32 4294901760, %v5483_v51  ;;  %v13190_v38 = vpack.c.bf16 %v5418_v30, %v5414_v2 }
 0x519   :  { %v5531_v51 = vsub.f32 %v13164_v7, %v5530_v19  ;;  %v5536_v24 = vand.u32 4294901760, %v13168_v35 }
 0x51a   :  { %9468 = vmatpush1.bf16.msra.mxu1 %v13190_v38  ;;  %v5566_v2 = vand.u32 4294901760, %v13179_v4 }
 0x51b   :  { %v5532_v6 = vand.u32 4294901760, %v5531_v51  ;;  %v5537_v21 = vsub.f32 %v13168_v35, %v5536_v24 }
 0x51c   :  { %v5567_v36 = vsub.f32 %v13179_v4, %v5566_v2 }
 0x51e   :  { %v5568_v5 = vand.u32 4294901760, %v5567_v36  ;;  %v9497_v36 = vpack.c.bf16 %v13179_v4, %v13176_v46  ;;  %v9525_v4 = vpack.c.bf16 %v5542_v28, %v5530_v19  ;;  %v14988_v19 = vmov 0.0   ;;  %v5338_v28 = vld [vmem:[%s13723_s2 + $0x68] sm:$0xff] }
 0x534   :  { %v7990_v9 = vpop.f32.mrb[44].mxu1 }
 0x535   :  { %v7991_v42 = vpop.f32.mrb[45].mxu1 }
 0x536   :  { %v7992_v13 = vadd.f32 %v7991_v42, %v7990_v9  ;;  %v5488_v9 = vand.u32 4294901760, %v13129_v61  ;;  %v5500_v42 = vand.u32 4294901760, %v13131_v10 }
 0x538   :  { %v13085_v50 = vadd.f32 %v7992_v13, %v4572_v53  ;;  %v5495_v53 = vsub.f32 %v13091_v29, %v5494_v22  ;;  %v13192_v13 = vsub.f32 %v5360_v37, %v5418_v30  ;;  %v5489_v16 = vsub.f32 %v13129_v61, %v5488_v9 }
 0x539   :  { %v5501_v45 = vsub.f32 %v13131_v10, %v5500_v42  ;;  %v5549_v37 = vsub.f32 %v13172_v49, %v5548_v31  ;;  %v9475_v30 = vpack.c.bf16 %v5526_v44, %v5514_v26 }
 0x53a   :  { %v5496_v62 = vand.u32 4294901760, %v5495_v53  ;;  %v5490_v25 = vand.u32 4294901760, %v5489_v16  ;;  %v5560_v53 = vand.u32 4294901760, %v13181_v39  ;;  %v5544_v16 = vand.u32 4294901760, %v5543_v23 }
 0x53b   :  { %v5502_v47 = vand.u32 4294901760, %v5501_v45  ;;  %v5538_v45 = vand.u32 4294901760, %v5537_v21  ;;  %v5550_v41 = vand.u32 4294901760, %v5549_v37  ;;  %v9485_v23 = vpack.c.bf16 %v13091_v29, %v13089_v57 }
 0x53c   :  { %v9469_v11 = vpack.c.bf16 %v5496_v62, %v5484_v0  ;;  %v5555_v0 = vsub.f32 %v13176_v46, %v5554_v60  ;;  %v5572_v62 = vand.u32 4294901760, %v13192_v13  ;;  %v9487_v21 = vpack.c.bf16 %v13131_v10, %v13129_v61 }
 0x53d   :  { %v13217_v43 = vpack.c.bf16 %v5502_v47, %v5490_v25  ;;  %v9477_v47 = vpack.c.bf16 %v5544_v16, %v5532_v6  ;;  %v9479_v20 = vpack.c.bf16 %v5550_v41, %v5538_v45  ;;  %v9491_v6 = vpack.c.bf16 %v13156_v18, %v13150_v14 }
 0x53e   :  { %9470 = vmatprep.subr.bf16.mxu1 %v9469_v11  ;;  %v5556_v8 = vand.u32 4294901760, %v5555_v0  ;;  %v5561_v11 = vsub.f32 %v13181_v39, %v5560_v53  ;;  %v5573_v25 = vsub.f32 %v13192_v13, %v5572_v62  ;;  %v9493_v45 = vpack.c.bf16 %v13166_v52, %v13164_v7 }
 0x53f   :  { %v9495_v41 = vpack.c.bf16 %v13172_v49, %v13168_v35  ;;  %v9517_v18 = vpack.c.bf16 %v5494_v22, %v5482_v12  ;;  %v9521_v52 = vpack.c.bf16 %v5518_v27, %v5506_v32  ;;  %v14987_v35 = vand.u32 4294901760, %v13150_v14 }
 0x540   :  { %v5562_v33 = vand.u32 4294901760, %v5561_v11  ;;  %v5574_v51 = vand.u32 4294901760, %v5573_v25  ;;  %v9481_v48 = vpack.c.bf16 %v5568_v5, %v5556_v8  ;;  %v9499_v8 = vpack.c.bf16 %v13192_v13, %v13181_v39 }
 0x541   :  { %v9523_v49 = vpack.c.bf16 %v5524_v15, %v14987_v35  ;;  %v9527_v57 = vpack.c.bf16 %v5548_v31, %v5536_v24  ;;  %v9529_v39 = vpack.c.bf16 %v5566_v2, %v5554_v60  ;;  %v9531_v29 = vpack.c.bf16 %v5572_v62, %v5560_v53  ;;  %v5342_v24 = vld [vmem:[%s13723_s2 + $0x88] sm:$0xff]  ;;  %v5353_v53 = vld [vmem:[%s13723_s2 + $0xe0] sm:$0xff] }
 0x542   :  { %v9483_v0 = vpack.c.bf16 %v5574_v51, %v5562_v33  ;;  %v6049_v51 = vand.u32 4294901760, %v5342_v24 }
 0x554   :  { %v8025_v26 = vpop.f32.mrb[46].mxu1 }
 0x555   :  { %v8026_v44 = vpop.f32.mrb[47].mxu1 }
 0x556   :  { %v8027_v37 = vadd.f32 %v8026_v44, %v8025_v26  ;;  %v5347_v44 = vld [vmem:[%s13723_s2 + $0xb0] sm:$0xff] }
 0x558   :  { %v4942_v16 = vadd.f32 %v8027_v37, %v13085_v50  ;;  %v9519_v50 = vpack.c.bf16 %v5500_v42, %v5488_v9 }
 0x574   :  { %v8060_v11 = vpop.f32.mrb[48].mxu1 }
 0x575   :  { %v8061_v25 = vpop.f32.mrb[49].mxu1 }
 0x576   :  { %v8062_v7 = vadd.f32 %v8061_v25, %v8060_v11  ;;  %v5358_v11 = vld [vmem:[%s13723_s2 + $0x108] sm:$0xff] }
 0x578   :  { %v5050_v46 = vadd.f32 %v8062_v7, %v4942_v16 }
 0x594   :  { %v8095_v12 = vpop.f32.mrb[50].mxu1 }
 0x595   :  { %v8096_v22 = vpop.f32.mrb[51].mxu1 }
 0x596   :  { %v8097_v61 = vadd.f32 %v8096_v22, %v8095_v12 }
 0x598   :  { %v5218_v13 = vadd.f32 %v8097_v61, %v5050_v46  ;;  %v5362_v46 = vld [vmem:[%s13723_s2 + $0x128] sm:$0xff] }
 0x5b4   :  { %v8130_v10 = vpop.f32.mrb[52].mxu1 }
 0x5b5   :  { %v8131_v9 = vpop.f32.mrb[53].mxu1 }
 0x5b6   :  { %v8132_v42 = vadd.f32 %v8131_v9, %v8130_v10 }
 0x5b8   :  { %v5322_v5 = vadd.f32 %v8132_v42, %v5218_v13 }
 0x5ba   :  { %v5386_v59 = vsel %vm98_vm0, %v5322_v5, 0  ;;  %v6065_v5 = vand.u32 4294901760, %v5362_v46 }
 0x5bb   :  { %v13268_v34 = vand.u32 4294901760, %v5386_v59 }
 0x5bd   :  { %v13271_v14 = vsub.f32 %v5386_v59, %v13268_v34 }
 0x5bf   :  { %v13274_v32 = vand.u32 4294901760, %v13271_v14 }
 0x5c1   :  { %v5472_v27 = vsub.f32 %v13271_v14, %v13274_v32 }
 0x5c3   :  { %v13278_v15 = vand.u32 4294901760, %v5472_v27 }
 0x5c5   :  { %5474 = vmatmul.mubr.f32.vlgmr.msra.gmra.mrb[54].mxu1 %v13278_v15 }
 0x5c6   :  { %9472 = vmatpush1.bf16.msra.mxu1 %v13217_v43  ;;  %5624 = vmatprep.mubr.f32.mxu1 %v14988_v19 }
 0x5c7   :  { %9474 = vmatprep.subr.bf16.mxu1 %v13223_v17 }
 0x5ca   :  { %9476 = vmatpush1.bf16.msra.mxu1 %v9475_v30  ;;  %v5348_v30 = vld [vmem:[%s13723_s2 + $0xb8] sm:$0xff] }
 0x5cb   :  { %9478 = vmatprep.subr.bf16.mxu1 %v9477_v47  ;;  %v6043_v47 = vand.u32 4294901760, %v5338_v28  ;;  %v6051_v37 = vand.u32 4294901760, %v5348_v30 }
 0x5cd   :  { %v13399_v61 = vsub.f32 %v5348_v30, %v6051_v37 }
 0x5ce   :  { %9480 = vmatpush1.bf16.msra.mxu1 %v9479_v20 }
 0x5cf   :  { %9482 = vmatprep.subr.bf16.mxu1 %v9481_v48  ;;  %v5328_v48 = vld [vmem:[%s13723_s2 + $0x18] sm:$0xff] }
 0x5d2   :  { %9484 = vmatpush1.bf16.msra.mxu1 %v9483_v0  ;;  %v6055_v0 = vand.u32 4294901760, %v5353_v53 }
 0x5d3   :  { %9486 = vmatprep.subr.bf16.mxu1 %v9485_v23  ;;  %v5352_v23 = vld [vmem:[%s13723_s2 + $0xd8] sm:$0xff] }
 0x5d4   :  { %v13380_v35 = vpack.c.bf16 %v6055_v0, %v6051_v37  ;;  %v13401_v13 = vsub.f32 %v5353_v53, %v6055_v0  ;;  %v13444_v37 = vsub.f32 %v5362_v46, %v6065_v5 }
 0x5d5   :  { %5626 = vmatmul.mubr.f32.vlgmr.msra.gmra.mrb[54].mxu1 %v13268_v34 }
 0x5d6   :  { %9488 = vmatpush1.bf16.msra.mxu1 %v9487_v21  ;;  %5728 = vmatprep.mubr.f32.mxu1 %v14988_v19  ;;  %v13353_v21 = vsub.f32 %v5338_v28, %v6043_v47 }
 0x5d7   :  { %9490 = vmatprep.subr.bf16.mxu1 %v9489_v63  ;;  %v5333_v63 = vld [vmem:[%s13723_s2 + $0x40] sm:$0xff] }
 0x5d8   :  { %v6039_v43 = vand.u32 4294901760, %v5333_v63 }
 0x5da   :  { %9492 = vmatpush1.bf16.msra.mxu1 %v9491_v6  ;;  %v13332_v17 = vsub.f32 %v5333_v63, %v6039_v43 }
 0x5db   :  { %9494 = vmatprep.subr.bf16.mxu1 %v9493_v45 }
 0x5dc   :  { %v6141_v45 = vand.u32 4294901760, %v13332_v17 }
 0x5de   :  { %9496 = vmatpush1.bf16.msra.mxu1 %v9495_v41  ;;  %v6142_v22 = vsub.f32 %v13332_v17, %v6141_v45 }
 0x5df   :  { %9498 = vmatprep.subr.bf16.mxu1 %v9497_v36  ;;  %v6053_v36 = vand.u32 4294901760, %v5347_v44 }
 0x5e1   :  { %v13405_v9 = vsub.f32 %v5347_v44, %v6053_v36 }
 0x5e2   :  { %9500 = vmatpush1.bf16.msra.mxu1 %v9499_v8  ;;  %v6057_v8 = vand.u32 4294901760, %v5352_v23 }
 0x5e3   :  { %9502 = vmatprep.subr.bf16.mxu1 %v13087_v58 }
 0x5e4   :  { %v13403_v10 = vpack.c.bf16 %v6057_v8, %v6053_v36  ;;  %v6183_v36 = vand.u32 4294901760, %v13405_v9 }
 0x5e5   :  { %5731 = vmatmul.mubr.f32.vlgmr.msra.gmra.mrb[54].mxu1 %v13271_v14 }
 0x5e6   :  { %9504 = vmatpush1.bf16.msra.mxu1 %v13127_v56  ;;  %5817 = vmatprep.mubr.f32.mxu1 %v14988_v19 }
 0x5e7   :  { %9506 = vmatprep.subr.bf16.mxu1 %v13144_v3 }
 0x5ea   :  { %9508 = vmatpush1.bf16.msra.mxu1 %v13148_v1 }
 0x5eb   :  { %9510 = vmatprep.subr.bf16.mxu1 %v13162_v40 }
 0x5ee   :  { %9512 = vmatpush1.bf16.msra.mxu1 %v13170_v55 }
 0x5ef   :  { %9514 = vmatprep.subr.bf16.mxu1 %v13174_v54 }
 0x5f2   :  { %9516 = vmatpush1.bf16.msra.mxu1 %v13190_v38 }
 0x5f3   :  { %9518 = vmatprep.subr.bf16.mxu1 %v9517_v18 }
 0x5f5   :  { %5821 = vmatmul.mubr.f32.vlgmr.msra.gmra.mrb[54].mxu1 %v13274_v32 }
 0x5f6   :  { %9520 = vmatpush1.bf16.msra.mxu1 %v9519_v50  ;;  %5939 = vmatprep.mubr.f32.mxu1 %v14988_v19 }
 0x5f7   :  { %9522 = vmatprep.subr.bf16.mxu1 %v9521_v52  ;;  %v13378_v52 = vsub.f32 %v5342_v24, %v6049_v51 }
 0x5fa   :  { %9524 = vmatpush1.bf16.msra.mxu1 %v9523_v49  ;;  %v5357_v49 = vld [vmem:[%s13723_s2 + $0x100] sm:$0xff] }
 0x5fb   :  { %9526 = vmatprep.subr.bf16.mxu1 %v9525_v4  ;;  %v6153_v4 = vand.u32 4294901760, %v13353_v21  ;;  %v6061_v42 = vand.u32 4294901760, %v5357_v49 }
 0x5fd   :  { %v13433_v30 = vpack.c.bf16 %v6065_v5, %v6061_v42  ;;  %v13435_v53 = vsub.f32 %v5357_v49, %v6061_v42  ;;  %v6184_v42 = vsub.f32 %v13405_v9, %v6183_v36 }
 0x5fe   :  { %9528 = vmatpush1.bf16.msra.mxu1 %v9527_v57 }
 0x5ff   :  { %9530 = vmatprep.subr.bf16.mxu1 %v9529_v39  ;;  %v6059_v39 = vand.u32 4294901760, %v5358_v11 }
 0x602   :  { %9532 = vmatpush1.bf16.msra.mxu1 %v9531_v29 }
 0x603   :  { %9534 = vmatprep.subr.bf16.mxu1 %v13087_v58  ;;  %v6035_v58 = vand.u32 4294901760, %v5328_v48 }
 0x605   :  { %5941 = vmatmul.mubr.f32.vlgmr.msra.gmra.mrb[54].mxu1 %v13268_v34  ;;  %v13330_v31 = vsub.f32 %v5328_v48, %v6035_v58  ;;  %v13341_v62 = vpack.c.bf16 %v6039_v43, %v6035_v58  ;;  %v6154_v48 = vsub.f32 %v13353_v21, %v6153_v4  ;;  %v6171_v43 = vand.u32 4294901760, %v13378_v52 }
 0x606   :  { %9536 = vmatpush1.bf16.msra.mxu1 %v13127_v56  ;;  %6027 = vmatprep.mubr.f32.mxu1 %v14988_v19  ;;  %v5327_v56 = vld [vmem:[%s13723_s2 + $0x10] sm:$0xff] }
 0x607   :  { %9538 = vmatprep.subr.bf16.mxu1 %v13144_v3  ;;  %v5332_v3 = vld [vmem:[%s13723_s2 + $0x38] sm:$0xff]  ;;  %v6037_v60 = vand.u32 4294901760, %v5327_v56  ;;  %v6129_v16 = vand.u32 4294901760, %v13330_v31 }
 0x608   :  { %v6041_v2 = vand.u32 4294901760, %v5332_v3 }
 0x609   :  { %v13343_v20 = vsub.f32 %v5327_v56, %v6037_v60  ;;  %v6130_v12 = vsub.f32 %v13330_v31, %v6129_v16  ;;  %v13422_v56 = vsub.f32 %v5352_v23, %v6057_v8  ;;  %v6172_v23 = vsub.f32 %v13378_v52, %v6171_v43 }
 0x60a   :  { %9540 = vmatpush1.bf16.msra.mxu1 %v13148_v1  ;;  %v5343_v1 = vld [vmem:[%s13723_s2 + $0x90] sm:$0xff]  ;;  %v13345_v26 = vsub.f32 %v5332_v3, %v6041_v2  ;;  %v13358_v6 = vpack.c.bf16 %v6041_v2, %v6037_v60  ;;  %v6177_v60 = vand.u32 4294901760, %v13399_v61  ;;  %v6189_v2 = vand.u32 4294901760, %v13401_v13 }
 0x60b   :  { %9542 = vmatprep.subr.bf16.mxu1 %v13162_v40  ;;  %v5337_v40 = vld [vmem:[%s13723_s2 + $0x60] sm:$0xff]  ;;  %v6135_v50 = vand.u32 4294901760, %v13343_v20  ;;  %v6131_v28 = vand.u32 4294901760, %v6130_v12  ;;  %v6195_v8 = vand.u32 4294901760, %v13422_v56 }
 0x60c   :  { %v6045_v33 = vand.u32 4294901760, %v5337_v40  ;;  %v6147_v7 = vand.u32 4294901760, %v13345_v26 }
 0x60d   :  { %v6136_v59 = vsub.f32 %v13343_v20, %v6135_v50  ;;  %v6196_v5 = vsub.f32 %v13422_v56, %v6195_v8 }
 0x60e   :  { %9544 = vmatpush1.bf16.msra.mxu1 %v13170_v55  ;;  %v6047_v55 = vand.u32 4294901760, %v5343_v1  ;;  %v13371_v25 = vpack.c.bf16 %v6049_v51, %v6045_v33  ;;  %v13373_v18 = vsub.f32 %v5337_v40, %v6045_v33  ;;  %v6148_v27 = vsub.f32 %v13345_v26, %v6147_v7 }
 0x60f   :  { %9546 = vmatprep.subr.bf16.mxu1 %v13174_v54  ;;  %v13427_v40 = vsub.f32 %v5358_v11, %v6059_v39  ;;  %v6155_v33 = vand.u32 4294901760, %v6154_v48  ;;  %v6178_v11 = vsub.f32 %v13399_v61, %v6177_v60 }
 0x610   :  { %v13355_v54 = vsub.f32 %v5343_v1, %v6047_v55  ;;  %v13363_v41 = vpack.c.bf16 %v6047_v55, %v6043_v47  ;;  %v6159_v58 = vand.u32 4294901760, %v13373_v18  ;;  %v6143_v1 = vand.u32 4294901760, %v6142_v22 }
 0x611   :  { %v6137_v47 = vand.u32 4294901760, %v6136_v59  ;;  %v6149_v55 = vand.u32 4294901760, %v6148_v27  ;;  %v6201_v49 = vand.u32 4294901760, %v13427_v40  ;;  %v6173_v22 = vand.u32 4294901760, %v6172_v23 }
 0x612   :  { %9548 = vmatpush1.bf16.msra.mxu1 %v13190_v38  ;;  %v5363_v38 = vld [vmem:[%s13723_s2 + $0x130] sm:$0xff]  ;;  %v6165_v57 = vand.u32 4294901760, %v13355_v54  ;;  %v6160_v44 = vsub.f32 %v13373_v18, %v6159_v58  ;;  %v9565_v0 = vpack.c.bf16 %v6143_v1, %v6131_v28  ;;  %v6207_v59 = vand.u32 4294901760, %v13435_v53 }
 0x613   :  { %9550 = vmatprep.subr.bf16.mxu1 %v13341_v62  ;;  %v6063_v29 = vand.u32 4294901760, %v5363_v38  ;;  %v14194_v27 = vand.u32 4294901760, %v13444_v37  ;;  %v6179_v48 = vand.u32 4294901760, %v6178_v11  ;;  %v6202_v28 = vsub.f32 %v13427_v40, %v6201_v49 }
 0x614   :  { %v6166_v63 = vsub.f32 %v13355_v54, %v6165_v57  ;;  %v6161_v12 = vand.u32 4294901760, %v6160_v44 }
 0x615   :  { %6029 = vmatmul.mubr.f32.vlgmr.msra.gmra.mrb[54].mxu1 %v13268_v34  ;;  %v13424_v3 = vpack.c.bf16 %v6063_v29, %v6059_v39  ;;  %v13429_v24 = vsub.f32 %v5363_v38, %v6063_v29  ;;  %v6190_v38 = vsub.f32 %v13401_v13, %v6189_v2  ;;  %v9567_v39 = vpack.c.bf16 %v6149_v55, %v6137_v47 }
 0x616   :  { %9552 = vmatpush1.bf16.msra.mxu1 %v13358_v6  ;;  %6115 = vmatprep.mubr.f32.mxu1 %v14988_v19  ;;  %v6167_v51 = vand.u32 4294901760, %v6166_v63  ;;  %v9571_v47 = vpack.c.bf16 %v6173_v22, %v6161_v12  ;;  %v6185_v55 = vand.u32 4294901760, %v6184_v42  ;;  %v6220_v44 = vsub.f32 %v13444_v37, %v14194_v27 }
 0x617   :  { %9554 = vmatprep.subr.bf16.mxu1 %v13363_v41  ;;  %v6213_v46 = vand.u32 4294901760, %v13429_v24  ;;  %v6191_v63 = vand.u32 4294901760, %v6190_v38  ;;  %v9583_v27 = vpack.c.bf16 %v13345_v26, %v13343_v20  ;;  %v9623_v20 = vpack.c.bf16 %v6195_v8, %v6183_v36 }
 0x618   :  { %v9569_v29 = vpack.c.bf16 %v6167_v51, %v6155_v33  ;;  %v6197_v33 = vand.u32 4294901760, %v6196_v5  ;;  %v6208_v51 = vsub.f32 %v13435_v53, %v6207_v59  ;;  %v9581_v5 = vpack.c.bf16 %v13332_v17, %v13330_v31 }
 0x619   :  { %v6214_v1 = vsub.f32 %v13429_v24, %v6213_v46  ;;  %v9573_v23 = vpack.c.bf16 %v6191_v63, %v6179_v48  ;;  %v9587_v48 = vpack.c.bf16 %v13378_v52, %v13373_v18  ;;  %v9589_v63 = vpack.c.bf16 %v13401_v13, %v13399_v61  ;;  %v5354_v61 = vld [vmem:[%s13723_s2 + $0xe8] sm:$0xff] }
 0x61a   :  { %9556 = vmatpush1.bf16.msra.mxu1 %v13371_v25  ;;  %v9575_v38 = vpack.c.bf16 %v6197_v33, %v6185_v55  ;;  %v6209_v12 = vand.u32 4294901760, %v6208_v51  ;;  %v9615_v55 = vpack.c.bf16 %v6147_v7, %v6135_v50  ;;  %v9617_v33 = vpack.c.bf16 %v6165_v57, %v6153_v4  ;;  %v5349_v57 = vld [vmem:[%s13723_s2 + $0xc0] sm:$0xff] }
 0x61b   :  { %9558 = vmatprep.subr.bf16.mxu1 %v13380_v35  ;;  %v6215_v11 = vand.u32 4294901760, %v6214_v1  ;;  %v9593_v1 = vpack.c.bf16 %v13429_v24, %v13427_v40  ;;  %v9619_v31 = vpack.c.bf16 %v6171_v43, %v6159_v58  ;;  %v9621_v17 = vpack.c.bf16 %v6189_v2, %v6177_v60  ;;  %v5364_v58 = vld [vmem:[%s13723_s2 + $0x138] sm:$0xff] }
 0x61c   :  { %v9625_v26 = vpack.c.bf16 %v6213_v46, %v6201_v49  ;;  %v10158_v4 = vmov 0.0|0.0   ;;  %v6695_v40 = vand.u32 4294901760, %v5349_v57  ;;  %v6698_v24 = vand.u32 4294901760, %v5354_v61 }
 0x61d   :  { %v6704_v2 = vand.u32 4294901760, %v5364_v58 }
 0x61e   :  { %9560 = vmatpush1.bf16.msra.mxu1 %v13403_v10  ;;  %v13605_v8 = vpack.c.bf16 %v6698_v24, %v6695_v40  ;;  %v13607_v49 = vsub.f32 %v5349_v57, %v6695_v40  ;;  %v13609_v46 = vsub.f32 %v5354_v61, %v6698_v24 }
 0x61f   :  { %9562 = vmatprep.subr.bf16.mxu1 %v13424_v3 }
 0x622   :  { %9564 = vmatpush1.bf16.msra.mxu1 %v13433_v30 }
 0x623   :  { %9566 = vmatprep.subr.bf16.mxu1 %v9565_v0  ;;  %v6203_v0 = vand.u32 4294901760, %v6202_v28  ;;  %v9591_v28 = vpack.c.bf16 %v13422_v56, %v13405_v9  ;;  %v5359_v9 = vld [vmem:[%s13723_s2 + $0x110] sm:$0xff] }
 0x624   :  { %v6701_v60 = vand.u32 4294901760, %v5359_v9 }
 0x625   :  { %6121 = vmatmul.mubr.f32.vlgmr.msra.gmra.mrb[56].mxu1 %v13278_v15  ;;  %v9577_v22 = vpack.c.bf16 %v6215_v11, %v6203_v0 }
 0x626   :  { %9568 = vmatpush1.bf16.msra.mxu1 %v9567_v39  ;;  %6271 = vmatprep.mubr.f32.mxu1 %v14988_v19  ;;  %v6221_v39 = vand.u32 4294901760, %v6220_v44  ;;  %v13621_v11 = vsub.f32 %v5359_v9, %v6701_v60 }
 0x627   :  { %9570 = vmatprep.subr.bf16.mxu1 %v9569_v29  ;;  %v9585_v29 = vpack.c.bf16 %v13355_v54, %v13353_v21  ;;  %v14989_v21 = vand.u32 4294901760, %v13444_v37 }
 0x628   :  { %v9579_v42 = vpack.c.bf16 %v6221_v39, %v6209_v12  ;;  %v6796_v12 = vand.u32 4294901760, %v13607_v49  ;;  %v6803_v39 = vand.u32 4294901760, %v13609_v46 }
 0x629   :  { %v9627_v54 = vpack.c.bf16 %v14989_v21, %v6207_v59  ;;  %v13612_v59 = vpack.c.bf16 %v6704_v2, %v6701_v60 }
 0x62a   :  { %9572 = vmatpush1.bf16.msra.mxu1 %v9571_v47  ;;  %v9613_v47 = vpack.c.bf16 %v6141_v45, %v6129_v16  ;;  %v5329_v16 = vld [vmem:[%s13723_s2 + $0x20] sm:$0xff] }
 0x62b   :  { %9574 = vmatprep.subr.bf16.mxu1 %v9573_v23  ;;  %v6683_v45 = vand.u32 4294901760, %v5329_v16 }
 0x62d   :  { %v13563_v18 = vsub.f32 %v5329_v16, %v6683_v45 }
 0x62e   :  { %9576 = vmatpush1.bf16.msra.mxu1 %v9575_v38  ;;  %v13623_v38 = vsub.f32 %v5364_v58, %v6704_v2 }
 0x62f   :  { %9578 = vmatprep.subr.bf16.mxu1 %v9577_v22  ;;  %v6768_v43 = vand.u32 4294901760, %v13563_v18 }
 0x630   :  { %v9679_v16 = vpack.c.bf16 %v13623_v38, %v13621_v11 }
 0x632   :  { %9580 = vmatpush1.bf16.msra.mxu1 %v9579_v42 }
 0x633   :  { %9582 = vmatprep.subr.bf16.mxu1 %v9581_v5 }
 0x635   :  { %6273 = vmatmul.mubr.f32.vlgmr.msra.gmra.mrb[56].mxu1 %v13268_v34 }
 0x636   :  { %9584 = vmatpush1.bf16.msra.mxu1 %v9583_v27  ;;  %6375 = vmatprep.mubr.f32.mxu1 %v14988_v19  ;;  %v9595_v27 = vpack.c.bf16 %v13444_v37, %v13435_v53 }
 0x637   :  { %9586 = vmatprep.subr.bf16.mxu1 %v9585_v29  ;;  %v6797_v29 = vsub.f32 %v13607_v49, %v6796_v12 }
 0x63a   :  { %9588 = vmatpush1.bf16.msra.mxu1 %v9587_v48  ;;  %v6804_v48 = vsub.f32 %v13609_v46, %v6803_v39 }
 0x63b   :  { %9590 = vmatprep.subr.bf16.mxu1 %v9589_v63  ;;  %v6810_v63 = vand.u32 4294901760, %v13621_v11 }
 0x63e   :  { %9592 = vmatpush1.bf16.msra.mxu1 %v9591_v28  ;;  %v6817_v28 = vand.u32 4294901760, %v13623_v38 }
 0x63f   :  { %9594 = vmatprep.subr.bf16.mxu1 %v9593_v1 }
 0x642   :  { %9596 = vmatpush1.bf16.msra.mxu1 %v9595_v27  ;;  %v6798_v27 = vand.u32 4294901760, %v6797_v29 }
 0x643   :  { %9598 = vmatprep.subr.bf16.mxu1 %v13341_v62 }
 0x645   :  { %6378 = vmatmul.mubr.f32.vlgmr.msra.gmra.mrb[56].mxu1 %v13271_v14 }
 0x646   :  { %9600 = vmatpush1.bf16.msra.mxu1 %v13358_v6  ;;  %6464 = vmatprep.mubr.f32.mxu1 %v14988_v19 }
 0x647   :  { %9602 = vmatprep.subr.bf16.mxu1 %v13363_v41 }
 0x64a   :  { %9604 = vmatpush1.bf16.msra.mxu1 %v13371_v25 }
 0x64b   :  { %9606 = vmatprep.subr.bf16.mxu1 %v13380_v35 }
 0x64e   :  { %9608 = vmatpush1.bf16.msra.mxu1 %v13403_v10 }
 0x64f   :  { %9610 = vmatprep.subr.bf16.mxu1 %v13424_v3 }
 0x652   :  { %9612 = vmatpush1.bf16.msra.mxu1 %v13433_v30 }
 0x653   :  { %9614 = vmatprep.subr.bf16.mxu1 %v9613_v47  ;;  %v6805_v47 = vand.u32 4294901760, %v6804_v48 }
 0x655   :  { %6468 = vmatmul.mubr.f32.vlgmr.msra.gmra.mrb[56].mxu1 %v13274_v32 }
 0x656   :  { %9616 = vmatpush1.bf16.msra.mxu1 %v9615_v55  ;;  %6586 = vmatprep.mubr.f32.mxu1 %v14988_v19  ;;  %v6811_v55 = vsub.f32 %v13621_v11, %v6810_v63 }
 0x657   :  { %9618 = vmatprep.subr.bf16.mxu1 %v9617_v33  ;;  %v6818_v33 = vsub.f32 %v13623_v38, %v6817_v28 }
 0x65a   :  { %9620 = vmatpush1.bf16.msra.mxu1 %v9619_v31  ;;  %v9664_v31 = vpack.c.bf16 %v6805_v47, %v6798_v27 }
 0x65b   :  { %9622 = vmatprep.subr.bf16.mxu1 %v9621_v17  ;;  %v6812_v17 = vand.u32 4294901760, %v6811_v55 }
 0x65e   :  { %9624 = vmatpush1.bf16.msra.mxu1 %v9623_v20  ;;  %v6819_v20 = vand.u32 4294901760, %v6818_v33 }
 0x65f   :  { %9626 = vmatprep.subr.bf16.mxu1 %v9625_v26 }
 0x662   :  { %9628 = vmatpush1.bf16.msra.mxu1 %v9627_v54  ;;  %v9676_v54 = vpack.c.bf16 %v13609_v46, %v13607_v49 }
 0x663   :  { %9630 = vmatprep.subr.bf16.mxu1 %v13341_v62  ;;  %v5334_v62 = vld [vmem:[%s13723_s2 + $0x48] sm:$0xff] }
 0x665   :  { %6588 = vmatmul.mubr.f32.vlgmr.msra.gmra.mrb[56].mxu1 %v13268_v34 }
 0x666   :  { %9632 = vmatpush1.bf16.msra.mxu1 %v13358_v6  ;;  %6674 = vmatprep.mubr.f32.mxu1 %v14988_v19  ;;  %v6686_v6 = vand.u32 4294901760, %v5334_v62 }
 0x667   :  { %9634 = vmatprep.subr.bf16.mxu1 %v13363_v41  ;;  %v5339_v41 = vld [vmem:[%s13723_s2 + $0x70] sm:$0xff] }
 0x668   :  { %v13565_v50 = vsub.f32 %v5334_v62, %v6686_v6  ;;  %v13568_v7 = vpack.c.bf16 %v6686_v6, %v6683_v45  ;;  %v6689_v52 = vand.u32 4294901760, %v5339_v41  ;;  %v9700_v45 = vpack.c.bf16 %v6803_v39, %v6796_v12 }
 0x669   :  { %v9703_v6 = vpack.c.bf16 %v6817_v28, %v6810_v63 }
 0x66a   :  { %9636 = vmatpush1.bf16.msra.mxu1 %v13371_v25  ;;  %v5344_v25 = vld [vmem:[%s13723_s2 + $0x98] sm:$0xff]  ;;  %v13578_v13 = vsub.f32 %v5339_v41, %v6689_v52  ;;  %v6775_v56 = vand.u32 4294901760, %v13565_v50  ;;  %v9670_v26 = vpack.c.bf16 %v13565_v50, %v13563_v18 }
 0x66b   :  { %9638 = vmatprep.subr.bf16.mxu1 %v13380_v35  ;;  %v6692_v35 = vand.u32 4294901760, %v5344_v25 }
 0x66c   :  { %v6776_v53 = vsub.f32 %v13565_v50, %v6775_v56  ;;  %v6782_v37 = vand.u32 4294901760, %v13578_v13 }
 0x66e   :  { %9640 = vmatpush1.bf16.msra.mxu1 %v13403_v10  ;;  %v13580_v10 = vsub.f32 %v5344_v25, %v6692_v35  ;;  %v6777_v44 = vand.u32 4294901760, %v6776_v53  ;;  %v6783_v23 = vsub.f32 %v13578_v13, %v6782_v37  ;;  %v14990_v25 = vld [vmem:[#allocation45_spill] sm:$0xff] }
 0x66f   :  { %9642 = vmatprep.subr.bf16.mxu1 %v13424_v3  ;;  %v13591_v3 = vpack.c.bf16 %v6692_v35, %v6689_v52  ;;  %v7225_v52 = vsub.s32 4, %v14990_v25  ;;  %v10154_v35 = vld [vmem:[%s13722_s3 + $0x10] sm:$0xff]  ;;  %v7271_v47 = vsub.s32 5, %v14990_v25 }
 0x670   :  { %v6789_v36 = vand.u32 4294901760, %v13580_v10  ;;  %v6784_v42 = vand.u32 4294901760, %v6783_v23  ;;  %v9673_v21 = vpack.c.bf16 %v13580_v10, %v13578_v13  ;;  %v10156_v13 = vld [vmem:[%s13722_s3] sm:$0xff] }
 0x671   :  { %v7234_v40 = vrot.slane %v10154_v35, %v7225_v52  ;;  %v7272_v33 = vrot.slane %v10156_v13, %v7271_v47 }
 0x672   :  { %9644 = vmatpush1.bf16.msra.mxu1 %v13433_v30  ;;  %v6769_v30 = vsub.f32 %v13563_v18, %v6768_v43  ;;  %v6790_v0 = vsub.f32 %v13580_v10, %v6789_v36  ;;  %v9697_v62 = vpack.c.bf16 %v6789_v36, %v6782_v37  ;;  %v5367_v18 = vsub.s32 3, %v14990_v25 }
 0x673   :  { %9645 = vmatprep.subr.bf16.mxu1 %v10158_v4  ;;  %v7226_v10 = vrot.slane %v10156_v13, %v7225_v52 }
 0x674   :  { %v6770_v51 = vand.u32 4294901760, %v6769_v30  ;;  %v6791_v5 = vand.u32 4294901760, %v6790_v0  ;;  %v5368_v55 = vrot.slane %v10156_v13, %v5367_v18 }
 0x675   :  { %6676 = vmatmul.mubr.f32.vlgmr.msra.gmra.mrb[56].mxu1 %v13268_v34 }
 0x676   :  { %9647 = vmatpush3.bf16.msra.mxu1 %v13568_v7  ;;  %8875 = vmatprep.mubr.msk.f32.mxu1 %vm10159_vm1, %v14988_v19  ;;  %v9658_v22 = vpack.c.bf16 %v6777_v44, %v6770_v51  ;;  %v9661_v1 = vpack.c.bf16 %v6791_v5, %v6784_v42  ;;  %v10160_v42 = vmov 0  }
 0x677   :  { %9648 = vmatprep.subr.bf16.mxu1 %v10158_v4  ;;  %10148 = vset.pattern.permute.xlu0 %v10160_v42 }
 0x67a   :  { %9650 = vmatpush3.bf16.msra.mxu1 %v13591_v3 }
 0x67b   :  { %9651 = vmatprep.subr.bf16.mxu1 %v10158_v4 }
 0x67e   :  { %9653 = vmatpush3.bf16.msra.mxu1 %v13605_v8 }
 0x67f   :  { %9654 = vmatprep.subr.bf16.mxu1 %v10158_v4 }
 0x682   :  { %9656 = vmatpush3.bf16.msra.mxu1 %v13612_v59 }
 0x683   :  { %9657 = vmatprep.subr.bf16.mxu1 %v10158_v4 }
 0x685   :  { %8876 = vmatmul.mubr.f32.vlgmr.msra.gmra.mrb[58].mxu1 %v13278_v15  ;;  %v9667_v15 = vpack.c.bf16 %v6819_v20, %v6812_v17 }
 0x686   :  { %9659 = vmatpush3.bf16.msra.mxu1 %v9658_v22  ;;  %8894 = vmatprep.mubr.msk.f32.mxu1 %vm10159_vm1, %v14988_v19 }
 0x687   :  { %9660 = vmatprep.subr.bf16.mxu1 %v10158_v4 }
 0x68a   :  { %9662 = vmatpush3.bf16.msra.mxu1 %v9661_v1 }
 0x68b   :  { %9663 = vmatprep.subr.bf16.mxu1 %v10158_v4 }
 0x68e   :  { %9665 = vmatpush3.bf16.msra.mxu1 %v9664_v31 }
 0x68f   :  { %9666 = vmatprep.subr.bf16.mxu1 %v10158_v4 }
 0x692   :  { %9668 = vmatpush3.bf16.msra.mxu1 %v9667_v15 }
 0x693   :  { %9669 = vmatprep.subr.bf16.mxu1 %v10158_v4 }
 0x695   :  { %8895 = vmatmul.mubr.f32.vlgmr.msra.gmra.mrb[58].mxu1 %v13268_v34 }
 0x696   :  { %9671 = vmatpush3.bf16.msra.mxu1 %v9670_v26  ;;  %8913 = vmatprep.mubr.msk.f32.mxu1 %vm10159_vm1, %v14988_v19 }
 0x697   :  { %9672 = vmatprep.subr.bf16.mxu1 %v10158_v4 }
 0x69a   :  { %9674 = vmatpush3.bf16.msra.mxu1 %v9673_v21 }
 0x69b   :  { %9675 = vmatprep.subr.bf16.mxu1 %v10158_v4 }
 0x69e   :  { %9677 = vmatpush3.bf16.msra.mxu1 %v9676_v54 }
 0x69f   :  { %9678 = vmatprep.subr.bf16.mxu1 %v10158_v4 }
 0x6a2   :  { %9680 = vmatpush3.bf16.msra.mxu1 %v9679_v16 }
 0x6a3   :  { %9681 = vmatprep.subr.bf16.mxu1 %v10158_v4 }
 0x6a5   :  { %8914 = vmatmul.mubr.f32.vlgmr.msra.gmra.mrb[58].mxu1 %v13271_v14  ;;  %v9694_v14 = vpack.c.bf16 %v6775_v56, %v6768_v43 }
 0x6a6   :  { %9683 = vmatpush3.bf16.msra.mxu1 %v13568_v7  ;;  %8932 = vmatprep.mubr.msk.f32.mxu1 %vm10159_vm1, %v14988_v19 }
 0x6a7   :  { %9684 = vmatprep.subr.bf16.mxu1 %v10158_v4 }
 0x6aa   :  { %9686 = vmatpush3.bf16.msra.mxu1 %v13591_v3 }
 0x6ab   :  { %9687 = vmatprep.subr.bf16.mxu1 %v10158_v4 }
 0x6ae   :  { %9689 = vmatpush3.bf16.msra.mxu1 %v13605_v8 }
 0x6af   :  { %9690 = vmatprep.subr.bf16.mxu1 %v10158_v4 }
 0x6b2   :  { %9692 = vmatpush3.bf16.msra.mxu1 %v13612_v59 }
 0x6b3   :  { %9693 = vmatprep.subr.bf16.mxu1 %v10158_v4 }
 0x6b5   :  { %8933 = vmatmul.mubr.f32.vlgmr.msra.gmra.mrb[58].mxu1 %v13274_v32 }
 0x6b6   :  { %9695 = vmatpush3.bf16.msra.mxu1 %v9694_v14  ;;  %8951 = vmatprep.mubr.msk.f32.mxu1 %vm10159_vm1, %v14988_v19 }
 0x6b7   :  { %9696 = vmatprep.subr.bf16.mxu1 %v10158_v4 }
 0x6ba   :  { %9698 = vmatpush3.bf16.msra.mxu1 %v9697_v62 }
 0x6bb   :  { %9699 = vmatprep.subr.bf16.mxu1 %v10158_v4 }
 0x6be   :  { %9701 = vmatpush3.bf16.msra.mxu1 %v9700_v45 }
 0x6bf   :  { %9702 = vmatprep.subr.bf16.mxu1 %v10158_v4 }
 0x6c2   :  { %9704 = vmatpush3.bf16.msra.mxu1 %v9703_v6 }
 0x6c3   :  { %9705 = vmatprep.subr.bf16.mxu1 %v10158_v4 }
 0x6c5   :  { %8952 = vmatmul.mubr.f32.vlgmr.msra.gmra.mrb[58].mxu1 %v13268_v34 }
 0x6c6   :  { %9707 = vmatpush3.bf16.msra.mxu1 %v13568_v7  ;;  %8970 = vmatprep.mubr.msk.f32.mxu1 %vm10159_vm1, %v14988_v19  ;;  %v10153_v19 = vld [vmem:[%s13722_s3 + $0x8] sm:$0xff] }
 0x6c7   :  { %9708 = vmatprep.subr.bf16.mxu1 %v10158_v4  ;;  %v5372_v50 = vrot.slane %v10153_v19, %v5367_v18  ;;  %v7230_v43 = vrot.slane %v10153_v19, %v7225_v52 }
 0x6ca   :  { %9710 = vmatpush3.bf16.msra.mxu1 %v13591_v3 }
 0x6cb   :  { %9711 = vmatprep.subr.bf16.mxu1 %v10158_v4 }
 0x6ce   :  { %9713 = vmatpush3.bf16.msra.mxu1 %v13605_v8 }
 0x6cf   :  { %9714 = vmatprep.subr.bf16.mxu1 %v10158_v4  ;;  %v5376_v4 = vrot.slane %v10154_v35, %v5367_v18 }
 0x6d2   :  { %9716 = vmatpush3.bf16.msra.mxu1 %v13612_v59  ;;  %v21_v59 = vld [vmem:[%s13722_s3 + $0x20] sm:$0xff] }
 0x6d3   :  { %v5384_v51 = vrot.slane %v21_v59, %v5367_v18  ;;  %v7256_v5 = vrot.slane %v21_v59, %v7225_v52 }
 0x6d5   :  { %8971 = vmatmul.mubr.f32.vlgmr.msra.gmra.mrb[58].mxu1 %v13268_v34  ;;  %v10155_v34 = vld [vmem:[%s13722_s3 + $0x18] sm:$0xff] }
 0x6d6   :  { %v5380_v57 = vrot.slane %v10155_v34, %v5367_v18  ;;  %v7238_v11 = vrot.slane %v10155_v34, %v7225_v52 }
 0x6e8   :  { %v6030_v32 = vpop.f32.mrb[54].mxu1 }
 0x6e9   :  { %v6032_v41 = vpop.f32.mrb[55].mxu1  ;;  %v9819_v17 = vadd.f32 %v6030_v32, %v5368_v55 }
 0x6ea   :  { %v9820_v7 = vadd.f32 %v6032_v41, %v5372_v50 }
 0x6ec   :  { %v7219_v61 = vmax.f32 %v9820_v7, 0.0 }
 0x6ee   :  { %v7239_v24 = vmul.f32 %v7226_v10, %v7219_v61 }
 0x6f0   :  { %v7244_v37 = vsel %vm7243_vm2, %v7239_v24, 0.0 }
 0x748   :  { %v6677_v9 = vpop.f32.mrb[56].mxu1 }
 0x749   :  { %v9821_v58 = vadd.f32 %v6677_v9, %v5376_v4  ;;  %v6679_v56 = vpop.f32.mrb[57].mxu1 }
 0x74a   :  { %v9822_v3 = vadd.f32 %v6679_v56, %v5380_v57 }
 0x74b   :  { %v7220_v60 = vmax.f32 %v9821_v58, 0.0 }
 0x74c   :  { %v7221_v2 = vmax.f32 %v9822_v3, 0.0 }
 0x74d   :  { %v7240_v30 = vmul.f32 %v7230_v43, %v7220_v60 }
 0x74e   :  { %v7241_v53 = vmul.f32 %v7234_v40, %v7221_v2 }
 0x74f   :  { %v7245_v36 = vsel %vm7243_vm2, %v7240_v30, 0.0 }
 0x750   :  { %v7246_v8 = vadd.f32 %v7245_v36, %v7244_v37  ;;  %v7247_v49 = vsel %vm7243_vm2, %v7241_v53, 0.0 }
 0x752   :  { %v7248_v46 = vadd.f32 %v7247_v49, %v7246_v8 }
 0x7a8   :  { %v7215_v44 = vpop.f32.mrb[58].mxu1 }
 0x7a9   :  { %v9823_v23 = vadd.f32 %v7215_v44, %v5384_v51  ;;  %v8972_v0 = vpop.f32.mrb[59].mxu1 }
 0x7ab   :  { %v7222_v38 = vmax.f32 %v9823_v23, 0.0 }
 0x7ad   :  { %v7242_v12 = vmul.f32 %v7238_v11, %v7222_v38 }
 0x7af   :  { %v7249_v39 = vsel %vm7243_vm2, %v7242_v12, 0.0 }
 0x7b0   :  { %v7250_v22 = vadd.f32 %v7249_v39, %v7248_v46 }
 0x7b2   :  { %7251 = vadd.xlane.f32.xlu0 %v7250_v22 }
 0x83f   :  { %v7252_v29 = vpop.xlane.xlu0 %7251 }
 0x840   :  { %v7257_v48 = vadd.f32 %v7256_v5, %v7252_v29 }
 0x842   :  { %v7280_v63 = vmul.f32 -1.442695, %v7257_v48 }
 0x844   :  { %10149 = vpow2.f32 %v7280_v63 }
 0x84e   :  { %v10150_v28 = vpop.eup %10149 }
 0x84f   :  { %v7261_v1 = vadd.f32 1.0, %v10150_v28 }
 0x851   :  { %10151 = vrcp.f32 %v7261_v1 }
 0x85b   :  { %v10152_v27 = vpop.eup %10151 }
 0x85c   :  { %7266 = vperm.xlu0 %10148, %v10152_v27  }
 0x8db   :  { %v7267_v31 = vpop.permute.xlu0 %7266 }
 0x8dc   :  { %v7273_v20 = vmul.f32 %v7272_v33, %v7267_v31 }
 0x8de   :  { %v7274_v15 = vadd.f32 %v9819_v17, %v7273_v20 }
 0x8e0   :  { %7275 = vst [vmem:[%s13724_s4] sm:$0x3] %v7274_v15 }

</bundles_post_ra>
